<compile_context>
chip_gen: v7x
topology: tpu7x:2x2x1
jax: 0.10.0
libtpu: 0.0.40
codegen_flags: <defaults>
</compile_context>

<pallas_src>
import functools

import jax
import jax.numpy as jnp
from jax import lax
from jax.experimental import pallas as pl
from jax.experimental.pallas import tpu as pltpu

EPS = 1e-5


def _vmem_limit_bytes():
    # Per-generation scoped-VMEM budget: ~3/4 of physical VMEM (64 MiB on v7x,
    # 128 MiB on v5e/v6e), capped at 96 MiB; conservative fallback if the query
    # is unavailable (e.g. interpret mode / CPU).
    try:
        cap = int(pltpu.get_tpu_info().vmem_capacity_bytes)
        if cap <= 0:
            raise ValueError
    except Exception:
        cap = 64 * 1024 * 1024
    return int(min(cap * 3 // 4, 96 * 1024 * 1024))


def _compiler_params():
    return pltpu.CompilerParams(dimension_semantics=("parallel",),
                                vmem_limit_bytes=_vmem_limit_bytes())


# ----------------------------- kernel bodies --------------------------------

def _apply_bn_relu(y, ss_ref):
    """y: (R, C) bf16/f32. ss_ref: (2, C) f32, row0=scale, row1=shift."""
    return jnp.maximum(y * ss_ref[0:1, :] + ss_ref[1:2, :], 0.0)


def _emit_stats(y, s_ref, q_ref):
    # single-pass BN stats (per-channel sum and sum of squares) for this tile,
    # computed in f32 from the bf16-rounded values the next stage will read.
    s_ref[...] = jnp.sum(y, axis=0, keepdims=True)[None]
    q_ref[...] = jnp.sum(y * y, axis=0, keepdims=True)[None]


def _conv1x1_stats_kernel(x_ref, w_ref, b_ref, y_ref, s_ref, q_ref):
    # y = x @ w1 + b1  (bf16 operands on the MXU, f32 accumulation)
    y = jnp.dot(x_ref[...], w_ref[...],
                preferred_element_type=jnp.float32) + b_ref[...]
    yb = y.astype(jnp.bfloat16)          # bf16 HBM intermediate
    y_ref[...] = yb
    _emit_stats(yb.astype(jnp.float32), s_ref, q_ref)


def _bnrelu_conv1x1_stats_kernel(x_ref, ss_ref, w_ref, b_ref, y_ref, s_ref, q_ref):
    a = _apply_bn_relu(x_ref[...], ss_ref)               # f32
    y = jnp.dot(a.astype(jnp.bfloat16), w_ref[...],
                preferred_element_type=jnp.float32) + b_ref[...]
    yb = y.astype(jnp.bfloat16)
    y_ref[...] = yb
    _emit_stats(yb.astype(jnp.float32), s_ref, q_ref)


def _bnrelu_conv3x3_stats_kernel(y1_ref, ss_ref, w2_ref, b2_ref,
                                 y2_ref, s_ref, q_ref, im2col_ref, *, H, W):
    # One image per grid step, flattened to (H*W, C). The 3x3 / pad=1 conv is a
    # single im2col matmul with K = 9*C: 8 pltpu.roll shifts + lane-width-1
    # border masks, taps staged into a (HW, 9C) bf16 VMEM scratch.
    HW, C = y1_ref.shape
    a = _apply_bn_relu(y1_ref[...], ss_ref)              # (HW, C) f32

    # (HW, 1) border masks — skinny, computed once (not per tap, not full-width).
    flat = lax.broadcasted_iota(jnp.int32, (HW, 1), 0)
    col = flat % W                                       # once, lane-width-1
    row_ok = {-1: flat >= W, 0: None, 1: flat < HW - W}
    col_ok = {-1: col != 0, 0: None, 1: col != (W - 1)}

    # TODO(synk): on v6e/v7x the tap selects could run in bf16 (halves VPU work);
    # kept in f32 here for portability (v5e has no bf16 VALU).
    k = 0
    for dh in (-1, 0, 1):
        for dw in (-1, 0, 1):
            off = dh * W + dw
            tap = pltpu.roll(a, shift=(-off) % HW, axis=0) if off != 0 else a
            m = row_ok[dh]
            if col_ok[dw] is not None:
                m = col_ok[dw] if m is None else (m & col_ok[dw])
            if m is not None:
                tap = jnp.where(m, tap, 0.0)             # (HW,1) mask broadcast
            im2col_ref[:, k * C:(k + 1) * C] = tap.astype(jnp.bfloat16)
            k += 1

    y2 = jnp.dot(im2col_ref[...], w2_ref[...],
                 preferred_element_type=jnp.float32) + b2_ref[...]
    yb = y2.astype(jnp.bfloat16)
    y2_ref[...] = yb
    _emit_stats(yb.astype(jnp.float32), s_ref, q_ref)


def _bnrelu_scale_kernel(y_ref, ss_ref, o_ref):
    # out = relu(y*scale + shift); the final `relu(x3 + x3)` is folded into
    # (scale, shift) as an exact factor of 2 (relu(2z) == 2*relu(z)).
    o_ref[...] = _apply_bn_relu(y_ref[...], ss_ref).astype(o_ref.dtype)


# ----------------------------- pallas_call wrappers --------------------------

def _conv1x1_call(x2d, w_bf16, bias_1c, ss, *, tm):
    M, C = x2d.shape
    gm = M // tm
    row_spec = pl.BlockSpec((tm, C), lambda i: (i, 0))
    stat_spec = pl.BlockSpec((1, 1, C), lambda i: (i, 0, 0))
    w_spec = pl.BlockSpec((C, C), lambda i: (0, 0))
    b_spec = pl.BlockSpec((1, C), lambda i: (0, 0))
    out_shape = (jax.ShapeDtypeStruct((M, C), jnp.bfloat16),
                 jax.ShapeDtypeStruct((gm, 1, C), jnp.float32),
                 jax.ShapeDtypeStruct((gm, 1, C), jnp.float32))
    if ss is None:
        return pl.pallas_call(
            _conv1x1_stats_kernel, grid=(gm,),
            in_specs=[row_spec, w_spec, b_spec],
            out_specs=(row_spec, stat_spec, stat_spec),
            out_shape=out_shape,
            compiler_params=_compiler_params(),
        )(x2d, w_bf16, bias_1c)
    ss_spec = pl.BlockSpec((2, C), lambda i: (0, 0))
    return pl.pallas_call(
        _bnrelu_conv1x1_stats_kernel, grid=(gm,),
        in_specs=[row_spec, ss_spec, w_spec, b_spec],
        out_specs=(row_spec, stat_spec, stat_spec),
        out_shape=out_shape,
        compiler_params=_compiler_params(),
    )(x2d, ss, w_bf16, bias_1c)


def _conv3x3_call(y1_2d, ss, w2_flat, bias_1c, *, N, H, W):
    # TODO(synk): for tiny batches on v7x, split each image into row strips with a
    # 1-row halo so both TensorCores get >1 grid step; grid=(N,) is kept here
    # (realistic ResNet batches already give plenty of steps).
    HW = H * W
    C = y1_2d.shape[1]
    img_spec = pl.BlockSpec((HW, C), lambda n: (n, 0))
    stat_spec = pl.BlockSpec((1, 1, C), lambda n: (n, 0, 0))
    out_shape = (jax.ShapeDtypeStruct((N * HW, C), jnp.bfloat16),
                 jax.ShapeDtypeStruct((N, 1, C), jnp.float32),
                 jax.ShapeDtypeStruct((N, 1, C), jnp.float32))
    return pl.pallas_call(
        functools.partial(_bnrelu_conv3x3_stats_kernel, H=H, W=W), grid=(N,),
        in_specs=[img_spec,
                  pl.BlockSpec((2, C), lambda n: (0, 0)),
                  pl.BlockSpec((9 * C, C), lambda n: (0, 0)),
                  pl.BlockSpec((1, C), lambda n: (0, 0))],
        out_specs=(img_spec, stat_spec, stat_spec),
        out_shape=out_shape,
        scratch_shapes=[pltpu.VMEM((HW, 9 * C), jnp.bfloat16)],
        compiler_params=_compiler_params(),
    )(y1_2d, ss, w2_flat, bias_1c)


def _bnrelu_call(y2d, ss, *, tm):
    M, C = y2d.shape
    gm = M // tm
    row_spec = pl.BlockSpec((tm, C), lambda i: (i, 0))
    return pl.pallas_call(
        _bnrelu_scale_kernel, grid=(gm,),
        in_specs=[row_spec, pl.BlockSpec((2, C), lambda i: (0, 0))],
        out_specs=row_spec,
        out_shape=jax.ShapeDtypeStruct((M, C), jnp.float32),
        compiler_params=_compiler_params(),
    )(y2d, ss)


# ----------------------------- public forward --------------------------------

def block_forward(x_nhwc, w1, b1, w2, b2, gamma, beta, *, tm=1024):
    """`block.forward` in NHWC layout (channels on the lane dim).

    x_nhwc: (N, H, W, C) f32; w1: (C, C); w2: (3, 3, C, C) HWIO; b1/b2/gamma/beta: (C,).
    """
    N, H, W, C = x_nhwc.shape
    M = N * H * W
    HW = H * W
    tm = min(tm, M)
    assert M % tm == 0 and tm % 16 == 0, "pick tm dividing N*H*W, multiple of 16 (bf16 tiles)"
    assert HW % 16 == 0, "H*W must be a multiple of 16 (bf16 tiles)"
    assert C % 128 == 0, "channels must be lane-dense (multiple of 128)"

    w1b = w1.astype(jnp.bfloat16)                       # MXU operands in bf16
    w2b = w2.reshape(9 * C, C).astype(jnp.bfloat16)     # (kh, kw, cin) rows
    b1r = b1.reshape(1, C).astype(jnp.float32)
    b2r = b2.reshape(1, C).astype(jnp.float32)
    x2d = x_nhwc.reshape(M, C).astype(jnp.bfloat16)     # halve K1 input DMA

    def fold(s_part, q_part, k=1.0):
        # tiny (C,)-sized epilogue: fold training-mode BN + affine (+ optional
        # extra factor k) into a single per-channel (scale, shift) pair.
        ssum = jnp.sum(s_part, axis=(0, 1))
        qsum = jnp.sum(q_part, axis=(0, 1))
        mean = ssum / M
        var = jnp.maximum(qsum / M - mean * mean, 0.0)  # biased var (training BN)
        scale = gamma * lax.rsqrt(var + EPS)
        shift = beta - mean * scale
        return jnp.stack([k * scale, k * shift]).astype(jnp.float32)  # (2, C)

    # stage 1: y1 = conv1(x)
    y1, s1, q1 = _conv1x1_call(x2d, w1b, b1r, None, tm=tm)
    ss1 = fold(s1, q1)
    # stage 2: y2 = conv2(relu(bn1(y1)))
    y2, s2, q2 = _conv3x3_call(y1, ss1, w2b, b2r, N=N, H=H, W=W)
    ss2 = fold(s2, q2)
    # stage 3: y3 = conv1(relu(bn1(y2)))
    y3, s3, q3 = _conv1x1_call(y2, w1b, b1r, ss2, tm=tm)
    ss3 = fold(s3, q3, k=2.0)   # out = relu(x3 + x3) == 2 * relu(bn1(y3))
    # TODO(synk): identity_downsample (when not None) is not implemented.
    out2d = _bnrelu_call(y3, ss3, tm=tm)
    return out2d.reshape(N, H, W, C)


# ----------------------------- reference & test -------------------------------

def block_reference(x_nhwc, w1, b1, w2, b2, gamma, beta):
    """Pure-JAX NHWC reference with the same numerical contract as the kernel:
    matmul/conv operands and the HBM intermediates are rounded to bf16, while BN
    statistics, the BN affine and all accumulation stay in f32.  It uses the
    standard (unfolded, two-pass) BN formula, lax.conv for the 3x3, and the
    redundant final relu(x+x) — an independent check of the im2col/fold algebra."""
    bf = lambda a: a.astype(jnp.bfloat16)

    def bn_relu(y):   # training-mode BatchNorm2d + ReLU, stats over (N, H, W)
        y = y.astype(jnp.float32)
        mean = jnp.mean(y, axis=(0, 1, 2), keepdims=True)
        var = jnp.mean(jnp.square(y - mean), axis=(0, 1, 2), keepdims=True)
        return jnp.maximum((y - mean) * lax.rsqrt(var + EPS) * gamma + beta, 0.0)

    y1 = bf(jnp.einsum('nhwc,cd->nhwd', bf(x_nhwc), bf(w1),
                       preferred_element_type=jnp.float32) + b1)
    a1 = bn_relu(y1)
    y2 = bf(lax.conv_general_dilated(bf(a1), bf(w2), (1, 1), 'SAME',
                                     dimension_numbers=('NHWC', 'HWIO', 'NHWC'),
                                     preferred_element_type=jnp.float32) + b2)
    a2 = bn_relu(y2)
    y3 = bf(jnp.einsum('nhwc,cd->nhwd', bf(a2), bf(w1),
                       preferred_element_type=jnp.float32) + b1)
    a3 = bn_relu(y3)
    return jnp.maximum(a3 + a3, 0.0)


if __name__ == "__main__":
    # in_channels must equal out_channels for this forward to be shape-valid.
    # C = 128 keeps the channel (lane) dim fully dense and the MXU K dim full.
    N, H, W, C = 2, 16, 16, 128

    key = jax.random.PRNGKey(0)
    kx, kw1, kb1, kw2, kb2, kg, kb = jax.random.split(key, 7)
    x = jax.random.normal(kx, (N, H, W, C), jnp.float32)
    w1 = jax.random.normal(kw1, (C, C), jnp.float32) / jnp.sqrt(C)
    b1 = 0.1 * jax.random.normal(kb1, (C,), jnp.float32)
    w2 = jax.random.normal(kw2, (3, 3, C, C), jnp.float32) / jnp.sqrt(9 * C)
    b2 = 0.1 * jax.random.normal(kb2, (C,), jnp.float32)
    gamma = 1.0 + 0.1 * jax.random.normal(kg, (C,), jnp.float32)
    beta = 0.1 * jax.random.normal(kb, (C,), jnp.float32)

    out = jax.block_until_ready(jax.jit(block_forward)(x, w1, b1, w2, b2, gamma, beta))
    ref = block_reference(x, w1, b1, w2, b2, gamma, beta)

    assert out.shape == (N, H, W, C)
    assert bool(jnp.all(jnp.isfinite(out)))
    ref_range = float(jnp.max(jnp.abs(ref))) + 1e-6
    max_err = float(jnp.max(jnp.abs(out - ref)))
    # bf16 matmul operands + bf16 HBM intermediates cascaded through 3 convs and
    # 3 data-dependent BNs: allow 2% of output range (structural bugs give O(1)).
    assert max_err <= 2e-2 * ref_range, (
        f"mismatch: max|d|={max_err}, max|ref|={ref_range}")
    print("KERNEL_OK")
</pallas_src>

<mosaic_0001>
module attributes {stable_mosaic.version = 11 : i64} {
  func.func @_conv1x1_stats_kernel(%arg0: i32, %arg1: memref<512x128xbf16, #tpu.memory_space<vmem>>, %arg2: memref<128x128xbf16, #tpu.memory_space<vmem>>, %arg3: memref<1x128xf32, #tpu.memory_space<vmem>>, %arg4: memref<512x128xbf16, #tpu.memory_space<vmem>>, %arg5: memref<1x1x128xf32, #tpu.memory_space<vmem>>, %arg6: memref<1x1x128xf32, #tpu.memory_space<vmem>>) attributes {dimension_semantics = [#tpu.dimension_semantics<parallel>], iteration_bounds = array<i64: 1>, scalar_prefetch = 0 : i64, scratch_operands = 0 : i64, tpu.core_type = #tpu.core_type<tc>, window_params = [{transform_indices = @transform_0, window_bounds = array<i64: 512, 128>}, {pipeline_mode = #tpu.pipeline_mode<synchronous>, transform_indices = @transform_1, window_bounds = array<i64: 128, 128>}, {pipeline_mode = #tpu.pipeline_mode<synchronous>, transform_indices = @transform_2, window_bounds = array<i64: 1, 128>}, {transform_indices = @transform_3, window_bounds = array<i64: 512, 128>}, {transform_indices = @transform_4, window_bounds = array<i64: 1, 1, 128>}, {transform_indices = @transform_5, window_bounds = array<i64: 1, 1, 128>}]} {
    %c0 = arith.constant 0 : index
    %c0_0 = arith.constant 0 : index
    %0 = vector.load %arg1[%c0, %c0_0] : memref<512x128xbf16, #tpu.memory_space<vmem>>, vector<512x128xbf16>
    %c0_1 = arith.constant 0 : index
    %c0_2 = arith.constant 0 : index
    %1 = vector.load %arg2[%c0_1, %c0_2] : memref<128x128xbf16, #tpu.memory_space<vmem>>, vector<128x128xbf16>
    %cst = arith.constant dense<0.000000e+00> : vector<512x128xf32>
    %2 = tpu.matmul %0, %1, %cst {dimension_numbers = #tpu.dot_dimension_numbers<[1], [0], [0], [1], [0, 0, 1, 1], [], []>} : vector<512x128xbf16>, vector<128x128xbf16>, vector<512x128xf32> -> vector<512x128xf32>
    %c0_3 = arith.constant 0 : index
    %c0_4 = arith.constant 0 : index
    %3 = vector.load %arg3[%c0_3, %c0_4] : memref<1x128xf32, #tpu.memory_space<vmem>>, vector<1x128xf32>
    %4 = vector.broadcast %3 : vector<1x128xf32> to vector<512x128xf32>
    %5 = arith.addf %2, %4 : vector<512x128xf32>
    %6 = arith.truncf %5 : vector<512x128xf32> to vector<512x128xbf16>
    %c0_5 = arith.constant 0 : index
    %c0_6 = arith.constant 0 : index
    %7 = vector.load %arg4[%c0_5, %c0_6] : memref<512x128xbf16, #tpu.memory_space<vmem>>, vector<512x128xbf16>
    tpu.vector_store %arg4[%c0_5, %c0_6], %6 {strides = array<i32>} : memref<512x128xbf16, #tpu.memory_space<vmem>>, vector<512x128xbf16>,
    %8 = arith.extf %6 : vector<512x128xbf16> to vector<512x128xf32>
    %cst_7 = arith.constant dense<0.000000e+00> : vector<128xf32>
    %9 = vector.multi_reduction <add>, %8, %cst_7 [0] : vector<512x128xf32> to vector<128xf32>
    %10 = vector.shape_cast %9 : vector<128xf32> to vector<1x128xf32>
    %11 = vector.shape_cast %10 : vector<1x128xf32> to vector<1x1x128xf32>
    %c0_8 = arith.constant 0 : index
    %c0_9 = arith.constant 0 : index
    %c0_10 = arith.constant 0 : index
    %12 = vector.load %arg5[%c0_8, %c0_9, %c0_10] : memref<1x1x128xf32, #tpu.memory_space<vmem>>, vector<1x1x128xf32>
    tpu.vector_store %arg5[%c0_8, %c0_9, %c0_10], %11 {strides = array<i32>} : memref<1x1x128xf32, #tpu.memory_space<vmem>>, vector<1x1x128xf32>,
    %13 = arith.mulf %8, %8 : vector<512x128xf32>
    %cst_11 = arith.constant dense<0.000000e+00> : vector<128xf32>
    %14 = vector.multi_reduction <add>, %13, %cst_11 [0] : vector<512x128xf32> to vector<128xf32>
    %15 = vector.shape_cast %14 : vector<128xf32> to vector<1x128xf32>
    %16 = vector.shape_cast %15 : vector<1x128xf32> to vector<1x1x128xf32>
    %c0_12 = arith.constant 0 : index
    %c0_13 = arith.constant 0 : index
    %c0_14 = arith.constant 0 : index
    %17 = vector.load %arg6[%c0_12, %c0_13, %c0_14] : memref<1x1x128xf32, #tpu.memory_space<vmem>>, vector<1x1x128xf32>
    tpu.vector_store %arg6[%c0_12, %c0_13, %c0_14], %16 {strides = array<i32>} : memref<1x1x128xf32, #tpu.memory_space<vmem>>, vector<1x1x128xf32>,
    return
  }
  func.func @transform_0(%arg0: i32) -> (i32, i32) {
    %c0_i32 = arith.constant 0 : i32
    %c0_i32_0 = arith.constant 0 : i32
    return %arg0, %c0_i32 : i32, i32
  }
  func.func @transform_1(%arg0: i32) -> (i32, i32) {
    %c0_i32 = arith.constant 0 : i32
    %c0_i32_0 = arith.constant 0 : i32
    %c0_i32_1 = arith.constant 0 : i32
    return %c0_i32, %c0_i32_0 : i32, i32
  }
  func.func @transform_2(%arg0: i32) -> (i32, i32) {
    %c0_i32 = arith.constant 0 : i32
    %c0_i32_0 = arith.constant 0 : i32
    %c0_i32_1 = arith.constant 0 : i32
    return %c0_i32, %c0_i32_0 : i32, i32
  }
  func.func @transform_3(%arg0: i32) -> (i32, i32) {
    %c0_i32 = arith.constant 0 : i32
    %c0_i32_0 = arith.constant 0 : i32
    return %arg0, %c0_i32 : i32, i32
  }
  func.func @transform_4(%arg0: i32) -> (i32, i32, i32) {
    %c0_i32 = arith.constant 0 : i32
    %c0_i32_0 = arith.constant 0 : i32
    %c0_i32_1 = arith.constant 0 : i32
    return %arg0, %c0_i32, %c0_i32_0 : i32, i32, i32
  }
  func.func @transform_5(%arg0: i32) -> (i32, i32, i32) {
    %c0_i32 = arith.constant 0 : i32
    %c0_i32_0 = arith.constant 0 : i32
    %c0_i32_1 = arith.constant 0 : i32
    return %arg0, %c0_i32, %c0_i32_0 : i32, i32, i32
  }
}

module attributes {stable_mosaic.version = 11 : i64} {
  func.func @_bnrelu_conv3x3_stats_kernel(%arg0: i32, %arg1: memref<256x128xbf16, #tpu.memory_space<vmem>>, %arg2: memref<2x128xf32, #tpu.memory_space<vmem>>, %arg3: memref<1152x128xbf16, #tpu.memory_space<vmem>>, %arg4: memref<1x128xf32, #tpu.memory_space<vmem>>, %arg5: memref<256x128xbf16, #tpu.memory_space<vmem>>, %arg6: memref<1x1x128xf32, #tpu.memory_space<vmem>>, %arg7: memref<1x1x128xf32, #tpu.memory_space<vmem>>, %arg8: memref<256x1152xbf16, #tpu.memory_space<vmem>>) attributes {dimension_semantics = [#tpu.dimension_semantics<parallel>], iteration_bounds = array<i64: 2>, scalar_prefetch = 0 : i64, scratch_operands = 1 : i64, tpu.core_type = #tpu.core_type<tc>, window_params = [{transform_indices = @transform_0, window_bounds = array<i64: 256, 128>}, {pipeline_mode = #tpu.pipeline_mode<synchronous>, transform_indices = @transform_1, window_bounds = array<i64: 2, 128>}, {pipeline_mode = #tpu.pipeline_mode<synchronous>, transform_indices = @transform_2, window_bounds = array<i64: 1152, 128>}, {pipeline_mode = #tpu.pipeline_mode<synchronous>, transform_indices = @transform_3, window_bounds = array<i64: 1, 128>}, {transform_indices = @transform_4, window_bounds = array<i64: 256, 128>}, {transform_indices = @transform_5, window_bounds = array<i64: 1, 1, 128>}, {transform_indices = @transform_6, window_bounds = array<i64: 1, 1, 128>}]} {
    %c0 = arith.constant 0 : index
    %c0_0 = arith.constant 0 : index
    %0 = vector.load %arg1[%c0, %c0_0] : memref<256x128xbf16, #tpu.memory_space<vmem>>, vector<256x128xbf16>
    %c0_1 = arith.constant 0 : index
    %c0_2 = arith.constant 0 : index
    %1 = vector.load %arg2[%c0_1, %c0_2] : memref<2x128xf32, #tpu.memory_space<vmem>>, vector<1x128xf32>
    %2 = arith.extf %0 : vector<256x128xbf16> to vector<256x128xf32>
    %3 = vector.broadcast %1 : vector<1x128xf32> to vector<256x128xf32>
    %4 = arith.mulf %2, %3 : vector<256x128xf32>
    %c1 = arith.constant 1 : index
    %c0_3 = arith.constant 0 : index
    %5 = vector.load %arg2[%c1, %c0_3] : memref<2x128xf32, #tpu.memory_space<vmem>>, vector<1x128xf32>
    %6 = vector.broadcast %5 : vector<1x128xf32> to vector<256x128xf32>
    %7 = arith.addf %4, %6 : vector<256x128xf32>
    %cst = arith.constant 0.000000e+00 : f32
    %8 = vector.broadcast %cst : f32 to vector<256x128xf32>
    %9 = arith.maximumf %7, %8 : vector<256x128xf32>
    %10 = tpu.iota {dimensions = array<i32: 0>} : vector<256x1xi32>
    %c16_i32 = arith.constant 16 : i32
    %c0_i32 = arith.constant 0 : i32
    %11 = arith.cmpi eq, %c16_i32, %c0_i32 : i32
    %c1_i32 = arith.constant 1 : i32
    %12 = arith.select %11, %c1_i32, %c16_i32 : i32
    %13 = vector.broadcast %12 : i32 to vector<256x1xi32>
    %14 = arith.remsi %10, %13 : vector<256x1xi32>
    %c0_i32_4 = arith.constant 0 : i32
    %15 = vector.broadcast %c0_i32_4 : i32 to vector<256x1xi32>
    %16 = arith.cmpi ne, %14, %15 : vector<256x1xi32>
    %c0_i32_5 = arith.constant 0 : i32
    %17 = vector.broadcast %c0_i32_5 : i32 to vector<256x1xi32>
    %18 = arith.cmpi slt, %14, %17 : vector<256x1xi32>
    %c0_i32_6 = arith.constant 0 : i32
    %19 = arith.cmpi slt, %12, %c0_i32_6 : i32
    %20 = vector.broadcast %19 : i1 to vector<256x1xi1>
    %21 = vector.broadcast %20 : vector<256x1xi1> to vector<256x1xi1>
    %22 = arith.xori %18, %21 : vector<256x1xi1>
    %23 = arith.andi %22, %16 : vector<256x1xi1>
    %24 = vector.broadcast %12 : i32 to vector<256x1xi32>
    %25 = arith.addi %14, %24 : vector<256x1xi32>
    %26 = arith.select %23, %25, %14 : vector<256x1xi1>, vector<256x1xi32>
    %c16_i32_7 = arith.constant 16 : i32
    %27 = vector.broadcast %c16_i32_7 : i32 to vector<256x1xi32>
    %28 = arith.cmpi sge, %10, %27 : vector<256x1xi32>
    %c240_i32 = arith.constant 240 : i32
    %29 = vector.broadcast %c240_i32 : i32 to vector<256x1xi32>
    %30 = arith.cmpi slt, %10, %29 : vector<256x1xi32>
    %c0_i32_8 = arith.constant 0 : i32
    %31 = vector.broadcast %c0_i32_8 : i32 to vector<256x1xi32>
    %32 = arith.cmpi ne, %26, %31 : vector<256x1xi32>
    %c15_i32 = arith.constant 15 : i32
    %33 = vector.broadcast %c15_i32 : i32 to vector<256x1xi32>
    %34 = arith.cmpi ne, %26, %33 : vector<256x1xi32>
    %c17_i32 = arith.constant 17 : i32
    %35 = tpu.dynamic_rotate %9 by %c17_i32 dim 0 : vector<256x128xf32>, i32 -> vector<256x128xf32>
    %36 = arith.andi %28, %32 : vector<256x1xi1>
    %cst_9 = arith.constant 0.000000e+00 : f32
    %37 = vector.shape_cast %36 : vector<256x1xi1> to vector<256x1xi1>
    %38 = vector.broadcast %37 : vector<256x1xi1> to vector<256x128xi1>
    %39 = vector.broadcast %cst_9 : f32 to vector<256x128xf32>
    %40 = arith.select %38, %35, %39 : vector<256x128xi1>, vector<256x128xf32>
    %41 = arith.truncf %40 : vector<256x128xf32> to vector<256x128xbf16>
    %c0_10 = arith.constant 0 : index
    %c0_11 = arith.constant 0 : index
    %42 = vector.load %arg8[%c0_10, %c0_11] : memref<256x1152xbf16, #tpu.memory_space<vmem>>, vector<256x128xbf16>
    tpu.vector_store %arg8[%c0_10, %c0_11], %41 {strides = array<i32>} : memref<256x1152xbf16, #tpu.memory_space<vmem>>, vector<256x128xbf16>,
    %c16_i32_12 = arith.constant 16 : i32
    %43 = tpu.dynamic_rotate %9 by %c16_i32_12 dim 0 : vector<256x128xf32>, i32 -> vector<256x128xf32>
    %cst_13 = arith.constant 0.000000e+00 : f32
    %44 = vector.shape_cast %28 : vector<256x1xi1> to vector<256x1xi1>
    %45 = vector.broadcast %44 : vector<256x1xi1> to vector<256x128xi1>
    %46 = vector.broadcast %cst_13 : f32 to vector<256x128xf32>
    %47 = arith.select %45, %43, %46 : vector<256x128xi1>, vector<256x128xf32>
    %48 = arith.truncf %47 : vector<256x128xf32> to vector<256x128xbf16>
    %c0_14 = arith.constant 0 : index
    %c128 = arith.constant 128 : index
    %49 = vector.load %arg8[%c0_14, %c128] : memref<256x1152xbf16, #tpu.memory_space<vmem>>, vector<256x128xbf16>
    tpu.vector_store %arg8[%c0_14, %c128], %48 {strides = array<i32>} : memref<256x1152xbf16, #tpu.memory_space<vmem>>, vector<256x128xbf16>,
    %c15_i32_15 = arith.constant 15 : i32
    %50 = tpu.dynamic_rotate %9 by %c15_i32_15 dim 0 : vector<256x128xf32>, i32 -> vector<256x128xf32>
    %51 = arith.andi %28, %34 : vector<256x1xi1>
    %cst_16 = arith.constant 0.000000e+00 : f32
    %52 = vector.shape_cast %51 : vector<256x1xi1> to vector<256x1xi1>
    %53 = vector.broadcast %52 : vector<256x1xi1> to vector<256x128xi1>
    %54 = vector.broadcast %cst_16 : f32 to vector<256x128xf32>
    %55 = arith.select %53, %50, %54 : vector<256x128xi1>, vector<256x128xf32>
    %56 = arith.truncf %55 : vector<256x128xf32> to vector<256x128xbf16>
    %c0_17 = arith.constant 0 : index
    %c256 = arith.constant 256 : index
    %57 = vector.load %arg8[%c0_17, %c256] : memref<256x1152xbf16, #tpu.memory_space<vmem>>, vector<256x128xbf16>
    tpu.vector_store %arg8[%c0_17, %c256], %56 {strides = array<i32>} : memref<256x1152xbf16, #tpu.memory_space<vmem>>, vector<256x128xbf16>,
    %c1_i32_18 = arith.constant 1 : i32
    %58 = tpu.dynamic_rotate %9 by %c1_i32_18 dim 0 : vector<256x128xf32>, i32 -> vector<256x128xf32>
    %cst_19 = arith.constant 0.000000e+00 : f32
    %59 = vector.shape_cast %32 : vector<256x1xi1> to vector<256x1xi1>
    %60 = vector.broadcast %59 : vector<256x1xi1> to vector<256x128xi1>
    %61 = vector.broadcast %cst_19 : f32 to vector<256x128xf32>
    %62 = arith.select %60, %58, %61 : vector<256x128xi1>, vector<256x128xf32>
    %63 = arith.truncf %62 : vector<256x128xf32> to vector<256x128xbf16>
    %c0_20 = arith.constant 0 : index
    %c384 = arith.constant 384 : index
    %64 = vector.load %arg8[%c0_20, %c384] : memref<256x1152xbf16, #tpu.memory_space<vmem>>, vector<256x128xbf16>
    tpu.vector_store %arg8[%c0_20, %c384], %63 {strides = array<i32>} : memref<256x1152xbf16, #tpu.memory_space<vmem>>, vector<256x128xbf16>,
    %65 = arith.truncf %9 : vector<256x128xf32> to vector<256x128xbf16>
    %c0_21 = arith.constant 0 : index
    %c512 = arith.constant 512 : index
    %66 = vector.load %arg8[%c0_21, %c512] : memref<256x1152xbf16, #tpu.memory_space<vmem>>, vector<256x128xbf16>
    tpu.vector_store %arg8[%c0_21, %c512], %65 {strides = array<i32>} : memref<256x1152xbf16, #tpu.memory_space<vmem>>, vector<256x128xbf16>,
    %c255_i32 = arith.constant 255 : i32
    %67 = tpu.dynamic_rotate %9 by %c255_i32 dim 0 : vector<256x128xf32>, i32 -> vector<256x128xf32>
    %cst_22 = arith.constant 0.000000e+00 : f32
    %68 = vector.shape_cast %34 : vector<256x1xi1> to vector<256x1xi1>
    %69 = vector.broadcast %68 : vector<256x1xi1> to vector<256x128xi1>
    %70 = vector.broadcast %cst_22 : f32 to vector<256x128xf32>
    %71 = arith.select %69, %67, %70 : vector<256x128xi1>, vector<256x128xf32>
    %72 = arith.truncf %71 : vector<256x128xf32> to vector<256x128xbf16>
    %c0_23 = arith.constant 0 : index
    %c640 = arith.constant 640 : index
    %73 = vector.load %arg8[%c0_23, %c640] : memref<256x1152xbf16, #tpu.memory_space<vmem>>, vector<256x128xbf16>
    tpu.vector_store %arg8[%c0_23, %c640], %72 {strides = array<i32>} : memref<256x1152xbf16, #tpu.memory_space<vmem>>, vector<256x128xbf16>,
    %c241_i32 = arith.constant 241 : i32
    %74 = tpu.dynamic_rotate %9 by %c241_i32 dim 0 : vector<256x128xf32>, i32 -> vector<256x128xf32>
    %75 = arith.andi %30, %32 : vector<256x1xi1>
    %cst_24 = arith.constant 0.000000e+00 : f32
    %76 = vector.shape_cast %75 : vector<256x1xi1> to vector<256x1xi1>
    %77 = vector.broadcast %76 : vector<256x1xi1> to vector<256x128xi1>
    %78 = vector.broadcast %cst_24 : f32 to vector<256x128xf32>
    %79 = arith.select %77, %74, %78 : vector<256x128xi1>, vector<256x128xf32>
    %80 = arith.truncf %79 : vector<256x128xf32> to vector<256x128xbf16>
    %c0_25 = arith.constant 0 : index
    %c768 = arith.constant 768 : index
    %81 = vector.load %arg8[%c0_25, %c768] : memref<256x1152xbf16, #tpu.memory_space<vmem>>, vector<256x128xbf16>
    tpu.vector_store %arg8[%c0_25, %c768], %80 {strides = array<i32>} : memref<256x1152xbf16, #tpu.memory_space<vmem>>, vector<256x128xbf16>,
    %c240_i32_26 = arith.constant 240 : i32
    %82 = tpu.dynamic_rotate %9 by %c240_i32_26 dim 0 : vector<256x128xf32>, i32 -> vector<256x128xf32>
    %cst_27 = arith.constant 0.000000e+00 : f32
    %83 = vector.shape_cast %30 : vector<256x1xi1> to vector<256x1xi1>
    %84 = vector.broadcast %83 : vector<256x1xi1> to vector<256x128xi1>
    %85 = vector.broadcast %cst_27 : f32 to vector<256x128xf32>
    %86 = arith.select %84, %82, %85 : vector<256x128xi1>, vector<256x128xf32>
    %87 = arith.truncf %86 : vector<256x128xf32> to vector<256x128xbf16>
    %c0_28 = arith.constant 0 : index
    %c896 = arith.constant 896 : index
    %88 = vector.load %arg8[%c0_28, %c896] : memref<256x1152xbf16, #tpu.memory_space<vmem>>, vector<256x128xbf16>
    tpu.vector_store %arg8[%c0_28, %c896], %87 {strides = array<i32>} : memref<256x1152xbf16, #tpu.memory_space<vmem>>, vector<256x128xbf16>,
    %c239_i32 = arith.constant 239 : i32
    %89 = tpu.dynamic_rotate %9 by %c239_i32 dim 0 : vector<256x128xf32>, i32 -> vector<256x128xf32>
    %90 = arith.andi %30, %34 : vector<256x1xi1>
    %cst_29 = arith.constant 0.000000e+00 : f32
    %91 = vector.shape_cast %90 : vector<256x1xi1> to vector<256x1xi1>
    %92 = vector.broadcast %91 : vector<256x1xi1> to vector<256x128xi1>
    %93 = vector.broadcast %cst_29 : f32 to vector<256x128xf32>
    %94 = arith.select %92, %89, %93 : vector<256x128xi1>, vector<256x128xf32>
    %95 = arith.truncf %94 : vector<256x128xf32> to vector<256x128xbf16>
    %c0_30 = arith.constant 0 : index
    %c1024 = arith.constant 1024 : index
    %96 = vector.load %arg8[%c0_30, %c1024] : memref<256x1152xbf16, #tpu.memory_space<vmem>>, vector<256x128xbf16>
    tpu.vector_store %arg8[%c0_30, %c1024], %95 {strides = array<i32>} : memref<256x1152xbf16, #tpu.memory_space<vmem>>, vector<256x128xbf16>,
    %c0_31 = arith.constant 0 : index
    %c0_32 = arith.constant 0 : index
    %97 = vector.load %arg8[%c0_31, %c0_32] : memref<256x1152xbf16, #tpu.memory_space<vmem>>, vector<256x1152xbf16>
    %c0_33 = arith.constant 0 : index
    %c0_34 = arith.constant 0 : index
    %98 = vector.load %arg3[%c0_33, %c0_34] : memref<1152x128xbf16, #tpu.memory_space<vmem>>, vector<1152x128xbf16>
    %cst_35 = arith.constant dense<0.000000e+00> : vector<256x128xf32>
    %99 = tpu.matmul %97, %98, %cst_35 {dimension_numbers = #tpu.dot_dimension_numbers<[1], [0], [0], [1], [0, 0, 1, 1], [], []>} : vector<256x1152xbf16>, vector<1152x128xbf16>, vector<256x128xf32> -> vector<256x128xf32>
    %c0_36 = arith.constant 0 : index
    %c0_37 = arith.constant 0 : index
    %100 = vector.load %arg4[%c0_36, %c0_37] : memref<1x128xf32, #tpu.memory_space<vmem>>, vector<1x128xf32>
    %101 = vector.broadcast %100 : vector<1x128xf32> to vector<256x128xf32>
    %102 = arith.addf %99, %101 : vector<256x128xf32>
    %103 = arith.truncf %102 : vector<256x128xf32> to vector<256x128xbf16>
    %c0_38 = arith.constant 0 : index
    %c0_39 = arith.constant 0 : index
    %104 = vector.load %arg5[%c0_38, %c0_39] : memref<256x128xbf16, #tpu.memory_space<vmem>>, vector<256x128xbf16>
    tpu.vector_store %arg5[%c0_38, %c0_39], %103 {strides = array<i32>} : memref<256x128xbf16, #tpu.memory_space<vmem>>, vector<256x128xbf16>,
    %105 = arith.extf %103 : vector<256x128xbf16> to vector<256x128xf32>
    %cst_40 = arith.constant dense<0.000000e+00> : vector<128xf32>
    %106 = vector.multi_reduction <add>, %105, %cst_40 [0] : vector<256x128xf32> to vector<128xf32>
    %107 = vector.shape_cast %106 : vector<128xf32> to vector<1x128xf32>
    %108 = vector.shape_cast %107 : vector<1x128xf32> to vector<1x1x128xf32>
    %c0_41 = arith.constant 0 : index
    %c0_42 = arith.constant 0 : index
    %c0_43 = arith.constant 0 : index
    %109 = vector.load %arg6[%c0_41, %c0_42, %c0_43] : memref<1x1x128xf32, #tpu.memory_space<vmem>>, vector<1x1x128xf32>
    tpu.vector_store %arg6[%c0_41, %c0_42, %c0_43], %108 {strides = array<i32>} : memref<1x1x128xf32, #tpu.memory_space<vmem>>, vector<1x1x128xf32>,
    %110 = arith.mulf %105, %105 : vector<256x128xf32>
    %cst_44 = arith.constant dense<0.000000e+00> : vector<128xf32>
    %111 = vector.multi_reduction <add>, %110, %cst_44 [0] : vector<256x128xf32> to vector<128xf32>
    %112 = vector.shape_cast %111 : vector<128xf32> to vector<1x128xf32>
    %113 = vector.shape_cast %112 : vector<1x128xf32> to vector<1x1x128xf32>
    %c0_45 = arith.constant 0 : index
    %c0_46 = arith.constant 0 : index
    %c0_47 = arith.constant 0 : index
    %114 = vector.load %arg7[%c0_45, %c0_46, %c0_47] : memref<1x1x128xf32, #tpu.memory_space<vmem>>, vector<1x1x128xf32>
    tpu.vector_store %arg7[%c0_45, %c0_46, %c0_47], %113 {strides = array<i32>} : memref<1x1x128xf32, #tpu.memory_space<vmem>>, vector<1x1x128xf32>,
    return
  }
  func.func @transform_0(%arg0: i32) -> (i32, i32) {
    %c0_i32 = arith.constant 0 : i32
    %c0_i32_0 = arith.constant 0 : i32
    return %arg0, %c0_i32 : i32, i32
  }
  func.func @transform_1(%arg0: i32) -> (i32, i32) {
    %c0_i32 = arith.constant 0 : i32
    %c0_i32_0 = arith.constant 0 : i32
    %c0_i32_1 = arith.constant 0 : i32
    return %c0_i32, %c0_i32_0 : i32, i32
  }
  func.func @transform_2(%arg0: i32) -> (i32, i32) {
    %c0_i32 = arith.constant 0 : i32
    %c0_i32_0 = arith.constant 0 : i32
    %c0_i32_1 = arith.constant 0 : i32
    return %c0_i32, %c0_i32_0 : i32, i32
  }
  func.func @transform_3(%arg0: i32) -> (i32, i32) {
    %c0_i32 = arith.constant 0 : i32
    %c0_i32_0 = arith.constant 0 : i32
    %c0_i32_1 = arith.constant 0 : i32
    return %c0_i32, %c0_i32_0 : i32, i32
  }
  func.func @transform_4(%arg0: i32) -> (i32, i32) {
    %c0_i32 = arith.constant 0 : i32
    %c0_i32_0 = arith.constant 0 : i32
    return %arg0, %c0_i32 : i32, i32
  }
  func.func @transform_5(%arg0: i32) -> (i32, i32, i32) {
    %c0_i32 = arith.constant 0 : i32
    %c0_i32_0 = arith.constant 0 : i32
    %c0_i32_1 = arith.constant 0 : i32
    return %arg0, %c0_i32, %c0_i32_0 : i32, i32, i32
  }
  func.func @transform_6(%arg0: i32) -> (i32, i32, i32) {
    %c0_i32 = arith.constant 0 : i32
    %c0_i32_0 = arith.constant 0 : i32
    %c0_i32_1 = arith.constant 0 : i32
    return %arg0, %c0_i32, %c0_i32_0 : i32, i32, i32
  }
}

module attributes {stable_mosaic.version = 11 : i64} {
  func.func @_bnrelu_conv1x1_stats_kernel(%arg0: i32, %arg1: memref<512x128xbf16, #tpu.memory_space<vmem>>, %arg2: memref<2x128xf32, #tpu.memory_space<vmem>>, %arg3: memref<128x128xbf16, #tpu.memory_space<vmem>>, %arg4: memref<1x128xf32, #tpu.memory_space<vmem>>, %arg5: memref<512x128xbf16, #tpu.memory_space<vmem>>, %arg6: memref<1x1x128xf32, #tpu.memory_space<vmem>>, %arg7: memref<1x1x128xf32, #tpu.memory_space<vmem>>) attributes {dimension_semantics = [#tpu.dimension_semantics<parallel>], iteration_bounds = array<i64: 1>, scalar_prefetch = 0 : i64, scratch_operands = 0 : i64, tpu.core_type = #tpu.core_type<tc>, window_params = [{transform_indices = @transform_0, window_bounds = array<i64: 512, 128>}, {pipeline_mode = #tpu.pipeline_mode<synchronous>, transform_indices = @transform_1, window_bounds = array<i64: 2, 128>}, {pipeline_mode = #tpu.pipeline_mode<synchronous>, transform_indices = @transform_2, window_bounds = array<i64: 128, 128>}, {pipeline_mode = #tpu.pipeline_mode<synchronous>, transform_indices = @transform_3, window_bounds = array<i64: 1, 128>}, {transform_indices = @transform_4, window_bounds = array<i64: 512, 128>}, {transform_indices = @transform_5, window_bounds = array<i64: 1, 1, 128>}, {transform_indices = @transform_6, window_bounds = array<i64: 1, 1, 128>}]} {
    %c0 = arith.constant 0 : index
    %c0_0 = arith.constant 0 : index
    %0 = vector.load %arg1[%c0, %c0_0] : memref<512x128xbf16, #tpu.memory_space<vmem>>, vector<512x128xbf16>
    %c0_1 = arith.constant 0 : index
    %c0_2 = arith.constant 0 : index
    %1 = vector.load %arg2[%c0_1, %c0_2] : memref<2x128xf32, #tpu.memory_space<vmem>>, vector<1x128xf32>
    %2 = arith.extf %0 : vector<512x128xbf16> to vector<512x128xf32>
    %3 = vector.broadcast %1 : vector<1x128xf32> to vector<512x128xf32>
    %4 = arith.mulf %2, %3 : vector<512x128xf32>
    %c1 = arith.constant 1 : index
    %c0_3 = arith.constant 0 : index
    %5 = vector.load %arg2[%c1, %c0_3] : memref<2x128xf32, #tpu.memory_space<vmem>>, vector<1x128xf32>
    %6 = vector.broadcast %5 : vector<1x128xf32> to vector<512x128xf32>
    %7 = arith.addf %4, %6 : vector<512x128xf32>
    %cst = arith.constant 0.000000e+00 : f32
    %8 = vector.broadcast %cst : f32 to vector<512x128xf32>
    %9 = arith.maximumf %7, %8 : vector<512x128xf32>
    %10 = arith.truncf %9 : vector<512x128xf32> to vector<512x128xbf16>
    %c0_4 = arith.constant 0 : index
    %c0_5 = arith.constant 0 : index
    %11 = vector.load %arg3[%c0_4, %c0_5] : memref<128x128xbf16, #tpu.memory_space<vmem>>, vector<128x128xbf16>
    %cst_6 = arith.constant dense<0.000000e+00> : vector<512x128xf32>
    %12 = tpu.matmul %10, %11, %cst_6 {dimension_numbers = #tpu.dot_dimension_numbers<[1], [0], [0], [1], [0, 0, 1, 1], [], []>} : vector<512x128xbf16>, vector<128x128xbf16>, vector<512x128xf32> -> vector<512x128xf32>
    %c0_7 = arith.constant 0 : index
    %c0_8 = arith.constant 0 : index
    %13 = vector.load %arg4[%c0_7, %c0_8] : memref<1x128xf32, #tpu.memory_space<vmem>>, vector<1x128xf32>
    %14 = vector.broadcast %13 : vector<1x128xf32> to vector<512x128xf32>
    %15 = arith.addf %12, %14 : vector<512x128xf32>
    %16 = arith.truncf %15 : vector<512x128xf32> to vector<512x128xbf16>
    %c0_9 = arith.constant 0 : index
    %c0_10 = arith.constant 0 : index
    %17 = vector.load %arg5[%c0_9, %c0_10] : memref<512x128xbf16, #tpu.memory_space<vmem>>, vector<512x128xbf16>
    tpu.vector_store %arg5[%c0_9, %c0_10], %16 {strides = array<i32>} : memref<512x128xbf16, #tpu.memory_space<vmem>>, vector<512x128xbf16>,
    %18 = arith.extf %16 : vector<512x128xbf16> to vector<512x128xf32>
    %cst_11 = arith.constant dense<0.000000e+00> : vector<128xf32>
    %19 = vector.multi_reduction <add>, %18, %cst_11 [0] : vector<512x128xf32> to vector<128xf32>
    %20 = vector.shape_cast %19 : vector<128xf32> to vector<1x128xf32>
    %21 = vector.shape_cast %20 : vector<1x128xf32> to vector<1x1x128xf32>
    %c0_12 = arith.constant 0 : index
    %c0_13 = arith.constant 0 : index
    %c0_14 = arith.constant 0 : index
    %22 = vector.load %arg6[%c0_12, %c0_13, %c0_14] : memref<1x1x128xf32, #tpu.memory_space<vmem>>, vector<1x1x128xf32>
    tpu.vector_store %arg6[%c0_12, %c0_13, %c0_14], %21 {strides = array<i32>} : memref<1x1x128xf32, #tpu.memory_space<vmem>>, vector<1x1x128xf32>,
    %23 = arith.mulf %18, %18 : vector<512x128xf32>
    %cst_15 = arith.constant dense<0.000000e+00> : vector<128xf32>
    %24 = vector.multi_reduction <add>, %23, %cst_15 [0] : vector<512x128xf32> to vector<128xf32>
    %25 = vector.shape_cast %24 : vector<128xf32> to vector<1x128xf32>
    %26 = vector.shape_cast %25 : vector<1x128xf32> to vector<1x1x128xf32>
    %c0_16 = arith.constant 0 : index
    %c0_17 = arith.constant 0 : index
    %c0_18 = arith.constant 0 : index
    %27 = vector.load %arg7[%c0_16, %c0_17, %c0_18] : memref<1x1x128xf32, #tpu.memory_space<vmem>>, vector<1x1x128xf32>
    tpu.vector_store %arg7[%c0_16, %c0_17, %c0_18], %26 {strides = array<i32>} : memref<1x1x128xf32, #tpu.memory_space<vmem>>, vector<1x1x128xf32>,
    return
  }
  func.func @transform_0(%arg0: i32) -> (i32, i32) {
    %c0_i32 = arith.constant 0 : i32
    %c0_i32_0 = arith.constant 0 : i32
    return %arg0, %c0_i32 : i32, i32
  }
  func.func @transform_1(%arg0: i32) -> (i32, i32) {
    %c0_i32 = arith.constant 0 : i32
    %c0_i32_0 = arith.constant 0 : i32
    %c0_i32_1 = arith.constant 0 : i32
    return %c0_i32, %c0_i32_0 : i32, i32
  }
  func.func @transform_2(%arg0: i32) -> (i32, i32) {
    %c0_i32 = arith.constant 0 : i32
    %c0_i32_0 = arith.constant 0 : i32
    %c0_i32_1 = arith.constant 0 : i32
    return %c0_i32, %c0_i32_0 : i32, i32
  }
  func.func @transform_3(%arg0: i32) -> (i32, i32) {
    %c0_i32 = arith.constant 0 : i32
    %c0_i32_0 = arith.constant 0 : i32
    %c0_i32_1 = arith.constant 0 : i32
    return %c0_i32, %c0_i32_0 : i32, i32
  }
  func.func @transform_4(%arg0: i32) -> (i32, i32) {
    %c0_i32 = arith.constant 0 : i32
    %c0_i32_0 = arith.constant 0 : i32
    return %arg0, %c0_i32 : i32, i32
  }
  func.func @transform_5(%arg0: i32) -> (i32, i32, i32) {
    %c0_i32 = arith.constant 0 : i32
    %c0_i32_0 = arith.constant 0 : i32
    %c0_i32_1 = arith.constant 0 : i32
    return %arg0, %c0_i32, %c0_i32_0 : i32, i32, i32
  }
  func.func @transform_6(%arg0: i32) -> (i32, i32, i32) {
    %c0_i32 = arith.constant 0 : i32
    %c0_i32_0 = arith.constant 0 : i32
    %c0_i32_1 = arith.constant 0 : i32
    return %arg0, %c0_i32, %c0_i32_0 : i32, i32, i32
  }
}

module attributes {stable_mosaic.version = 11 : i64} {
  func.func @_bnrelu_scale_kernel(%arg0: i32, %arg1: memref<512x128xbf16, #tpu.memory_space<vmem>>, %arg2: memref<2x128xf32, #tpu.memory_space<vmem>>, %arg3: memref<512x128xf32, #tpu.memory_space<vmem>>) attributes {dimension_semantics = [#tpu.dimension_semantics<parallel>], iteration_bounds = array<i64: 1>, scalar_prefetch = 0 : i64, scratch_operands = 0 : i64, tpu.core_type = #tpu.core_type<tc>, window_params = [{transform_indices = @transform_0, window_bounds = array<i64: 512, 128>}, {pipeline_mode = #tpu.pipeline_mode<synchronous>, transform_indices = @transform_1, window_bounds = array<i64: 2, 128>}, {transform_indices = @transform_2, window_bounds = array<i64: 512, 128>}]} {
    %c0 = arith.constant 0 : index
    %c0_0 = arith.constant 0 : index
    %0 = vector.load %arg1[%c0, %c0_0] : memref<512x128xbf16, #tpu.memory_space<vmem>>, vector<512x128xbf16>
    %c0_1 = arith.constant 0 : index
    %c0_2 = arith.constant 0 : index
    %1 = vector.load %arg2[%c0_1, %c0_2] : memref<2x128xf32, #tpu.memory_space<vmem>>, vector<1x128xf32>
    %2 = arith.extf %0 : vector<512x128xbf16> to vector<512x128xf32>
    %3 = vector.broadcast %1 : vector<1x128xf32> to vector<512x128xf32>
    %4 = arith.mulf %2, %3 : vector<512x128xf32>
    %c1 = arith.constant 1 : index
    %c0_3 = arith.constant 0 : index
    %5 = vector.load %arg2[%c1, %c0_3] : memref<2x128xf32, #tpu.memory_space<vmem>>, vector<1x128xf32>
    %6 = vector.broadcast %5 : vector<1x128xf32> to vector<512x128xf32>
    %7 = arith.addf %4, %6 : vector<512x128xf32>
    %cst = arith.constant 0.000000e+00 : f32
    %8 = vector.broadcast %cst : f32 to vector<512x128xf32>
    %9 = arith.maximumf %7, %8 : vector<512x128xf32>
    %c0_4 = arith.constant 0 : index
    %c0_5 = arith.constant 0 : index
    %10 = vector.load %arg3[%c0_4, %c0_5] : memref<512x128xf32, #tpu.memory_space<vmem>>, vector<512x128xf32>
    tpu.vector_store %arg3[%c0_4, %c0_5], %9 {strides = array<i32>} : memref<512x128xf32, #tpu.memory_space<vmem>>, vector<512x128xf32>,
    return
  }
  func.func @transform_0(%arg0: i32) -> (i32, i32) {
    %c0_i32 = arith.constant 0 : i32
    %c0_i32_0 = arith.constant 0 : i32
    return %arg0, %c0_i32 : i32, i32
  }
  func.func @transform_1(%arg0: i32) -> (i32, i32) {
    %c0_i32 = arith.constant 0 : i32
    %c0_i32_0 = arith.constant 0 : i32
    %c0_i32_1 = arith.constant 0 : i32
    return %c0_i32, %c0_i32_0 : i32, i32
  }
  func.func @transform_2(%arg0: i32) -> (i32, i32) {
    %c0_i32 = arith.constant 0 : i32
    %c0_i32_0 = arith.constant 0 : i32
    return %arg0, %c0_i32 : i32, i32
  }
}

</mosaic_0001>

<bundles_post_ra>
// kernel: block_forward.4
= control target key start
LH: loop header
LB: loop body
LE: loop exit
PB: predicated region body
PF: predicated region fallthrough
CT: control target
= control target key end

     0   :  { %11 = vsyncpa [#allocation3], 0  ;;  %s1808_s18 = smov [#allocation2]   ;;  %s2240_s0 = inlined_call_operand.vmem [shape: bf16[512,128], index: 0, kind: input, shape index: {}]   ;;  %s2241_s1 = inlined_call_operand.vmem [shape: bf16[128,128], index: 1, kind: input, shape index: {}]   ;;  %s2242_s2 = inlined_call_operand.hbm [shape: f32[1,128], index: 2, kind: input, shape index: {}]   ;;  %s2243_s3 = inlined_call_operand.vmem [shape: bf16[512,128], index: 3, kind: output, shape index: {0}]   ;;  %s2244_s4 = inlined_call_operand.vmem [shape: f32[1,1,128], index: 4, kind: output, shape index: {1}]   ;;  %s2245_s5 = inlined_call_operand.vmem [shape: f32[1,1,128], index: 5, kind: output, shape index: {2}]  }
   0x1   :  { %s22_s19 = sshll.u32 %s1808_s18, 4  ;;  %s1784_s22 = scalar_lea.hbm %s2242_s2, 16  ;;  %s23_s19 = int_to_ptr.vmem [resolvable:$true] %s22_s19 }
   0x2   :  { %p1785_p0 = scmp.ne.s32.totalorder %s2242_s2, %s1784_s22  ;;  %p1788_p1 = scmp.lt.u32.totalorder %s1784_s22, %s2242_s2 }
   0x4   :  { %p1790_p2 = pnand %p1788_p1, %p1785_p0 }
   0x6   :  { %1793 = shalt.err (!%p1790_p2)
}
   0x7   :  { %s1794_s27 = scalar_lea.vmem %s23_s19, 16  ;;  %s1798_s28 = scalar_lea.vmem %s23_s19, 32 }
   0x8   :  { %p1795_p3 = scmp.ne.s32.totalorder %s23_s19, %s1794_s27  ;;  %p1799_p4 = scmp.lt.s32.totalorder %s23_s19, %s23_s19 }
   0x9   :  { %p1800_p5 = scmp.lt.s32.totalorder %s1798_s28, %s1794_s27 }
   0xb   :  { %p1801_p6 = por %p1800_p5, %p1799_p4 }
   0xd   :  { %p1802_p7 = pnand %p1801_p6, %p1795_p3 }
   0xf   :  { %1805 = shalt.err (!%p1802_p7)
}
  0x10   :  { %25 = dma.hbm_to_vmem [thread:$0]  %s2242_s2, 16, %s23_s19, [#allocation3]  }
  0x11   :  { %1806 = dma.done.wait [#allocation3], 16  }
  0x12   :  { %1807 = vsyncadd [#allocation3], 4294967280  ;;  %v1744_v0 = vld [vmem:[%s2241_s1] sm:$0xff]   ;;  %v1745_v1 = vld [vmem:[%s2241_s1 + $0x8] sm:$0xff]  }
  0x13   :  { %1647 = vmatprep.subr.bf16.mxu0 %v1744_v0  ;;  %1727 = vmatprep.subr.bf16.mxu1 %v1744_v0  ;;  %v1746_v2 = vld [vmem:[%s2241_s1 + $0x10] sm:$0xff]   ;;  %v1747_v3 = vld [vmem:[%s2241_s1 + $0x18] sm:$0xff]   ;;  %v1752_v4 = vld [vmem:[%s2240_s0] sm:$0xff]  }
  0x14   :  { %1648 = vmatpush3.bf16.msra.mxu0 %v1744_v0  ;;  %1735 = vmatpush3.bf16.msra.mxu1 %v1744_v0  ;;  %v1748_v5 = vld [vmem:[%s2241_s1 + $0x20] sm:$0xff]   ;;  %v1749_v6 = vld [vmem:[%s2241_s1 + $0x28] sm:$0xff]   ;;  %v1750_v7 = vld [vmem:[%s2241_s1 + $0x30] sm:$0xff]  }
  0x15   :  { %1649 = vmatprep.subr.bf16.mxu0 %v1745_v1  ;;  %1728 = vmatprep.subr.bf16.mxu1 %v1745_v1  ;;  %v1751_v8 = vld [vmem:[%s2241_s1 + $0x38] sm:$0xff]   ;;  %v1768_v9 = vld [vmem:[%s2240_s0 + $0x80] sm:$0xff]   ;;  %v1753_v10 = vld [vmem:[%s2240_s0 + $0x8] sm:$0xff]  }
  0x16   :  { %1663 = vmatprep.mubr.bf16.mxu0 %v1752_v4  ;;  %1695 = vmatprep.mubr.bf16.mxu1 %v1768_v9  ;;  %v1754_v11 = vld [vmem:[%s2240_s0 + $0x10] sm:$0xff]   ;;  %v1769_v12 = vld [vmem:[%s2240_s0 + $0x88] sm:$0xff]   ;;  %v1755_v14 = vld [vmem:[%s2240_s0 + $0x18] sm:$0xff]  }
  0x17   :  { %v1770_v13 = vld [vmem:[%s2240_s0 + $0x90] sm:$0xff]   ;;  %v1756_v15 = vld [vmem:[%s2240_s0 + $0x20] sm:$0xff]   ;;  %v1771_v16 = vld [vmem:[%s2240_s0 + $0x98] sm:$0xff]  }
  0x18   :  { %1650 = vmatpush3.bf16.msra.mxu0 %v1745_v1  ;;  %1736 = vmatpush3.bf16.msra.mxu1 %v1745_v1  ;;  %v1772_v17 = vld [vmem:[%s2240_s0 + $0xa0] sm:$0xff]   ;;  %v1757_v18 = vld [vmem:[%s2240_s0 + $0x28] sm:$0xff]   ;;  %v1758_v20 = vld [vmem:[%s2240_s0 + $0x30] sm:$0xff]  }
  0x19   :  { %1651 = vmatprep.subr.bf16.mxu0 %v1746_v2  ;;  %1729 = vmatprep.subr.bf16.mxu1 %v1746_v2  ;;  %v1773_v19 = vld [vmem:[%s2240_s0 + $0xa8] sm:$0xff]   ;;  %v1774_v21 = vld [vmem:[%s2240_s0 + $0xb0] sm:$0xff]   ;;  %v1759_v22 = vld [vmem:[%s2240_s0 + $0x38] sm:$0xff]  }
  0x1a   :  { %v1775_v23 = vld [vmem:[%s2240_s0 + $0xb8] sm:$0xff]   ;;  %v1760_v24 = vld [vmem:[%s2240_s0 + $0x40] sm:$0xff]   ;;  %v1761_v26 = vld [vmem:[%s2240_s0 + $0x48] sm:$0xff]  }
  0x1b   :  { %v1776_v25 = vld [vmem:[%s2240_s0 + $0xc0] sm:$0xff]   ;;  %v1777_v27 = vld [vmem:[%s2240_s0 + $0xc8] sm:$0xff]   ;;  %v1762_v28 = vld [vmem:[%s2240_s0 + $0x50] sm:$0xff]  }
  0x1c   :  { %1652 = vmatpush3.bf16.msra.mxu0 %v1746_v2  ;;  %1737 = vmatpush3.bf16.msra.mxu1 %v1746_v2  ;;  %v1778_v29 = vld [vmem:[%s2240_s0 + $0xd0] sm:$0xff]   ;;  %v1763_v30 = vld [vmem:[%s2240_s0 + $0x58] sm:$0xff]   ;;  %v1764_v32 = vld [vmem:[%s2240_s0 + $0x60] sm:$0xff]  }
  0x1d   :  { %1653 = vmatprep.subr.bf16.mxu0 %v1747_v3  ;;  %1730 = vmatprep.subr.bf16.mxu1 %v1747_v3  ;;  %v1779_v31 = vld [vmem:[%s2240_s0 + $0xd8] sm:$0xff]   ;;  %v1780_v33 = vld [vmem:[%s2240_s0 + $0xe0] sm:$0xff]   ;;  %v1765_v34 = vld [vmem:[%s2240_s0 + $0x68] sm:$0xff]  }
  0x1e   :  { %v1781_v35 = vld [vmem:[%s2240_s0 + $0xe8] sm:$0xff]   ;;  %v1766_v36 = vld [vmem:[%s2240_s0 + $0x70] sm:$0xff]   ;;  %v1767_v38 = vld [vmem:[%s2240_s0 + $0x78] sm:$0xff]  }
  0x1f   :  { %v1782_v37 = vld [vmem:[%s2240_s0 + $0xf0] sm:$0xff]   ;;  %v1783_v39 = vld [vmem:[%s2240_s0 + $0xf8] sm:$0xff]   ;;  %v1971_v41 = vld [vmem:[#allocation2] ss:$0 sm:$0xff] }
  0x20   :  { %1654 = vmatpush3.bf16.msra.mxu0 %v1747_v3  ;;  %1738 = vmatpush3.bf16.msra.mxu1 %v1747_v3 }
  0x21   :  { %1655 = vmatprep.subr.bf16.mxu0 %v1748_v5  ;;  %1731 = vmatprep.subr.bf16.mxu1 %v1748_v5 }
  0x24   :  { %1656 = vmatpush3.bf16.msra.mxu0 %v1748_v5  ;;  %1739 = vmatpush3.bf16.msra.mxu1 %v1748_v5 }
  0x25   :  { %1657 = vmatprep.subr.bf16.mxu0 %v1749_v6  ;;  %1732 = vmatprep.subr.bf16.mxu1 %v1749_v6 }
  0x28   :  { %1658 = vmatpush3.bf16.msra.mxu0 %v1749_v6  ;;  %1740 = vmatpush3.bf16.msra.mxu1 %v1749_v6 }
  0x29   :  { %1659 = vmatprep.subr.bf16.mxu0 %v1750_v7  ;;  %1733 = vmatprep.subr.bf16.mxu1 %v1750_v7 }
  0x2c   :  { %1660 = vmatpush3.bf16.msra.mxu0 %v1750_v7  ;;  %1741 = vmatpush3.bf16.msra.mxu1 %v1750_v7 }
  0x2d   :  { %1661 = vmatprep.subr.bf16.mxu0 %v1751_v8  ;;  %1734 = vmatprep.subr.bf16.mxu1 %v1751_v8 }
  0x30   :  { %1662 = vmatpush3.bf16.msra.mxu0 %v1751_v8  ;;  %1742 = vmatpush3.bf16.msra.mxu1 %v1751_v8 }
  0x33   :  { %1664 = vmatmul.mubr.bf16.vlgmr.msra.gmra.mrb[0].mxu0 %v1753_v10  ;;  %1696 = vmatmul.mubr.bf16.vlgmr.msra.gmra.mrb[0].mxu1 %v1769_v12 }
  0x34   :  { %1667 = vmatprep.mubr.bf16.mxu0 %v1754_v11  ;;  %1699 = vmatprep.mubr.bf16.mxu1 %v1770_v13 }
  0x3b   :  { %1668 = vmatmul.mubr.bf16.gmra.mrb[4].mxu0 %v1755_v14  ;;  %1700 = vmatmul.mubr.bf16.gmra.mrb[4].mxu1 %v1771_v16 }
  0x3c   :  { %1671 = vmatprep.mubr.bf16.mxu0 %v1756_v15  ;;  %1703 = vmatprep.mubr.bf16.mxu1 %v1772_v17 }
  0x43   :  { %1672 = vmatmul.mubr.bf16.gmra.mrb[8].mxu0 %v1757_v18  ;;  %1704 = vmatmul.mubr.bf16.gmra.mrb[8].mxu1 %v1773_v19 }
  0x44   :  { %1675 = vmatprep.mubr.bf16.mxu0 %v1758_v20  ;;  %1707 = vmatprep.mubr.bf16.mxu1 %v1774_v21 }
  0x4b   :  { %1676 = vmatmul.mubr.bf16.gmra.mrb[12].mxu0 %v1759_v22  ;;  %1708 = vmatmul.mubr.bf16.gmra.mrb[12].mxu1 %v1775_v23 }
  0x4c   :  { %1679 = vmatprep.mubr.bf16.mxu0 %v1760_v24  ;;  %1711 = vmatprep.mubr.bf16.mxu1 %v1776_v25 }
  0x53   :  { %1680 = vmatmul.mubr.bf16.gmra.mrb[16].mxu0 %v1761_v26  ;;  %1712 = vmatmul.mubr.bf16.gmra.mrb[16].mxu1 %v1777_v27 }
  0x54   :  { %1683 = vmatprep.mubr.bf16.mxu0 %v1762_v28  ;;  %1715 = vmatprep.mubr.bf16.mxu1 %v1778_v29 }
  0x5b   :  { %1684 = vmatmul.mubr.bf16.gmra.mrb[20].mxu0 %v1763_v30  ;;  %1716 = vmatmul.mubr.bf16.gmra.mrb[20].mxu1 %v1779_v31 }
  0x5c   :  { %1687 = vmatprep.mubr.bf16.mxu0 %v1764_v32  ;;  %1719 = vmatprep.mubr.bf16.mxu1 %v1780_v33 }
  0x63   :  { %1688 = vmatmul.mubr.bf16.gmra.mrb[24].mxu0 %v1765_v34  ;;  %1720 = vmatmul.mubr.bf16.gmra.mrb[24].mxu1 %v1781_v35 }
  0x64   :  { %1691 = vmatprep.mubr.bf16.mxu0 %v1766_v36  ;;  %1723 = vmatprep.mubr.bf16.mxu1 %v1782_v37 }
  0x6b   :  { %1692 = vmatmul.mubr.bf16.gmra.mrb[28].mxu0 %v1767_v38  ;;  %1724 = vmatmul.mubr.bf16.gmra.mrb[28].mxu1 %v1783_v39 }
 0x106   :  { %v1665_v40 = vpop.f32.mrb[0].mxu0  ;;  %v1697_v42 = vpop.f32.mrb[0].mxu1 }
 0x107   :  { %v391_v43 = vpop.f32.mrb[1].mxu0  ;;  %v528_v44 = vadd.f32 %v1697_v42, %v1971_v41  ;;  %v519_v45 = vpop.f32.mrb[1].mxu1  ;;  %v400_v49 = vadd.f32 %v1665_v40, %v1971_v41 }
 0x108   :  { %v1666_v46 = vpop.f32.mrb[2].mxu0  ;;  %v520_v47 = vadd.f32 %v1971_v41, %v519_v45  ;;  %v1698_v48 = vpop.f32.mrb[2].mxu1  ;;  %v392_v54 = vadd.f32 %v1971_v41, %v391_v43 }
 0x109   :  { %v403_v50 = vadd.f32 %v1666_v46, %v1971_v41  ;;  %v394_v51 = vpop.f32.mrb[3].mxu0  ;;  %v531_v52 = vadd.f32 %v1698_v48, %v1971_v41  ;;  %v522_v53 = vpop.f32.mrb[3].mxu1 }
 0x10a   :  { %v395_v55 = vadd.f32 %v1971_v41, %v394_v51  ;;  %v523_v56 = vadd.f32 %v1971_v41, %v522_v53 }
 0x10b   :  { %v647_v57 = vpack.c.bf16 %v403_v50, %v400_v49  ;;  %v1981_v58 = vpack.c.bf16 %v531_v52, %v528_v44 }
 0x10c   :  { %v646_v59 = vpack.c.bf16 %v395_v55, %v392_v54  ;;  %v1983_v60 = vpack.c.bf16 %v523_v56, %v520_v47 }
 0x10d   :  { %1576 = vst [vmem:[%s2243_s3 + $0x8] sm:$0xff] %v647_v57   ;;  %v968_v61 = vunpack.c.l.bf16 %v647_v57  ;;  %1592 = vst [vmem:[%s2243_s3 + $0x88] sm:$0xff] %v1981_v58   ;;  %v969_v4 = vunpack.c.h.bf16 %v647_v57 }
 0x10e   :  { %1420 = vst [vmem:[%s2243_s3] sm:$0xff] %v646_v59   ;;  %v966_v62 = vunpack.c.l.bf16 %v646_v59  ;;  %v967_v63 = vunpack.c.h.bf16 %v646_v59  ;;  %v1669_v0 = vpop.f32.mrb[4].mxu0  ;;  %1591 = vst [vmem:[%s2243_s3 + $0x80] sm:$0xff] %v1983_v60   ;;  %v1701_v1 = vpop.f32.mrb[4].mxu1 }
 0x10f   :  { %v407_v2 = vpop.f32.mrb[5].mxu0  ;;  %v535_v3 = vpop.f32.mrb[5].mxu1  ;;  %v1102_v10 = vmul.f32 %v968_v61, %v968_v61  ;;  %v416_v11 = vadd.f32 %v1669_v0, %v1971_v41  ;;  %v544_v19 = vadd.f32 %v1701_v1, %v1971_v41  ;;  %v1103_v24 = vmul.f32 %v969_v4, %v969_v4 }
 0x110   :  { %v1030_v5 = vadd.f32 %v967_v63, %v966_v62  ;;  %v1100_v6 = vmul.f32 %v966_v62, %v966_v62  ;;  %v1101_v7 = vmul.f32 %v967_v63, %v967_v63  ;;  %v1670_v8 = vpop.f32.mrb[6].mxu0  ;;  %v1702_v9 = vpop.f32.mrb[6].mxu1  ;;  %v408_v12 = vadd.f32 %v1971_v41, %v407_v2 }
 0x111   :  { %v419_v13 = vadd.f32 %v1670_v8, %v1971_v41  ;;  %v410_v14 = vpop.f32.mrb[7].mxu0  ;;  %v538_v15 = vpop.f32.mrb[7].mxu1  ;;  %v536_v21 = vadd.f32 %v1971_v41, %v535_v3  ;;  %v547_v22 = vadd.f32 %v1702_v9, %v1971_v41 }
 0x112   :  { %v1031_v16 = vadd.f32 %v1030_v5, %v968_v61  ;;  %v1164_v17 = vadd.f32 %v1101_v7, %v1100_v6  ;;  %v411_v18 = vadd.f32 %v1971_v41, %v410_v14  ;;  %v539_v23 = vadd.f32 %v1971_v41, %v538_v15 }
 0x113   :  { %v649_v20 = vpack.c.bf16 %v419_v13, %v416_v11  ;;  %v2010_v28 = vpack.c.bf16 %v547_v22, %v544_v19 }
 0x114   :  { %v1165_v25 = vadd.f32 %v1164_v17, %v1102_v10  ;;  %v648_v26 = vpack.c.bf16 %v411_v18, %v408_v12  ;;  %v1032_v27 = vadd.f32 %v1031_v16, %v969_v4  ;;  %v2012_v29 = vpack.c.bf16 %v539_v23, %v536_v21 }
 0x115   :  { %1578 = vst [vmem:[%s2243_s3 + $0x18] sm:$0xff] %v649_v20   ;;  %1594 = vst [vmem:[%s2243_s3 + $0x98] sm:$0xff] %v2010_v28   ;;  %v972_v37 = vunpack.c.l.bf16 %v649_v20  ;;  %v973_v43 = vunpack.c.h.bf16 %v649_v20 }
 0x116   :  { %1577 = vst [vmem:[%s2243_s3 + $0x10] sm:$0xff] %v648_v26   ;;  %v970_v30 = vunpack.c.l.bf16 %v648_v26  ;;  %v971_v31 = vunpack.c.h.bf16 %v648_v26  ;;  %v1166_v32 = vadd.f32 %v1165_v25, %v1103_v24  ;;  %v1673_v33 = vpop.f32.mrb[8].mxu0  ;;  %v1705_v34 = vpop.f32.mrb[8].mxu1  ;;  %1593 = vst [vmem:[%s2243_s3 + $0x90] sm:$0xff] %v2012_v29  }
 0x117   :  { %v423_v35 = vpop.f32.mrb[9].mxu0  ;;  %v551_v36 = vpop.f32.mrb[9].mxu1  ;;  %v432_v45 = vadd.f32 %v1673_v33, %v1971_v41  ;;  %v560_v54 = vadd.f32 %v1705_v34, %v1971_v41  ;;  %v1106_v55 = vmul.f32 %v972_v37, %v972_v37  ;;  %v1107_v61 = vmul.f32 %v973_v43, %v973_v43 }
 0x118   :  { %v1033_v38 = vadd.f32 %v1032_v27, %v970_v30  ;;  %v1104_v39 = vmul.f32 %v970_v30, %v970_v30  ;;  %v1674_v40 = vpop.f32.mrb[10].mxu0  ;;  %v1706_v42 = vpop.f32.mrb[10].mxu1  ;;  %v1105_v44 = vmul.f32 %v971_v31, %v971_v31  ;;  %v424_v51 = vadd.f32 %v1971_v41, %v423_v35 }
 0x119   :  { %v435_v46 = vadd.f32 %v1674_v40, %v1971_v41  ;;  %v426_v47 = vpop.f32.mrb[11].mxu0  ;;  %v554_v48 = vpop.f32.mrb[11].mxu1  ;;  %v563_v62 = vadd.f32 %v1706_v42, %v1971_v41  ;;  %v552_v14 = vadd.f32 %v1971_v41, %v551_v36 }
 0x11a   :  { %v1034_v49 = vadd.f32 %v1033_v38, %v971_v31  ;;  %v1167_v50 = vadd.f32 %v1166_v32, %v1104_v39  ;;  %v427_v52 = vadd.f32 %v1971_v41, %v426_v47  ;;  %v555_v25 = vadd.f32 %v1971_v41, %v554_v48 }
 0x11b   :  { %v651_v53 = vpack.c.bf16 %v435_v46, %v432_v45  ;;  %v2037_v8 = vpack.c.bf16 %v563_v62, %v560_v54 }
 0x11c   :  { %v1035_v56 = vadd.f32 %v1034_v49, %v972_v37  ;;  %v1168_v57 = vadd.f32 %v1167_v50, %v1105_v44  ;;  %v650_v59 = vpack.c.bf16 %v427_v52, %v424_v51  ;;  %v2049_v33 = vpack.c.bf16 %v555_v25, %v552_v14 }
 0x11d   :  { %1580 = vst [vmem:[%s2243_s3 + $0x28] sm:$0xff] %v651_v53   ;;  %v976_v5 = vunpack.c.l.bf16 %v651_v53  ;;  %v977_v6 = vunpack.c.h.bf16 %v651_v53  ;;  %1596 = vst [vmem:[%s2243_s3 + $0xa8] sm:$0xff] %v2037_v8  }
 0x11e   :  { %v1169_v63 = vadd.f32 %v1168_v57, %v1106_v55  ;;  %1579 = vst [vmem:[%s2243_s3 + $0x20] sm:$0xff] %v650_v59   ;;  %v974_v0 = vunpack.c.l.bf16 %v650_v59  ;;  %v975_v1 = vunpack.c.h.bf16 %v650_v59  ;;  %v1036_v2 = vadd.f32 %v1035_v56, %v973_v43  ;;  %v1677_v3 = vpop.f32.mrb[12].mxu0  ;;  %v1709_v4 = vpop.f32.mrb[12].mxu1  ;;  %1595 = vst [vmem:[%s2243_s3 + $0xa0] sm:$0xff] %v2049_v33  }
 0x11f   :  { %v439_v7 = vpop.f32.mrb[13].mxu0  ;;  %v567_v9 = vpop.f32.mrb[13].mxu1  ;;  %v448_v17 = vadd.f32 %v1677_v3, %v1971_v41  ;;  %v1110_v26 = vmul.f32 %v976_v5, %v976_v5  ;;  %v1111_v34 = vmul.f32 %v977_v6, %v977_v6  ;;  %v576_v35 = vadd.f32 %v1709_v4, %v1971_v41 }
 0x120   :  { %v1037_v10 = vadd.f32 %v1036_v2, %v974_v0  ;;  %v1108_v11 = vmul.f32 %v974_v0, %v974_v0  ;;  %v1170_v12 = vadd.f32 %v1169_v63, %v1107_v61  ;;  %v1678_v13 = vpop.f32.mrb[14].mxu0  ;;  %v1710_v15 = vpop.f32.mrb[14].mxu1  ;;  %v1109_v16 = vmul.f32 %v975_v1, %v975_v1 }
 0x121   :  { %v440_v18 = vadd.f32 %v1971_v41, %v439_v7  ;;  %v451_v19 = vadd.f32 %v1678_v13, %v1971_v41  ;;  %v442_v20 = vpop.f32.mrb[15].mxu0  ;;  %v570_v21 = vpop.f32.mrb[15].mxu1  ;;  %v579_v36 = vadd.f32 %v1710_v15, %v1971_v41  ;;  %v568_v52 = vadd.f32 %v1971_v41, %v567_v9 }
 0x122   :  { %v1038_v22 = vadd.f32 %v1037_v10, %v975_v1  ;;  %v1171_v23 = vadd.f32 %v1170_v12, %v1108_v11  ;;  %v443_v24 = vadd.f32 %v1971_v41, %v442_v20  ;;  %v571_v3 = vadd.f32 %v1971_v41, %v570_v21 }
 0x123   :  { %v653_v27 = vpack.c.bf16 %v451_v19, %v448_v17  ;;  %v2068_v1 = vpack.c.bf16 %v579_v36, %v576_v35 }
 0x124   :  { %v1039_v30 = vadd.f32 %v1038_v22, %v976_v5  ;;  %v1172_v31 = vadd.f32 %v1171_v23, %v1109_v16  ;;  %v652_v32 = vpack.c.bf16 %v443_v24, %v440_v18  ;;  %v2078_v10 = vpack.c.bf16 %v571_v3, %v568_v52 }
 0x125   :  { %1582 = vst [vmem:[%s2243_s3 + $0x38] sm:$0xff] %v653_v27   ;;  %v980_v44 = vunpack.c.l.bf16 %v653_v27  ;;  %v981_v45 = vunpack.c.h.bf16 %v653_v27  ;;  %1598 = vst [vmem:[%s2243_s3 + $0xb8] sm:$0xff] %v2068_v1  }
 0x126   :  { %v1173_v37 = vadd.f32 %v1172_v31, %v1110_v26  ;;  %1581 = vst [vmem:[%s2243_s3 + $0x30] sm:$0xff] %v652_v32   ;;  %v978_v38 = vunpack.c.l.bf16 %v652_v32  ;;  %v979_v39 = vunpack.c.h.bf16 %v652_v32  ;;  %v1040_v40 = vadd.f32 %v1039_v30, %v977_v6  ;;  %v1681_v42 = vpop.f32.mrb[16].mxu0  ;;  %v1713_v43 = vpop.f32.mrb[16].mxu1  ;;  %1597 = vst [vmem:[%s2243_s3 + $0xb0] sm:$0xff] %v2078_v10  }
 0x127   :  { %v455_v46 = vpop.f32.mrb[17].mxu0  ;;  %v583_v47 = vpop.f32.mrb[17].mxu1  ;;  %v464_v55 = vadd.f32 %v1681_v42, %v1971_v41  ;;  %v1114_v4 = vmul.f32 %v980_v44, %v980_v44  ;;  %v1115_v9 = vmul.f32 %v981_v45, %v981_v45  ;;  %v592_v18 = vadd.f32 %v1713_v43, %v1971_v41 }
 0x128   :  { %v1041_v48 = vadd.f32 %v1040_v40, %v978_v38  ;;  %v1112_v49 = vmul.f32 %v978_v38, %v978_v38  ;;  %v1174_v50 = vadd.f32 %v1173_v37, %v1111_v34  ;;  %v1682_v51 = vpop.f32.mrb[18].mxu0  ;;  %v1714_v53 = vpop.f32.mrb[18].mxu1  ;;  %v1113_v54 = vmul.f32 %v979_v39, %v979_v39 }
 0x129   :  { %v456_v56 = vadd.f32 %v1971_v41, %v455_v46  ;;  %v467_v57 = vadd.f32 %v1682_v51, %v1971_v41  ;;  %v458_v59 = vpop.f32.mrb[19].mxu0  ;;  %v586_v61 = vpop.f32.mrb[19].mxu1  ;;  %v595_v40 = vadd.f32 %v1714_v53, %v1971_v41 }
 0x12a   :  { %v1042_v62 = vadd.f32 %v1041_v48, %v979_v39  ;;  %v1175_v63 = vadd.f32 %v1174_v50, %v1112_v49  ;;  %v459_v0 = vadd.f32 %v1971_v41, %v458_v59  ;;  %v584_v48 = vadd.f32 %v1971_v41, %v583_v47 }
 0x12b   :  { %v655_v2 = vpack.c.bf16 %v467_v57, %v464_v55  ;;  %v2103_v49 = vpack.c.bf16 %v595_v40, %v592_v18  ;;  %v587_v50 = vadd.f32 %v1971_v41, %v586_v61 }
 0x12c   :  { %v1043_v5 = vadd.f32 %v1042_v62, %v980_v44  ;;  %v1176_v6 = vadd.f32 %v1175_v63, %v1113_v54  ;;  %v654_v7 = vpack.c.bf16 %v459_v0, %v456_v56 }
 0x12d   :  { %1584 = vst [vmem:[%s2243_s3 + $0x48] sm:$0xff] %v655_v2   ;;  %v984_v20 = vunpack.c.l.bf16 %v655_v2  ;;  %v985_v26 = vunpack.c.h.bf16 %v655_v2  ;;  %1600 = vst [vmem:[%s2243_s3 + $0xc8] sm:$0xff] %v2103_v49  }
 0x12e   :  { %v1177_v11 = vadd.f32 %v1176_v6, %v1114_v4  ;;  %1583 = vst [vmem:[%s2243_s3 + $0x40] sm:$0xff] %v654_v7   ;;  %v982_v12 = vunpack.c.l.bf16 %v654_v7  ;;  %v983_v13 = vunpack.c.h.bf16 %v654_v7  ;;  %v1044_v14 = vadd.f32 %v1043_v5, %v981_v45  ;;  %v1685_v15 = vpop.f32.mrb[20].mxu0  ;;  %v2083_v16 = vpop.f32.mrb[20].mxu1 }
 0x12f   :  { %v471_v17 = vpop.f32.mrb[21].mxu0  ;;  %v2090_v19 = vpop.f32.mrb[21].mxu1  ;;  %v480_v30 = vadd.f32 %v1685_v15, %v1971_v41  ;;  %v1118_v42 = vmul.f32 %v984_v20, %v984_v20  ;;  %v1119_v46 = vmul.f32 %v985_v26, %v985_v26  ;;  %v2125_v15 = vpack.c.bf16 %v587_v50, %v584_v48 }
 0x130   :  { %v1045_v21 = vadd.f32 %v1044_v14, %v982_v12  ;;  %v1116_v22 = vmul.f32 %v982_v12, %v982_v12  ;;  %v1178_v23 = vadd.f32 %v1177_v11, %v1115_v9  ;;  %v1686_v24 = vpop.f32.mrb[22].mxu0  ;;  %v1718_v25 = vpop.f32.mrb[22].mxu1  ;;  %v1117_v27 = vmul.f32 %v983_v13, %v983_v13 }
 0x131   :  { %v483_v31 = vadd.f32 %v1686_v24, %v1971_v41  ;;  %v474_v32 = vpop.f32.mrb[23].mxu0  ;;  %v2094_v34 = vpop.f32.mrb[23].mxu1  ;;  %v472_v37 = vadd.f32 %v1971_v41, %v471_v17  ;;  %1599 = vst [vmem:[%s2243_s3 + $0xc0] sm:$0xff] %v2125_v15   ;;  %v608_v24 = vadd.f32 %v2083_v16, %v1971_v41  ;;  %v600_v40 = vadd.f32 %v1971_v41, %v2090_v19 }
 0x132   :  { %v1046_v35 = vadd.f32 %v1045_v21, %v983_v13  ;;  %v1179_v36 = vadd.f32 %v1178_v23, %v1116_v22  ;;  %v475_v38 = vadd.f32 %v1971_v41, %v474_v32 }
 0x133   :  { %v657_v39 = vpack.c.bf16 %v483_v31, %v480_v30 }
 0x134   :  { %v1047_v43 = vadd.f32 %v1046_v35, %v984_v20  ;;  %v1180_v44 = vadd.f32 %v1179_v36, %v1117_v27  ;;  %v656_v45 = vpack.c.bf16 %v475_v38, %v472_v37 }
 0x135   :  { %1586 = vst [vmem:[%s2243_s3 + $0x58] sm:$0xff] %v657_v39   ;;  %v988_v57 = vunpack.c.l.bf16 %v657_v39  ;;  %v989_v61 = vunpack.c.h.bf16 %v657_v39 }
 0x136   :  { %v1181_v51 = vadd.f32 %v1180_v44, %v1118_v42  ;;  %1585 = vst [vmem:[%s2243_s3 + $0x50] sm:$0xff] %v656_v45   ;;  %v986_v52 = vunpack.c.l.bf16 %v656_v45  ;;  %v987_v53 = vunpack.c.h.bf16 %v656_v45  ;;  %v1048_v54 = vadd.f32 %v1047_v43, %v985_v26  ;;  %v1689_v55 = vpop.f32.mrb[24].mxu0  ;;  %v2109_v56 = vpop.f32.mrb[24].mxu1 }
 0x137   :  { %v487_v59 = vpop.f32.mrb[25].mxu0  ;;  %v2115_v47 = vpop.f32.mrb[25].mxu1  ;;  %v496_v5 = vadd.f32 %v1689_v55, %v1971_v41  ;;  %v1122_v18 = vmul.f32 %v988_v57, %v988_v57  ;;  %v1123_v23 = vmul.f32 %v989_v61, %v989_v61  ;;  %v611_v26 = vadd.f32 %v1718_v25, %v1971_v41 }
 0x138   :  { %v1049_v62 = vadd.f32 %v1048_v54, %v986_v52  ;;  %v1120_v63 = vmul.f32 %v986_v52, %v986_v52  ;;  %v1182_v0 = vadd.f32 %v1181_v51, %v1119_v46  ;;  %v1690_v2 = vpop.f32.mrb[26].mxu0  ;;  %v2117_v3 = vpop.f32.mrb[26].mxu1  ;;  %v1121_v4 = vmul.f32 %v987_v53, %v987_v53 }
 0x139   :  { %v488_v6 = vadd.f32 %v1971_v41, %v487_v59  ;;  %v499_v7 = vadd.f32 %v1690_v2, %v1971_v41  ;;  %v490_v9 = vpop.f32.mrb[27].mxu0  ;;  %v2122_v11 = vpop.f32.mrb[27].mxu1  ;;  %v603_v59 = vadd.f32 %v1971_v41, %v2094_v34 }
 0x13a   :  { %v1050_v12 = vadd.f32 %v1049_v62, %v987_v53  ;;  %v1183_v13 = vadd.f32 %v1182_v0, %v1120_v63  ;;  %v491_v14 = vadd.f32 %v1971_v41, %v490_v9  ;;  %v2145_v53 = vpack.c.bf16 %v611_v26, %v608_v24 }
 0x13b   :  { %v659_v17 = vpack.c.bf16 %v499_v7, %v496_v5  ;;  %v627_v24 = vadd.f32 %v2117_v3, %v1971_v41 }
 0x13c   :  { %v1051_v20 = vadd.f32 %v1050_v12, %v988_v57  ;;  %v1184_v21 = vadd.f32 %v1183_v13, %v1121_v4  ;;  %v658_v22 = vpack.c.bf16 %v491_v14, %v488_v6  ;;  %1602 = vst [vmem:[%s2243_s3 + $0xd8] sm:$0xff] %v2145_v53   ;;  %v2154_v4 = vpack.c.bf16 %v603_v59, %v600_v40 }
 0x13d   :  { %1588 = vst [vmem:[%s2243_s3 + $0x68] sm:$0xff] %v659_v17   ;;  %v992_v37 = vunpack.c.l.bf16 %v659_v17  ;;  %v993_v38 = vunpack.c.h.bf16 %v659_v17  ;;  %v998_v12 = vunpack.c.l.bf16 %v1983_v60  ;;  %v624_v13 = vadd.f32 %v2109_v56, %v1971_v41 }
 0x13e   :  { %v1185_v27 = vadd.f32 %v1184_v21, %v1122_v18  ;;  %1587 = vst [vmem:[%s2243_s3 + $0x60] sm:$0xff] %v658_v22   ;;  %v990_v30 = vunpack.c.l.bf16 %v658_v22  ;;  %v991_v31 = vunpack.c.h.bf16 %v658_v22  ;;  %v1052_v32 = vadd.f32 %v1051_v20, %v989_v61  ;;  %v1693_v35 = vpop.f32.mrb[28].mxu0  ;;  %v1725_v36 = vpop.f32.mrb[28].mxu1  ;;  %1601 = vst [vmem:[%s2243_s3 + $0xd0] sm:$0xff] %v2154_v4  }
 0x13f   :  { %v503_v39 = vpop.f32.mrb[29].mxu0  ;;  %v631_v42 = vpop.f32.mrb[29].mxu1  ;;  %v512_v44 = vadd.f32 %v1693_v35, %v1971_v41  ;;  %v1126_v61 = vmul.f32 %v992_v37, %v992_v37  ;;  %v1127_v5 = vmul.f32 %v993_v38, %v993_v38  ;;  %v2176_v56 = vpack.c.bf16 %v627_v24, %v624_v13 }
 0x140   :  { %v1053_v16 = vadd.f32 %v1052_v32, %v990_v30  ;;  %v1124_v43 = vmul.f32 %v990_v30, %v990_v30  ;;  %v1186_v25 = vadd.f32 %v1185_v27, %v1123_v23  ;;  %v1694_v45 = vpop.f32.mrb[30].mxu0  ;;  %v1726_v46 = vpop.f32.mrb[30].mxu1  ;;  %v1125_v48 = vmul.f32 %v991_v31, %v991_v31 }
 0x141   :  { %v504_v50 = vadd.f32 %v1971_v41, %v503_v39  ;;  %v515_v51 = vadd.f32 %v1694_v45, %v1971_v41  ;;  %v506_v52 = vpop.f32.mrb[31].mxu0  ;;  %v634_v54 = vpop.f32.mrb[31].mxu1  ;;  %v616_v23 = vadd.f32 %v1971_v41, %v2115_v47  ;;  %v619_v30 = vadd.f32 %v1971_v41, %v2122_v11  ;;  %1604 = vst [vmem:[%s2243_s3 + $0xe8] sm:$0xff] %v2176_v56  }
 0x142   :  { %v1054_v55 = vadd.f32 %v1053_v16, %v991_v31  ;;  %v1187_v57 = vadd.f32 %v1186_v25, %v1124_v43  ;;  %v507_v19 = vadd.f32 %v1971_v41, %v506_v52  ;;  %v640_v31 = vadd.f32 %v1725_v36, %v1971_v41 }
 0x143   :  { %v661_v62 = vpack.c.bf16 %v515_v51, %v512_v44  ;;  %v632_v32 = vadd.f32 %v1971_v41, %v631_v42  ;;  %v643_v35 = vadd.f32 %v1726_v46, %v1971_v41  ;;  %v2181_v40 = vpack.c.bf16 %v619_v30, %v616_v23 }
 0x144   :  { %v1055_v63 = vadd.f32 %v1054_v55, %v992_v37  ;;  %v1188_v0 = vadd.f32 %v1187_v57, %v1125_v48  ;;  %v660_v2 = vpack.c.bf16 %v507_v19, %v504_v50  ;;  %v635_v37 = vadd.f32 %v1971_v41, %v634_v54 }
 0x145   :  { %1590 = vst [vmem:[%s2243_s3 + $0x78] sm:$0xff] %v661_v62   ;;  %v996_v14 = vunpack.c.l.bf16 %v661_v62  ;;  %v997_v21 = vunpack.c.h.bf16 %v661_v62  ;;  %v2187_v3 = vpack.c.bf16 %v643_v35, %v640_v31  ;;  %v999_v16 = vunpack.c.h.bf16 %v1983_v60  ;;  %1603 = vst [vmem:[%s2243_s3 + $0xe0] sm:$0xff] %v2181_v40  }
 0x146   :  { %v1189_v6 = vadd.f32 %v1188_v0, %v1126_v61  ;;  %1589 = vst [vmem:[%s2243_s3 + $0x70] sm:$0xff] %v660_v2   ;;  %v994_v34 = vunpack.c.l.bf16 %v660_v2  ;;  %v995_v7 = vunpack.c.h.bf16 %v660_v2  ;;  %v1056_v9 = vadd.f32 %v1055_v63, %v993_v38 }
 0x147   :  { %v1130_v38 = vmul.f32 %v996_v14, %v996_v14  ;;  %v2189_v11 = vpack.c.bf16 %v635_v37, %v632_v32  ;;  %v1131_v36 = vmul.f32 %v997_v21, %v997_v21  ;;  %1606 = vst [vmem:[%s2243_s3 + $0xf8] sm:$0xff] %v2187_v3   ;;  %v1000_v41 = vunpack.c.l.bf16 %v1981_v58 }
 0x148   :  { %v1057_v17 = vadd.f32 %v1056_v9, %v994_v34  ;;  %v1128_v18 = vmul.f32 %v994_v34, %v994_v34  ;;  %v1190_v20 = vadd.f32 %v1189_v6, %v1127_v5  ;;  %v1129_v22 = vmul.f32 %v995_v7, %v995_v7 }
 0x149   :  { %1605 = vst [vmem:[%s2243_s3 + $0xf0] sm:$0xff] %v2189_v11   ;;  %v1132_v60 = vmul.f32 %v998_v12, %v998_v12  ;;  %v1001_v45 = vunpack.c.h.bf16 %v1981_v58  ;;  %v1133_v48 = vmul.f32 %v999_v16, %v999_v16  ;;  %v1134_v51 = vmul.f32 %v1000_v41, %v1000_v41 }
 0x14a   :  { %v1058_v26 = vadd.f32 %v1057_v17, %v995_v7  ;;  %v1191_v27 = vadd.f32 %v1190_v20, %v1128_v18  ;;  %v1002_v55 = vunpack.c.l.bf16 %v2012_v29  ;;  %v1003_v59 = vunpack.c.h.bf16 %v2012_v29 }
 0x14b   :  { %v1135_v57 = vmul.f32 %v1001_v45, %v1001_v45  ;;  %v1004_v62 = vunpack.c.l.bf16 %v2010_v28  ;;  %v1005_v58 = vunpack.c.h.bf16 %v2010_v28  ;;  %v1006_v13 = vunpack.c.l.bf16 %v2049_v33 }
 0x14c   :  { %v1059_v47 = vadd.f32 %v1058_v26, %v996_v14  ;;  %v1192_v39 = vadd.f32 %v1191_v27, %v1129_v22  ;;  %v1136_v0 = vmul.f32 %v1002_v55, %v1002_v55  ;;  %v1137_v6 = vmul.f32 %v1003_v59, %v1003_v59 }
 0x14d   :  { %v1138_v7 = vmul.f32 %v1004_v62, %v1004_v62  ;;  %v1139_v14 = vmul.f32 %v1005_v58, %v1005_v58  ;;  %v1007_v29 = vunpack.c.h.bf16 %v2049_v33  ;;  %v1008_v20 = vunpack.c.l.bf16 %v2037_v8 }
 0x14e   :  { %v1193_v42 = vadd.f32 %v1192_v39, %v1130_v38  ;;  %v1060_v43 = vadd.f32 %v1059_v47, %v997_v21  ;;  %v1140_v22 = vmul.f32 %v1006_v13, %v1006_v13  ;;  %v1009_v28 = vunpack.c.h.bf16 %v2037_v8 }
 0x14f   :  { %v1141_v26 = vmul.f32 %v1007_v29, %v1007_v29  ;;  %v1142_v30 = vmul.f32 %v1008_v20, %v1008_v20  ;;  %v1010_v35 = vunpack.c.l.bf16 %v2078_v10  ;;  %v1011_v33 = vunpack.c.h.bf16 %v2078_v10 }
 0x150   :  { %v1061_v25 = vadd.f32 %v1060_v43, %v998_v12  ;;  %v1194_v44 = vadd.f32 %v1193_v42, %v1131_v36  ;;  %v1143_v37 = vmul.f32 %v1009_v28, %v1009_v28  ;;  %v1012_v39 = vunpack.c.l.bf16 %v2068_v1 }
 0x151   :  { %v1144_v42 = vmul.f32 %v1010_v35, %v1010_v35  ;;  %v1013_v8 = vunpack.c.h.bf16 %v2068_v1  ;;  %v1015_v10 = vunpack.c.h.bf16 %v2125_v15  ;;  %v1017_v1 = vunpack.c.h.bf16 %v2103_v49 }
 0x152   :  { %v1062_v46 = vadd.f32 %v1061_v25, %v999_v16  ;;  %v1195_v50 = vadd.f32 %v1194_v44, %v1132_v60  ;;  %v1146_v60 = vmul.f32 %v1012_v39, %v1012_v39 }
 0x154   :  { %v1063_v52 = vadd.f32 %v1062_v46, %v1000_v41  ;;  %v1196_v54 = vadd.f32 %v1195_v50, %v1133_v48  ;;  %v1145_v41 = vmul.f32 %v1011_v33, %v1011_v33  ;;  %v1014_v46 = vunpack.c.l.bf16 %v2125_v15 }
 0x155   :  { %v1147_v48 = vmul.f32 %v1013_v8, %v1013_v8  ;;  %v1019_v15 = vunpack.c.h.bf16 %v2154_v4 }
 0x156   :  { %v1197_v19 = vadd.f32 %v1196_v54, %v1134_v51  ;;  %v1064_v61 = vadd.f32 %v1063_v52, %v1001_v45  ;;  %v1016_v52 = vunpack.c.l.bf16 %v2103_v49  ;;  %v1021_v49 = vunpack.c.h.bf16 %v2145_v53 }
 0x158   :  { %v1065_v63 = vadd.f32 %v1064_v61, %v1002_v55  ;;  %v1198_v2 = vadd.f32 %v1197_v19, %v1135_v57  ;;  %v1148_v55 = vmul.f32 %v1014_v46, %v1014_v46 }
 0x15a   :  { %v1066_v5 = vadd.f32 %v1065_v63, %v1003_v59  ;;  %v1199_v34 = vadd.f32 %v1198_v2, %v1136_v0  ;;  %v1149_v59 = vmul.f32 %v1015_v10, %v1015_v10  ;;  %v1018_v2 = vunpack.c.l.bf16 %v2154_v4 }
 0x15b   :  { %v1023_v4 = vunpack.c.h.bf16 %v2181_v40 }
 0x15c   :  { %v1067_v9 = vadd.f32 %v1066_v5, %v1004_v62  ;;  %v1200_v12 = vadd.f32 %v1199_v34, %v1137_v6  ;;  %v1150_v62 = vmul.f32 %v1016_v52, %v1016_v52  ;;  %v1020_v34 = vunpack.c.l.bf16 %v2145_v53 }
 0x15d   :  { %v1025_v53 = vunpack.c.h.bf16 %v2176_v56 }
 0x15e   :  { %v1201_v17 = vadd.f32 %v1200_v12, %v1138_v7  ;;  %v1068_v18 = vadd.f32 %v1067_v9, %v1005_v58  ;;  %v1151_v58 = vmul.f32 %v1017_v1, %v1017_v1  ;;  %v1152_v9 = vmul.f32 %v1018_v2, %v1018_v2 }
 0x160   :  { %v1069_v21 = vadd.f32 %v1068_v18, %v1006_v13  ;;  %v1202_v23 = vadd.f32 %v1201_v17, %v1139_v14  ;;  %v1153_v14 = vmul.f32 %v1019_v15, %v1019_v15 }
 0x162   :  { %v1070_v24 = vadd.f32 %v1069_v21, %v1007_v29  ;;  %v1203_v27 = vadd.f32 %v1202_v23, %v1140_v22  ;;  %v1154_v29 = vmul.f32 %v1020_v34, %v1020_v34  ;;  %v1022_v21 = vunpack.c.l.bf16 %v2181_v40 }
 0x163   :  { %v1155_v22 = vmul.f32 %v1021_v49, %v1021_v49  ;;  %v1027_v40 = vunpack.c.h.bf16 %v2189_v11 }
 0x164   :  { %v1071_v31 = vadd.f32 %v1070_v24, %v1008_v20  ;;  %v1204_v32 = vadd.f32 %v1203_v27, %v1141_v26  ;;  %v1024_v24 = vunpack.c.l.bf16 %v2176_v56  ;;  %v1156_v27 = vmul.f32 %v1022_v21, %v1022_v21 }
 0x165   :  { %v1029_v56 = vunpack.c.h.bf16 %v2187_v3 }
 0x166   :  { %v1205_v38 = vadd.f32 %v1204_v32, %v1142_v30  ;;  %v1072_v47 = vadd.f32 %v1071_v31, %v1009_v28  ;;  %v1157_v32 = vmul.f32 %v1023_v4, %v1023_v4 }
 0x168   :  { %v1073_v36 = vadd.f32 %v1072_v47, %v1010_v35  ;;  %v1206_v16 = vadd.f32 %v1205_v38, %v1143_v37  ;;  %v1158_v37 = vmul.f32 %v1024_v24, %v1024_v24  ;;  %v1026_v47 = vunpack.c.l.bf16 %v2189_v11 }
 0x16a   :  { %v1074_v43 = vadd.f32 %v1073_v36, %v1011_v33  ;;  %v1207_v25 = vadd.f32 %v1206_v16, %v1144_v42  ;;  %v1028_v16 = vunpack.c.l.bf16 %v2187_v3 }
 0x16c   :  { %v1075_v44 = vadd.f32 %v1074_v43, %v1012_v39  ;;  %v1208_v45 = vadd.f32 %v1207_v25, %v1145_v41  ;;  %v1159_v39 = vmul.f32 %v1025_v53, %v1025_v53  ;;  %v1160_v43 = vmul.f32 %v1026_v47, %v1026_v47 }
 0x16e   :  { %v1209_v50 = vadd.f32 %v1208_v45, %v1146_v60  ;;  %v1076_v51 = vadd.f32 %v1075_v44, %v1013_v8  ;;  %v1161_v60 = vmul.f32 %v1027_v40, %v1027_v40  ;;  %v1162_v45 = vmul.f32 %v1028_v16, %v1028_v16 }
 0x170   :  { %v1077_v54 = vadd.f32 %v1076_v51, %v1014_v46  ;;  %v1210_v57 = vadd.f32 %v1209_v50, %v1147_v48  ;;  %v1163_v50 = vmul.f32 %v1029_v56, %v1029_v56 }
 0x172   :  { %v1078_v19 = vadd.f32 %v1077_v54, %v1015_v10  ;;  %v1211_v61 = vadd.f32 %v1210_v57, %v1148_v55 }
 0x174   :  { %v1079_v63 = vadd.f32 %v1078_v19, %v1016_v52  ;;  %v1212_v0 = vadd.f32 %v1211_v61, %v1149_v59 }
 0x176   :  { %v1213_v5 = vadd.f32 %v1212_v0, %v1150_v62  ;;  %v1080_v6 = vadd.f32 %v1079_v63, %v1017_v1 }
 0x178   :  { %v1081_v7 = vadd.f32 %v1080_v6, %v1018_v2  ;;  %v1214_v12 = vadd.f32 %v1213_v5, %v1151_v58 }
 0x17a   :  { %v1082_v13 = vadd.f32 %v1081_v7, %v1019_v15  ;;  %v1215_v17 = vadd.f32 %v1214_v12, %v1152_v9 }
 0x17c   :  { %v1083_v18 = vadd.f32 %v1082_v13, %v1020_v34  ;;  %v1216_v20 = vadd.f32 %v1215_v17, %v1153_v14 }
 0x17e   :  { %v1217_v23 = vadd.f32 %v1216_v20, %v1154_v29  ;;  %v1084_v28 = vadd.f32 %v1083_v18, %v1021_v49 }
 0x180   :  { %v1085_v26 = vadd.f32 %v1084_v28, %v1022_v21  ;;  %v1218_v30 = vadd.f32 %v1217_v23, %v1155_v22 }
 0x182   :  { %v1086_v31 = vadd.f32 %v1085_v26, %v1023_v4  ;;  %v1219_v35 = vadd.f32 %v1218_v30, %v1156_v27 }
 0x184   :  { %v1087_v38 = vadd.f32 %v1086_v31, %v1024_v24  ;;  %v1220_v33 = vadd.f32 %v1219_v35, %v1157_v32 }
 0x186   :  { %v1221_v36 = vadd.f32 %v1220_v33, %v1158_v37  ;;  %v1088_v42 = vadd.f32 %v1087_v38, %v1025_v53 }
 0x188   :  { %v1089_v8 = vadd.f32 %v1088_v42, %v1026_v47  ;;  %v1222_v41 = vadd.f32 %v1221_v36, %v1159_v39 }
 0x18a   :  { %v1090_v25 = vadd.f32 %v1089_v8, %v1027_v40  ;;  %v1223_v44 = vadd.f32 %v1222_v41, %v1160_v43 }
 0x18c   :  { %v1091_v46 = vadd.f32 %v1090_v25, %v1028_v16  ;;  %v1224_v48 = vadd.f32 %v1223_v44, %v1161_v60 }
 0x18e   :  { %v1092_v10 = vadd.f32 %v1091_v46, %v1029_v56  ;;  %v1225_v51 = vadd.f32 %v1224_v48, %v1162_v45 }
 0x190   :  { %v1093_v52 = vrot.slane %v1092_v10, 4  ;;  %v1226_v54 = vadd.f32 %v1225_v51, %v1163_v50 }
 0x192   :  { %v1094_v11 = vadd.f32 %v1093_v52, %v1092_v10  ;;  %v1227_v55 = vrot.slane %v1226_v54, 4 }
 0x194   :  { %v1095_v57 = vrot.slane %v1094_v11, 2  ;;  %v1228_v1 = vadd.f32 %v1227_v55, %v1226_v54 }
 0x196   :  { %v1096_v19 = vadd.f32 %v1095_v57, %v1094_v11  ;;  %v1229_v59 = vrot.slane %v1228_v1, 2 }
 0x198   :  { %v1097_v61 = vrot.slane %v1096_v19, 1  ;;  %v1230_v62 = vadd.f32 %v1229_v59, %v1228_v1 }
 0x19a   :  { %v1098_v3 = vadd.f32 %v1097_v61, %v1096_v19  ;;  %v1231_v63 = vrot.slane %v1230_v62, 1 }
 0x19c   :  { %1099 = vst [vmem:[%s2244_s4] sm:$0x1] %v1098_v3  ;;  %v1232_v0 = vadd.f32 %v1231_v63, %v1230_v62 }
 0x19e   :  { %1233 = vst [vmem:[%s2245_s5] sm:$0x1] %v1232_v0 }
 0x19f   :  { %1246 = vsyncpa [#allocation3], 1 }

// kernel: block_forward.7
= control target key start
LH: loop header
LB: loop body
LE: loop exit
PB: predicated region body
PF: predicated region fallthrough
CT: control target
= control target key end

     0   :  { %s874_s0 = inlined_call_operand.vmem [shape: bf16[512,128], index: 0, kind: input, shape index: {}]   ;;  %s875_s1 = inlined_call_operand.vmem [shape: f32[2,128], index: 1, kind: input, shape index: {}]   ;;  %s876_s2 = inlined_call_operand.hbm [shape: f32[512,128], index: 2, kind: output, shape index: {}]  }
   0x1   :  { %v425_v0 = vld [vmem:[%s874_s0] sm:$0xff]   ;;  %v552_v4 = vld [vmem:[%s874_s0 + $0x8] sm:$0xff]   ;;  %v553_v5 = vld [vmem:[%s874_s0 + $0x10] sm:$0xff]  }
   0x2   :  { %v634_v1 = vld [vmem:[%s875_s1] ss:$0 sm:$0xff]  ;;  %v426_v2 = vunpack.c.l.bf16 %v425_v0  ;;  %v427_v3 = vunpack.c.h.bf16 %v425_v0  ;;  %v554_v6 = vld [vmem:[%s874_s0 + $0x18] sm:$0xff]   ;;  %v648_v7 = vld [vmem:[%s875_s1 + $0x1] ss:$0 sm:$0xff]  ;;  %v430_v8 = vunpack.c.l.bf16 %v552_v4  ;;  %v431_v9 = vunpack.c.h.bf16 %v552_v4 }
   0x3   :  { %v434_v10 = vunpack.c.l.bf16 %v553_v5  ;;  %v435_v11 = vunpack.c.h.bf16 %v553_v5  ;;  %v438_v14 = vunpack.c.l.bf16 %v554_v6  ;;  %v439_v15 = vunpack.c.h.bf16 %v554_v6  ;;  %v555_v28 = vld [vmem:[%s874_s0 + $0x20] sm:$0xff]   ;;  %v556_v33 = vld [vmem:[%s874_s0 + $0x28] sm:$0xff]   ;;  %v557_v34 = vld [vmem:[%s874_s0 + $0x30] sm:$0xff]  }
   0x4   :  { %v145_v12 = vmul.f32 %v426_v2, %v634_v1  ;;  %v146_v13 = vmul.f32 %v427_v3, %v634_v1  ;;  %v147_v16 = vmul.f32 %v430_v8, %v634_v1  ;;  %v148_v17 = vmul.f32 %v431_v9, %v634_v1  ;;  %v558_v39 = vld [vmem:[%s874_s0 + $0x38] sm:$0xff]  }
   0x5   :  { %v149_v18 = vmul.f32 %v434_v10, %v634_v1  ;;  %v150_v19 = vmul.f32 %v435_v11, %v634_v1  ;;  %v151_v22 = vmul.f32 %v438_v14, %v634_v1  ;;  %v152_v23 = vmul.f32 %v439_v15, %v634_v1 }
   0x6   :  { %v214_v20 = vadd.f32 %v648_v7, %v145_v12  ;;  %v215_v21 = vadd.f32 %v648_v7, %v146_v13  ;;  %v216_v24 = vadd.f32 %v648_v7, %v147_v16  ;;  %v217_v25 = vadd.f32 %v648_v7, %v148_v17 }
   0x7   :  { %v218_v26 = vadd.f32 %v648_v7, %v149_v18  ;;  %v219_v27 = vadd.f32 %v648_v7, %v150_v19  ;;  %v220_v31 = vadd.f32 %v648_v7, %v151_v22  ;;  %v221_v32 = vadd.f32 %v648_v7, %v152_v23 }
   0x8   :  { %v278_v29 = vmax.f32 %v214_v20, 0.0  ;;  %v279_v30 = vmax.f32 %v215_v21, 0.0  ;;  %v280_v35 = vmax.f32 %v216_v24, 0.0  ;;  %v281_v36 = vmax.f32 %v217_v25, 0.0 }
   0x9   :  { %v282_v37 = vmax.f32 %v218_v26, 0.0  ;;  %v283_v38 = vmax.f32 %v219_v27, 0.0  ;;  %v284_v40 = vmax.f32 %v220_v31, 0.0  ;;  %v285_v41 = vmax.f32 %v221_v32, 0.0 }
   0xa   :  { %342 = vst [vmem:[#allocation2] sm:$0xff] %v278_v29  ;;  %343 = vst [vmem:[#allocation2 + $0x8] sm:$0xff] %v279_v30  ;;  %v442_v42 = vunpack.c.l.bf16 %v555_v28  ;;  %v443_v43 = vunpack.c.h.bf16 %v555_v28  ;;  %v446_v44 = vunpack.c.l.bf16 %v556_v33  ;;  %v447_v45 = vunpack.c.h.bf16 %v556_v33 }
   0xb   :  { %344 = vst [vmem:[#allocation2 + $0x10] sm:$0xff] %v280_v35  ;;  %345 = vst [vmem:[#allocation2 + $0x18] sm:$0xff] %v281_v36  ;;  %v450_v46 = vunpack.c.l.bf16 %v557_v34  ;;  %v451_v47 = vunpack.c.h.bf16 %v557_v34  ;;  %v454_v50 = vunpack.c.l.bf16 %v558_v39  ;;  %v455_v51 = vunpack.c.h.bf16 %v558_v39 }
   0xc   :  { %346 = vst [vmem:[#allocation2 + $0x20] sm:$0xff] %v282_v37  ;;  %347 = vst [vmem:[#allocation2 + $0x28] sm:$0xff] %v283_v38  ;;  %v153_v48 = vmul.f32 %v442_v42, %v634_v1  ;;  %v154_v49 = vmul.f32 %v443_v43, %v634_v1 }
   0xd   :  { %348 = vst [vmem:[#allocation2 + $0x30] sm:$0xff] %v284_v40  ;;  %349 = vst [vmem:[#allocation2 + $0x38] sm:$0xff] %v285_v41 }
   0xe   :  { %7 = vsyncpa [#allocation3], 0  ;;  %v155_v52 = vmul.f32 %v446_v44, %v634_v1  ;;  %v156_v53 = vmul.f32 %v447_v45, %v634_v1  ;;  %v157_v54 = vmul.f32 %v450_v46, %v634_v1  ;;  %v158_v55 = vmul.f32 %v451_v47, %v634_v1  ;;  %v559_v0 = vld [vmem:[%s874_s0 + $0x40] sm:$0xff]   ;;  %v560_v6 = vld [vmem:[%s874_s0 + $0x48] sm:$0xff]  }
   0xf   :  { %v222_v56 = vadd.f32 %v648_v7, %v153_v48  ;;  %v223_v57 = vadd.f32 %v648_v7, %v154_v49  ;;  %v159_v58 = vmul.f32 %v454_v50, %v634_v1  ;;  %v160_v59 = vmul.f32 %v455_v51, %v634_v1  ;;  %v561_v8 = vld [vmem:[%s874_s0 + $0x50] sm:$0xff]   ;;  %v562_v13 = vld [vmem:[%s874_s0 + $0x58] sm:$0xff]   ;;  %v563_v38 = vld [vmem:[%s874_s0 + $0x60] sm:$0xff]  }
  0x10   :  { %v224_v60 = vadd.f32 %v648_v7, %v155_v52  ;;  %v225_v61 = vadd.f32 %v648_v7, %v156_v53  ;;  %v226_v62 = vadd.f32 %v648_v7, %v157_v54  ;;  %v227_v63 = vadd.f32 %v648_v7, %v158_v55  ;;  %v564_v43 = vld [vmem:[%s874_s0 + $0x68] sm:$0xff]   ;;  %v565_v44 = vld [vmem:[%s874_s0 + $0x70] sm:$0xff]   ;;  %v566_v49 = vld [vmem:[%s874_s0 + $0x78] sm:$0xff]  }
  0x11   :  { %v286_v2 = vmax.f32 %v222_v56, 0.0  ;;  %v287_v3 = vmax.f32 %v223_v57, 0.0  ;;  %v228_v4 = vadd.f32 %v648_v7, %v159_v58  ;;  %v229_v5 = vadd.f32 %v648_v7, %v160_v59 }
  0x12   :  { %v288_v9 = vmax.f32 %v224_v60, 0.0  ;;  %v289_v10 = vmax.f32 %v225_v61, 0.0  ;;  %v290_v11 = vmax.f32 %v226_v62, 0.0  ;;  %v291_v12 = vmax.f32 %v227_v63, 0.0 }
  0x13   :  { %350 = vst [vmem:[#allocation2 + $0x40] sm:$0xff] %v286_v2  ;;  %351 = vst [vmem:[#allocation2 + $0x48] sm:$0xff] %v287_v3  ;;  %v292_v14 = vmax.f32 %v228_v4, 0.0  ;;  %v293_v15 = vmax.f32 %v229_v5, 0.0  ;;  %v458_v16 = vunpack.c.l.bf16 %v559_v0  ;;  %v459_v17 = vunpack.c.h.bf16 %v559_v0 }
  0x14   :  { %352 = vst [vmem:[#allocation2 + $0x50] sm:$0xff] %v288_v9  ;;  %353 = vst [vmem:[#allocation2 + $0x58] sm:$0xff] %v289_v10  ;;  %v462_v18 = vunpack.c.l.bf16 %v560_v6  ;;  %v463_v19 = vunpack.c.h.bf16 %v560_v6  ;;  %v466_v20 = vunpack.c.l.bf16 %v561_v8  ;;  %v467_v21 = vunpack.c.h.bf16 %v561_v8 }
  0x15   :  { %354 = vst [vmem:[#allocation2 + $0x60] sm:$0xff] %v290_v11  ;;  %355 = vst [vmem:[#allocation2 + $0x68] sm:$0xff] %v291_v12  ;;  %v161_v22 = vmul.f32 %v458_v16, %v634_v1  ;;  %v162_v23 = vmul.f32 %v459_v17, %v634_v1  ;;  %v470_v24 = vunpack.c.l.bf16 %v562_v13  ;;  %v471_v25 = vunpack.c.h.bf16 %v562_v13  ;;  %v567_v12 = vld [vmem:[%s874_s0 + $0x80] sm:$0xff]   ;;  %v568_v17 = vld [vmem:[%s874_s0 + $0x88] sm:$0xff]  }
  0x16   :  { %356 = vst [vmem:[#allocation2 + $0x70] sm:$0xff] %v292_v14  ;;  %357 = vst [vmem:[#allocation2 + $0x78] sm:$0xff] %v293_v15  ;;  %v163_v26 = vmul.f32 %v462_v18, %v634_v1  ;;  %v164_v27 = vmul.f32 %v463_v19, %v634_v1  ;;  %v165_v28 = vmul.f32 %v466_v20, %v634_v1  ;;  %v474_v52 = vunpack.c.l.bf16 %v563_v38  ;;  %v569_v18 = vld [vmem:[%s874_s0 + $0x90] sm:$0xff]  }
  0x17   :  { %v166_v29 = vmul.f32 %v467_v21, %v634_v1  ;;  %v230_v30 = vadd.f32 %v648_v7, %v161_v22  ;;  %v231_v31 = vadd.f32 %v648_v7, %v162_v23  ;;  %v167_v32 = vmul.f32 %v470_v24, %v634_v1  ;;  %v570_v23 = vld [vmem:[%s874_s0 + $0x98] sm:$0xff]  }
  0x18   :  { %v168_v33 = vmul.f32 %v471_v25, %v634_v1  ;;  %v232_v34 = vadd.f32 %v648_v7, %v163_v26  ;;  %v233_v35 = vadd.f32 %v648_v7, %v164_v27  ;;  %v234_v36 = vadd.f32 %v648_v7, %v165_v28 }
  0x19   :  { %v235_v37 = vadd.f32 %v648_v7, %v166_v29  ;;  %v294_v39 = vmax.f32 %v230_v30, 0.0  ;;  %v295_v40 = vmax.f32 %v231_v31, 0.0  ;;  %v236_v41 = vadd.f32 %v648_v7, %v167_v32 }
  0x1a   :  { %v237_v42 = vadd.f32 %v648_v7, %v168_v33  ;;  %v296_v45 = vmax.f32 %v232_v34, 0.0  ;;  %v297_v46 = vmax.f32 %v233_v35, 0.0  ;;  %v298_v47 = vmax.f32 %v234_v36, 0.0 }
  0x1b   :  { %v299_v48 = vmax.f32 %v235_v37, 0.0  ;;  %358 = vst [vmem:[#allocation2 + $0x80] sm:$0xff] %v294_v39  ;;  %359 = vst [vmem:[#allocation2 + $0x88] sm:$0xff] %v295_v40  ;;  %v300_v50 = vmax.f32 %v236_v41, 0.0  ;;  %v475_v53 = vunpack.c.h.bf16 %v563_v38  ;;  %v478_v54 = vunpack.c.l.bf16 %v564_v43 }
  0x1c   :  { %v301_v51 = vmax.f32 %v237_v42, 0.0  ;;  %360 = vst [vmem:[#allocation2 + $0x90] sm:$0xff] %v296_v45  ;;  %361 = vst [vmem:[#allocation2 + $0x98] sm:$0xff] %v297_v46  ;;  %v479_v55 = vunpack.c.h.bf16 %v564_v43  ;;  %v482_v56 = vunpack.c.l.bf16 %v565_v44  ;;  %v483_v57 = vunpack.c.h.bf16 %v565_v44 }
  0x1d   :  { %362 = vst [vmem:[#allocation2 + $0xa0] sm:$0xff] %v298_v47  ;;  %363 = vst [vmem:[#allocation2 + $0xa8] sm:$0xff] %v299_v48  ;;  %v169_v58 = vmul.f32 %v474_v52, %v634_v1  ;;  %v170_v59 = vmul.f32 %v475_v53, %v634_v1  ;;  %v486_v60 = vunpack.c.l.bf16 %v566_v49  ;;  %v487_v61 = vunpack.c.h.bf16 %v566_v49  ;;  %v571_v48 = vld [vmem:[%s874_s0 + $0xa0] sm:$0xff]   ;;  %v572_v53 = vld [vmem:[%s874_s0 + $0xa8] sm:$0xff]  }
  0x1e   :  { %364 = vst [vmem:[#allocation2 + $0xb0] sm:$0xff] %v300_v50  ;;  %365 = vst [vmem:[#allocation2 + $0xb8] sm:$0xff] %v301_v51  ;;  %v171_v62 = vmul.f32 %v478_v54, %v634_v1  ;;  %v172_v63 = vmul.f32 %v479_v55, %v634_v1  ;;  %v173_v0 = vmul.f32 %v482_v56, %v634_v1  ;;  %v490_v26 = vunpack.c.l.bf16 %v567_v12  ;;  %v573_v54 = vld [vmem:[%s874_s0 + $0xb0] sm:$0xff]  }
  0x1f   :  { %v174_v2 = vmul.f32 %v483_v57, %v634_v1  ;;  %v238_v3 = vadd.f32 %v648_v7, %v169_v58  ;;  %v239_v4 = vadd.f32 %v648_v7, %v170_v59  ;;  %v175_v5 = vmul.f32 %v486_v60, %v634_v1  ;;  %v574_v59 = vld [vmem:[%s874_s0 + $0xb8] sm:$0xff]  }
  0x20   :  { %v176_v6 = vmul.f32 %v487_v61, %v634_v1  ;;  %v240_v8 = vadd.f32 %v648_v7, %v171_v62  ;;  %v241_v9 = vadd.f32 %v648_v7, %v172_v63  ;;  %v242_v10 = vadd.f32 %v648_v7, %v173_v0 }
  0x21   :  { %v243_v11 = vadd.f32 %v648_v7, %v174_v2  ;;  %v302_v13 = vmax.f32 %v238_v3, 0.0  ;;  %v303_v14 = vmax.f32 %v239_v4, 0.0  ;;  %v244_v15 = vadd.f32 %v648_v7, %v175_v5 }
  0x22   :  { %v245_v16 = vadd.f32 %v648_v7, %v176_v6  ;;  %v304_v19 = vmax.f32 %v240_v8, 0.0  ;;  %v305_v20 = vmax.f32 %v241_v9, 0.0  ;;  %v306_v21 = vmax.f32 %v242_v10, 0.0 }
  0x23   :  { %v307_v22 = vmax.f32 %v243_v11, 0.0  ;;  %366 = vst [vmem:[#allocation2 + $0xc0] sm:$0xff] %v302_v13  ;;  %367 = vst [vmem:[#allocation2 + $0xc8] sm:$0xff] %v303_v14  ;;  %v308_v24 = vmax.f32 %v244_v15, 0.0  ;;  %v491_v27 = vunpack.c.h.bf16 %v567_v12  ;;  %v494_v28 = vunpack.c.l.bf16 %v568_v17 }
  0x24   :  { %v309_v25 = vmax.f32 %v245_v16, 0.0  ;;  %368 = vst [vmem:[#allocation2 + $0xd0] sm:$0xff] %v304_v19  ;;  %369 = vst [vmem:[#allocation2 + $0xd8] sm:$0xff] %v305_v20  ;;  %v495_v29 = vunpack.c.h.bf16 %v568_v17  ;;  %v498_v30 = vunpack.c.l.bf16 %v569_v18  ;;  %v499_v31 = vunpack.c.h.bf16 %v569_v18 }
  0x25   :  { %370 = vst [vmem:[#allocation2 + $0xe0] sm:$0xff] %v306_v21  ;;  %371 = vst [vmem:[#allocation2 + $0xe8] sm:$0xff] %v307_v22  ;;  %v177_v32 = vmul.f32 %v490_v26, %v634_v1  ;;  %v178_v33 = vmul.f32 %v491_v27, %v634_v1  ;;  %v502_v34 = vunpack.c.l.bf16 %v570_v23  ;;  %v503_v35 = vunpack.c.h.bf16 %v570_v23  ;;  %v575_v22 = vld [vmem:[%s874_s0 + $0xc0] sm:$0xff]   ;;  %v576_v27 = vld [vmem:[%s874_s0 + $0xc8] sm:$0xff]  }
  0x26   :  { %372 = vst [vmem:[#allocation2 + $0xf0] sm:$0xff] %v308_v24  ;;  %373 = vst [vmem:[#allocation2 + $0xf8] sm:$0xff] %v309_v25  ;;  %v179_v36 = vmul.f32 %v494_v28, %v634_v1  ;;  %v180_v37 = vmul.f32 %v495_v29, %v634_v1  ;;  %v181_v38 = vmul.f32 %v498_v30, %v634_v1  ;;  %v506_v62 = vunpack.c.l.bf16 %v571_v48  ;;  %v577_v28 = vld [vmem:[%s874_s0 + $0xd0] sm:$0xff]  }
  0x27   :  { %v182_v39 = vmul.f32 %v499_v31, %v634_v1  ;;  %v246_v40 = vadd.f32 %v648_v7, %v177_v32  ;;  %v247_v41 = vadd.f32 %v648_v7, %v178_v33  ;;  %v183_v42 = vmul.f32 %v502_v34, %v634_v1  ;;  %v578_v33 = vld [vmem:[%s874_s0 + $0xd8] sm:$0xff]  }
  0x28   :  { %v184_v43 = vmul.f32 %v503_v35, %v634_v1  ;;  %v248_v44 = vadd.f32 %v648_v7, %v179_v36  ;;  %v249_v45 = vadd.f32 %v648_v7, %v180_v37  ;;  %v250_v46 = vadd.f32 %v648_v7, %v181_v38 }
  0x29   :  { %v251_v47 = vadd.f32 %v648_v7, %v182_v39  ;;  %v310_v49 = vmax.f32 %v246_v40, 0.0  ;;  %v311_v50 = vmax.f32 %v247_v41, 0.0  ;;  %v252_v51 = vadd.f32 %v648_v7, %v183_v42 }
  0x2a   :  { %v253_v52 = vadd.f32 %v648_v7, %v184_v43  ;;  %v312_v55 = vmax.f32 %v248_v44, 0.0  ;;  %v313_v56 = vmax.f32 %v249_v45, 0.0  ;;  %v314_v57 = vmax.f32 %v250_v46, 0.0 }
  0x2b   :  { %v315_v58 = vmax.f32 %v251_v47, 0.0  ;;  %374 = vst [vmem:[#allocation2 + $0x100] sm:$0xff] %v310_v49  ;;  %375 = vst [vmem:[#allocation2 + $0x108] sm:$0xff] %v311_v50  ;;  %v316_v60 = vmax.f32 %v252_v51, 0.0  ;;  %v507_v63 = vunpack.c.h.bf16 %v571_v48  ;;  %v510_v0 = vunpack.c.l.bf16 %v572_v53 }
  0x2c   :  { %v317_v61 = vmax.f32 %v253_v52, 0.0  ;;  %376 = vst [vmem:[#allocation2 + $0x110] sm:$0xff] %v312_v55  ;;  %377 = vst [vmem:[#allocation2 + $0x118] sm:$0xff] %v313_v56  ;;  %v511_v2 = vunpack.c.h.bf16 %v572_v53  ;;  %v514_v3 = vunpack.c.l.bf16 %v573_v54  ;;  %v515_v4 = vunpack.c.h.bf16 %v573_v54 }
  0x2d   :  { %378 = vst [vmem:[#allocation2 + $0x120] sm:$0xff] %v314_v57  ;;  %379 = vst [vmem:[#allocation2 + $0x128] sm:$0xff] %v315_v58  ;;  %v185_v5 = vmul.f32 %v506_v62, %v634_v1  ;;  %v186_v6 = vmul.f32 %v507_v63, %v634_v1  ;;  %v518_v8 = vunpack.c.l.bf16 %v574_v59  ;;  %v519_v9 = vunpack.c.h.bf16 %v574_v59  ;;  %v579_v58 = vld [vmem:[%s874_s0 + $0xe0] sm:$0xff]   ;;  %v580_v63 = vld [vmem:[%s874_s0 + $0xe8] sm:$0xff]  }
  0x2e   :  { %380 = vst [vmem:[#allocation2 + $0x130] sm:$0xff] %v316_v60  ;;  %381 = vst [vmem:[#allocation2 + $0x138] sm:$0xff] %v317_v61  ;;  %v187_v10 = vmul.f32 %v510_v0, %v634_v1  ;;  %v188_v11 = vmul.f32 %v511_v2, %v634_v1  ;;  %v189_v12 = vmul.f32 %v514_v3, %v634_v1  ;;  %v522_v36 = vunpack.c.l.bf16 %v575_v22  ;;  %v581_v0 = vld [vmem:[%s874_s0 + $0xf0] sm:$0xff]  }
  0x2f   :  { %v190_v13 = vmul.f32 %v515_v4, %v634_v1  ;;  %v254_v14 = vadd.f32 %v648_v7, %v185_v5  ;;  %v255_v15 = vadd.f32 %v648_v7, %v186_v6  ;;  %v191_v16 = vmul.f32 %v518_v8, %v634_v1  ;;  %v582_v6 = vld [vmem:[%s874_s0 + $0xf8] sm:$0xff]   ;;  %s610_s0 = smov [#allocation2]  }
  0x30   :  { %v192_v17 = vmul.f32 %v519_v9, %v634_v1  ;;  %v256_v18 = vadd.f32 %v648_v7, %v187_v10  ;;  %v257_v19 = vadd.f32 %v648_v7, %v188_v11  ;;  %v258_v20 = vadd.f32 %v648_v7, %v189_v12  ;;  %s411_s19 = sshll.u32 %s610_s0, 4  ;;  %s412_s19 = int_to_ptr.vmem [resolvable:$true] %s411_s19 }
  0x31   :  { %v259_v21 = vadd.f32 %v648_v7, %v190_v13  ;;  %v318_v23 = vmax.f32 %v254_v14, 0.0  ;;  %v319_v24 = vmax.f32 %v255_v15, 0.0  ;;  %v260_v25 = vadd.f32 %v648_v7, %v191_v16  ;;  %s586_s20 = scalar_lea.vmem %s412_s19, 8192  ;;  %p591_p1 = scmp.lt.s32.totalorder %s412_s19, %s412_s19 }
  0x32   :  { %v261_v26 = vadd.f32 %v648_v7, %v192_v17  ;;  %v320_v29 = vmax.f32 %v256_v18, 0.0  ;;  %v321_v30 = vmax.f32 %v257_v19, 0.0  ;;  %v322_v31 = vmax.f32 %v258_v20, 0.0  ;;  %p587_p0 = scmp.ne.s32.totalorder %s412_s19, %s586_s20  ;;  %p592_p2 = scmp.lt.s32.totalorder %s586_s20, %s586_s20 }
  0x33   :  { %v323_v32 = vmax.f32 %v259_v21, 0.0  ;;  %382 = vst [vmem:[#allocation2 + $0x140] sm:$0xff] %v318_v23  ;;  %383 = vst [vmem:[#allocation2 + $0x148] sm:$0xff] %v319_v24  ;;  %v324_v34 = vmax.f32 %v260_v25, 0.0  ;;  %v523_v37 = vunpack.c.h.bf16 %v575_v22  ;;  %v526_v38 = vunpack.c.l.bf16 %v576_v27 }
  0x34   :  { %v325_v35 = vmax.f32 %v261_v26, 0.0  ;;  %384 = vst [vmem:[#allocation2 + $0x150] sm:$0xff] %v320_v29  ;;  %385 = vst [vmem:[#allocation2 + $0x158] sm:$0xff] %v321_v30  ;;  %v527_v39 = vunpack.c.h.bf16 %v576_v27  ;;  %v530_v40 = vunpack.c.l.bf16 %v577_v28  ;;  %v531_v41 = vunpack.c.h.bf16 %v577_v28  ;;  %p593_p3 = por %p592_p2, %p591_p1 }
  0x35   :  { %386 = vst [vmem:[#allocation2 + $0x160] sm:$0xff] %v322_v31  ;;  %387 = vst [vmem:[#allocation2 + $0x168] sm:$0xff] %v323_v32  ;;  %v193_v42 = vmul.f32 %v522_v36, %v634_v1  ;;  %v194_v43 = vmul.f32 %v523_v37, %v634_v1  ;;  %v534_v44 = vunpack.c.l.bf16 %v578_v33  ;;  %v535_v45 = vunpack.c.h.bf16 %v578_v33 }
  0x36   :  { %388 = vst [vmem:[#allocation2 + $0x170] sm:$0xff] %v324_v34  ;;  %389 = vst [vmem:[#allocation2 + $0x178] sm:$0xff] %v325_v35  ;;  %v195_v46 = vmul.f32 %v526_v38, %v634_v1  ;;  %v196_v47 = vmul.f32 %v527_v39, %v634_v1  ;;  %v197_v48 = vmul.f32 %v530_v40, %v634_v1  ;;  %v538_v10 = vunpack.c.l.bf16 %v579_v58  ;;  %p594_p4 = pnand %p593_p3, %p587_p0 }
  0x37   :  { %v198_v49 = vmul.f32 %v531_v41, %v634_v1  ;;  %v262_v50 = vadd.f32 %v648_v7, %v193_v42  ;;  %v263_v51 = vadd.f32 %v648_v7, %v194_v43  ;;  %v199_v52 = vmul.f32 %v534_v44, %v634_v1 }
  0x38   :  { %v200_v53 = vmul.f32 %v535_v45, %v634_v1  ;;  %v264_v54 = vadd.f32 %v648_v7, %v195_v46  ;;  %v265_v55 = vadd.f32 %v648_v7, %v196_v47  ;;  %v266_v56 = vadd.f32 %v648_v7, %v197_v48 }
  0x39   :  { %v267_v57 = vadd.f32 %v648_v7, %v198_v49  ;;  %v326_v59 = vmax.f32 %v262_v50, 0.0  ;;  %v327_v60 = vmax.f32 %v263_v51, 0.0  ;;  %v268_v61 = vadd.f32 %v648_v7, %v199_v52 }
  0x3a   :  { %v269_v62 = vadd.f32 %v648_v7, %v200_v53  ;;  %v328_v2 = vmax.f32 %v264_v54, 0.0  ;;  %v329_v3 = vmax.f32 %v265_v55, 0.0  ;;  %v330_v4 = vmax.f32 %v266_v56, 0.0 }
  0x3b   :  { %v331_v5 = vmax.f32 %v267_v57, 0.0  ;;  %390 = vst [vmem:[#allocation2 + $0x180] sm:$0xff] %v326_v59  ;;  %391 = vst [vmem:[#allocation2 + $0x188] sm:$0xff] %v327_v60  ;;  %v332_v8 = vmax.f32 %v268_v61, 0.0  ;;  %v539_v11 = vunpack.c.h.bf16 %v579_v58  ;;  %v542_v12 = vunpack.c.l.bf16 %v580_v63 }
  0x3c   :  { %v333_v9 = vmax.f32 %v269_v62, 0.0  ;;  %392 = vst [vmem:[#allocation2 + $0x190] sm:$0xff] %v328_v2  ;;  %393 = vst [vmem:[#allocation2 + $0x198] sm:$0xff] %v329_v3  ;;  %v543_v13 = vunpack.c.h.bf16 %v580_v63  ;;  %v546_v14 = vunpack.c.l.bf16 %v581_v0  ;;  %v547_v15 = vunpack.c.h.bf16 %v581_v0 }
  0x3d   :  { %394 = vst [vmem:[#allocation2 + $0x1a0] sm:$0xff] %v330_v4  ;;  %395 = vst [vmem:[#allocation2 + $0x1a8] sm:$0xff] %v331_v5  ;;  %v201_v16 = vmul.f32 %v538_v10, %v634_v1  ;;  %v202_v17 = vmul.f32 %v539_v11, %v634_v1  ;;  %v550_v18 = vunpack.c.l.bf16 %v582_v6  ;;  %v551_v19 = vunpack.c.h.bf16 %v582_v6 }
  0x3e   :  { %396 = vst [vmem:[#allocation2 + $0x1b0] sm:$0xff] %v332_v8  ;;  %397 = vst [vmem:[#allocation2 + $0x1b8] sm:$0xff] %v333_v9  ;;  %v203_v20 = vmul.f32 %v542_v12, %v634_v1  ;;  %v204_v21 = vmul.f32 %v543_v13, %v634_v1  ;;  %v205_v22 = vmul.f32 %v546_v14, %v634_v1 }
  0x3f   :  { %v206_v23 = vmul.f32 %v547_v15, %v634_v1  ;;  %v270_v24 = vadd.f32 %v648_v7, %v201_v16  ;;  %v271_v25 = vadd.f32 %v648_v7, %v202_v17  ;;  %v207_v26 = vmul.f32 %v550_v18, %v634_v1 }
  0x40   :  { %v208_v27 = vmul.f32 %v551_v19, %v634_v1  ;;  %v272_v28 = vadd.f32 %v648_v7, %v203_v20  ;;  %v273_v29 = vadd.f32 %v648_v7, %v204_v21  ;;  %v274_v30 = vadd.f32 %v648_v7, %v205_v22 }
  0x41   :  { %v275_v31 = vadd.f32 %v648_v7, %v206_v23  ;;  %v334_v32 = vmax.f32 %v270_v24, 0.0  ;;  %v335_v33 = vmax.f32 %v271_v25, 0.0  ;;  %v276_v34 = vadd.f32 %v648_v7, %v207_v26 }
  0x42   :  { %v277_v35 = vadd.f32 %v648_v7, %v208_v27  ;;  %v336_v36 = vmax.f32 %v272_v28, 0.0  ;;  %v337_v37 = vmax.f32 %v273_v29, 0.0  ;;  %v338_v38 = vmax.f32 %v274_v30, 0.0 }
  0x43   :  { %v339_v1 = vmax.f32 %v275_v31, 0.0  ;;  %398 = vst [vmem:[#allocation2 + $0x1c0] sm:$0xff] %v334_v32  ;;  %399 = vst [vmem:[#allocation2 + $0x1c8] sm:$0xff] %v335_v33  ;;  %v340_v39 = vmax.f32 %v276_v34, 0.0 }
  0x44   :  { %v341_v40 = vmax.f32 %v277_v35, 0.0  ;;  %400 = vst [vmem:[#allocation2 + $0x1d0] sm:$0xff] %v336_v36  ;;  %401 = vst [vmem:[#allocation2 + $0x1d8] sm:$0xff] %v337_v37 }
  0x45   :  { %402 = vst [vmem:[#allocation2 + $0x1e0] sm:$0xff] %v338_v38  ;;  %403 = vst [vmem:[#allocation2 + $0x1e8] sm:$0xff] %v339_v1 }
  0x46   :  { %404 = vst [vmem:[#allocation2 + $0x1f0] sm:$0xff] %v340_v39  ;;  %405 = vst [vmem:[#allocation2 + $0x1f8] sm:$0xff] %v341_v40 }
  0x47   :  { %597 = shalt.err (!%p594_p4)
}
  0x48   :  { %s598_s22 = scalar_lea.hbm %s876_s2, 8192 }
  0x49   :  { %p599_p5 = scmp.ne.s32.totalorder %s876_s2, %s598_s22  ;;  %p602_p6 = scmp.lt.u32.totalorder %s598_s22, %s876_s2 }
  0x4b   :  { %p604_p7 = pnand %p602_p6, %p599_p5 }
  0x4d   :  { %607 = shalt.err (!%p604_p7)
}
  0x4e   :  { %s611_s27 = smov 128   ;;  %s612_s28 = smov 8  }
  0x4f   :  { %417 = dma.vmem_to_hbm [thread:$0]  %s412_s19, 8192, %s876_s2, [#allocation3], %s611_s27, %s611_s27, %s612_s28  }
  0x50   :  { %608 = dma.done.wait [#allocation3], 8192  }
  0x51   :  { %609 = vsyncadd [#allocation3], 4294959104 }
  0x52   :  { %421 = vsyncpa [#allocation3], 1 }

// kernel: block_forward.6
= control target key start
LH: loop header
LB: loop body
LE: loop exit
PB: predicated region body
PF: predicated region fallthrough
CT: control target
= control target key end

     0   :  { %s2554_s2 = inlined_call_operand.vmem [shape: bf16[128,128], index: 2, kind: input, shape index: {}]   ;;  %s2555_s0 = inlined_call_operand.vmem [shape: bf16[512,128], index: 0, kind: input, shape index: {}]   ;;  %s2556_s1 = inlined_call_operand.vmem [shape: f32[2,128], index: 1, kind: input, shape index: {}]   ;;  %s2557_s3 = inlined_call_operand.vmem [shape: f32[1,128], index: 3, kind: input, shape index: {}]   ;;  %s2558_s4 = inlined_call_operand.vmem [shape: bf16[512,128], index: 4, kind: output, shape index: {0}]   ;;  %s2559_s5 = inlined_call_operand.vmem [shape: f32[1,1,128], index: 5, kind: output, shape index: {1}]   ;;  %s2560_s6 = inlined_call_operand.vmem [shape: f32[1,1,128], index: 6, kind: output, shape index: {2}]  }
   0x1   :  { %v1968_v0 = vld [vmem:[%s2554_s2] sm:$0xff]   ;;  %v1969_v1 = vld [vmem:[%s2554_s2 + $0x8] sm:$0xff]   ;;  %v1970_v2 = vld [vmem:[%s2554_s2 + $0x10] sm:$0xff]  }
   0x2   :  { %1872 = vmatprep.subr.bf16.mxu0 %v1968_v0  ;;  %1952 = vmatprep.subr.bf16.mxu1 %v1968_v0  ;;  %v1971_v3 = vld [vmem:[%s2554_s2 + $0x18] sm:$0xff]   ;;  %v1483_v4 = vld [vmem:[%s2555_s0] sm:$0xff]   ;;  %v1770_v8 = vld [vmem:[%s2555_s0 + $0x8] sm:$0xff]  }
   0x3   :  { %1873 = vmatpush3.bf16.msra.mxu0 %v1968_v0  ;;  %1960 = vmatpush3.bf16.msra.mxu1 %v1968_v0  ;;  %v2029_v5 = vld [vmem:[%s2556_s1] ss:$0 sm:$0xff]  ;;  %v1484_v6 = vunpack.c.l.bf16 %v1483_v4  ;;  %v1485_v7 = vunpack.c.h.bf16 %v1483_v4  ;;  %v1771_v9 = vld [vmem:[%s2555_s0 + $0x10] sm:$0xff]   ;;  %v2040_v10 = vld [vmem:[%s2556_s1 + $0x1] ss:$0 sm:$0xff]  ;;  %v1488_v14 = vunpack.c.l.bf16 %v1770_v8  ;;  %v1489_v15 = vunpack.c.h.bf16 %v1770_v8 }
   0x4   :  { %1874 = vmatprep.subr.bf16.mxu0 %v1969_v1  ;;  %1953 = vmatprep.subr.bf16.mxu1 %v1969_v1  ;;  %v1972_v13 = vld [vmem:[%s2554_s2 + $0x20] sm:$0xff]   ;;  %v1492_v16 = vunpack.c.l.bf16 %v1771_v9  ;;  %v1493_v19 = vunpack.c.h.bf16 %v1771_v9  ;;  %v1973_v22 = vld [vmem:[%s2554_s2 + $0x28] sm:$0xff]   ;;  %v1772_v26 = vld [vmem:[%s2555_s0 + $0x18] sm:$0xff]  }
   0x5   :  { %v154_v11 = vmul.f32 %v1484_v6, %v2029_v5  ;;  %v155_v12 = vmul.f32 %v1485_v7, %v2029_v5  ;;  %v156_v23 = vmul.f32 %v1488_v14, %v2029_v5  ;;  %v157_v24 = vmul.f32 %v1489_v15, %v2029_v5  ;;  %v1773_v29 = vld [vmem:[%s2555_s0 + $0x20] sm:$0xff]   ;;  %v1974_v31 = vld [vmem:[%s2554_s2 + $0x30] sm:$0xff]   ;;  %v1774_v38 = vld [vmem:[%s2555_s0 + $0x28] sm:$0xff]  }
   0x6   :  { %v158_v25 = vmul.f32 %v1492_v16, %v2029_v5  ;;  %v159_v28 = vmul.f32 %v1493_v19, %v2029_v5  ;;  %v1496_v30 = vunpack.c.l.bf16 %v1772_v26  ;;  %v1497_v35 = vunpack.c.h.bf16 %v1772_v26  ;;  %v1775_v41 = vld [vmem:[%s2555_s0 + $0x30] sm:$0xff]   ;;  %v1776_v42 = vld [vmem:[%s2555_s0 + $0x38] sm:$0xff]   ;;  %v1777_v48 = vld [vmem:[%s2555_s0 + $0x40] sm:$0xff]  }
   0x7   :  { %1875 = vmatpush3.bf16.msra.mxu0 %v1969_v1  ;;  %1961 = vmatpush3.bf16.msra.mxu1 %v1969_v1  ;;  %v223_v17 = vadd.f32 %v2040_v10, %v154_v11  ;;  %v224_v18 = vadd.f32 %v2040_v10, %v155_v12  ;;  %v225_v32 = vadd.f32 %v2040_v10, %v156_v23  ;;  %v1500_v37 = vunpack.c.l.bf16 %v1773_v29  ;;  %v1975_v43 = vld [vmem:[%s2554_s2 + $0x38] sm:$0xff]   ;;  %v1778_v63 = vld [vmem:[%s2555_s0 + $0x48] sm:$0xff]   ;;  %v1779_v4 = vld [vmem:[%s2555_s0 + $0x50] sm:$0xff]  }
   0x8   :  { %1876 = vmatprep.subr.bf16.mxu0 %v1970_v2  ;;  %1954 = vmatprep.subr.bf16.mxu1 %v1970_v2  ;;  %v226_v33 = vadd.f32 %v2040_v10, %v157_v24  ;;  %v227_v34 = vadd.f32 %v2040_v10, %v158_v25  ;;  %v228_v36 = vadd.f32 %v2040_v10, %v159_v28  ;;  %v1501_v40 = vunpack.c.h.bf16 %v1773_v29  ;;  %v1780_v23 = vld [vmem:[%s2555_s0 + $0x58] sm:$0xff]  }
   0x9   :  { %v287_v20 = vmax.f32 %v223_v17, 0.0  ;;  %v288_v21 = vmax.f32 %v224_v18, 0.0  ;;  %v160_v39 = vmul.f32 %v1496_v30, %v2029_v5  ;;  %v289_v44 = vmax.f32 %v225_v32, 0.0 }
   0xa   :  { %v290_v45 = vmax.f32 %v226_v33, 0.0  ;;  %v291_v46 = vmax.f32 %v227_v34, 0.0  ;;  %v161_v47 = vmul.f32 %v1497_v35, %v2029_v5  ;;  %v292_v49 = vmax.f32 %v228_v36, 0.0 }
   0xb   :  { %1877 = vmatpush3.bf16.msra.mxu0 %v1970_v2  ;;  %1962 = vmatpush3.bf16.msra.mxu1 %v1970_v2  ;;  %v351_v27 = vpack.c.bf16 %v288_v21, %v287_v20  ;;  %v162_v50 = vmul.f32 %v1500_v37, %v2029_v5  ;;  %v1504_v51 = vunpack.c.l.bf16 %v1774_v38  ;;  %v1505_v52 = vunpack.c.h.bf16 %v1774_v38 }
   0xc   :  { %1878 = vmatprep.subr.bf16.mxu0 %v1971_v3  ;;  %1955 = vmatprep.subr.bf16.mxu1 %v1971_v3  ;;  %v1508_v53 = vunpack.c.l.bf16 %v1775_v41  ;;  %v1509_v54 = vunpack.c.h.bf16 %v1775_v41  ;;  %v1512_v55 = vunpack.c.l.bf16 %v1776_v42  ;;  %v1513_v56 = vunpack.c.h.bf16 %v1776_v42 }
   0xd   :  { %1888 = vmatprep.mubr.bf16.mxu0 %v351_v27  ;;  %v163_v57 = vmul.f32 %v1501_v40, %v2029_v5  ;;  %v1516_v58 = vunpack.c.l.bf16 %v1777_v48  ;;  %v1517_v59 = vunpack.c.h.bf16 %v1777_v48  ;;  %v352_v60 = vpack.c.bf16 %v290_v45, %v289_v44  ;;  %v1785_v44 = vld [vmem:[%s2555_s0 + $0x80] sm:$0xff]  }
   0xe   :  { %v229_v61 = vadd.f32 %v2040_v10, %v160_v39  ;;  %v230_v62 = vadd.f32 %v2040_v10, %v161_v47  ;;  %v353_v0 = vpack.c.bf16 %v292_v49, %v291_v46  ;;  %v231_v1 = vadd.f32 %v2040_v10, %v162_v50 }
   0xf   :  { %1879 = vmatpush3.bf16.msra.mxu0 %v1971_v3  ;;  %1963 = vmatpush3.bf16.msra.mxu1 %v1971_v3  ;;  %v164_v2 = vmul.f32 %v1504_v51, %v2029_v5  ;;  %v165_v3 = vmul.f32 %v1505_v52, %v2029_v5  ;;  %v166_v6 = vmul.f32 %v1508_v53, %v2029_v5  ;;  %v1520_v14 = vunpack.c.l.bf16 %v1778_v63  ;;  %v2133_v52 = vld [vmem:[%s2555_s0 + $0x60] sm:$0xff]  }
  0x10   :  { %1880 = vmatprep.subr.bf16.mxu0 %v1972_v13  ;;  %1956 = vmatprep.subr.bf16.mxu1 %v1972_v13  ;;  %v167_v7 = vmul.f32 %v1509_v54, %v2029_v5  ;;  %v168_v8 = vmul.f32 %v1512_v55, %v2029_v5  ;;  %v169_v9 = vmul.f32 %v1513_v56, %v2029_v5  ;;  %v293_v15 = vmax.f32 %v229_v61, 0.0 }
  0x11   :  { %v232_v11 = vadd.f32 %v2040_v10, %v163_v57  ;;  %v170_v12 = vmul.f32 %v1516_v58, %v2029_v5  ;;  %v294_v16 = vmax.f32 %v230_v62, 0.0  ;;  %v1521_v17 = vunpack.c.h.bf16 %v1778_v63 }
  0x12   :  { %v1524_v18 = vunpack.c.l.bf16 %v1779_v4  ;;  %v295_v19 = vmax.f32 %v231_v1, 0.0  ;;  %v233_v20 = vadd.f32 %v2040_v10, %v164_v2  ;;  %v234_v21 = vadd.f32 %v2040_v10, %v165_v3 }
  0x13   :  { %1881 = vmatpush3.bf16.msra.mxu0 %v1972_v13  ;;  %1964 = vmatpush3.bf16.msra.mxu1 %v1972_v13  ;;  %v171_v13 = vmul.f32 %v1517_v59, %v2029_v5  ;;  %v235_v24 = vadd.f32 %v2040_v10, %v166_v6  ;;  %v236_v25 = vadd.f32 %v2040_v10, %v167_v7  ;;  %v296_v28 = vmax.f32 %v232_v11, 0.0  ;;  %v1786_v59 = vld [vmem:[%s2555_s0 + $0x88] sm:$0xff]   ;;  %v1788_v11 = vld [vmem:[%s2555_s0 + $0x98] sm:$0xff]  }
  0x14   :  { %1882 = vmatprep.subr.bf16.mxu0 %v1973_v22  ;;  %1957 = vmatprep.subr.bf16.mxu1 %v1973_v22  ;;  %v237_v26 = vadd.f32 %v2040_v10, %v168_v8  ;;  %v238_v27 = vadd.f32 %v2040_v10, %v169_v9  ;;  %v239_v29 = vadd.f32 %v2040_v10, %v170_v12  ;;  %v1528_v35 = vunpack.c.l.bf16 %v1780_v23 }
  0x15   :  { %v240_v30 = vadd.f32 %v2040_v10, %v171_v13  ;;  %v354_v32 = vpack.c.bf16 %v294_v16, %v293_v15  ;;  %v173_v33 = vmul.f32 %v1521_v17, %v2029_v5  ;;  %v174_v34 = vmul.f32 %v1524_v18, %v2029_v5 }
  0x16   :  { %v297_v36 = vmax.f32 %v233_v20, 0.0  ;;  %v298_v37 = vmax.f32 %v234_v21, 0.0  ;;  %v1529_v39 = vunpack.c.h.bf16 %v1780_v23  ;;  %v299_v40 = vmax.f32 %v235_v24, 0.0  ;;  %v1789_v24 = vld [vmem:[%s2555_s0 + $0xa0] sm:$0xff]  }
  0x17   :  { %1883 = vmatpush3.bf16.msra.mxu0 %v1973_v22  ;;  %1965 = vmatpush3.bf16.msra.mxu1 %v1973_v22  ;;  %v1525_v22 = vunpack.c.h.bf16 %v1779_v4  ;;  %v300_v41 = vmax.f32 %v236_v25, 0.0  ;;  %v301_v42 = vmax.f32 %v237_v26, 0.0  ;;  %v355_v45 = vpack.c.bf16 %v296_v28, %v295_v19 }
  0x18   :  { %1884 = vmatprep.subr.bf16.mxu0 %v1974_v31  ;;  %1958 = vmatprep.subr.bf16.mxu1 %v1974_v31  ;;  %v303_v46 = vmax.f32 %v239_v29, 0.0  ;;  %v304_v47 = vmax.f32 %v240_v30, 0.0  ;;  %v242_v49 = vadd.f32 %v2040_v10, %v173_v33  ;;  %v2127_v50 = vadd.f32 %v2040_v10, %v174_v34  ;;  %v1790_v33 = vld [vmem:[%s2555_s0 + $0xa8] sm:$0xff]  }
  0x19   :  { %v175_v38 = vmul.f32 %v1525_v22, %v2029_v5  ;;  %v176_v51 = vmul.f32 %v1528_v35, %v2029_v5  ;;  %v177_v54 = vmul.f32 %v1529_v39, %v2029_v5  ;;  %v1548_v55 = vunpack.c.l.bf16 %v1785_v44 }
  0x1a   :  { %v356_v56 = vpack.c.bf16 %v298_v37, %v297_v36  ;;  %v357_v57 = vpack.c.bf16 %v300_v41, %v299_v40  ;;  %v1532_v62 = vunpack.c.l.bf16 %v2133_v52  ;;  %v1549_v63 = vunpack.c.h.bf16 %v1785_v44 }
  0x1b   :  { %1885 = vmatpush3.bf16.msra.mxu0 %v1974_v31  ;;  %1966 = vmatpush3.bf16.msra.mxu1 %v1974_v31  ;;  %v172_v31 = vmul.f32 %v1520_v14, %v2029_v5  ;;  %v2136_v53 = vadd.f32 %v2040_v10, %v175_v38  ;;  %v306_v1 = vmax.f32 %v242_v49, 0.0  ;;  %v307_v2 = vmax.f32 %v2127_v50, 0.0 }
  0x1c   :  { %1886 = vmatprep.subr.bf16.mxu0 %v1975_v43  ;;  %1959 = vmatprep.subr.bf16.mxu1 %v1975_v43  ;;  %v2152_v3 = vadd.f32 %v2040_v10, %v176_v51  ;;  %v186_v4 = vmul.f32 %v1548_v55, %v2029_v5  ;;  %v2157_v7 = vadd.f32 %v2040_v10, %v177_v54  ;;  %v1552_v9 = vunpack.c.l.bf16 %v1786_v59 }
  0x1d   :  { %v241_v48 = vadd.f32 %v2040_v10, %v172_v31  ;;  %v308_v6 = vmax.f32 %v2136_v53, 0.0  ;;  %v187_v8 = vmul.f32 %v1549_v63, %v2029_v5  ;;  %v1533_v12 = vunpack.c.h.bf16 %v2133_v52 }
  0x1e   :  { %v255_v13 = vadd.f32 %v2040_v10, %v186_v4  ;;  %v1553_v14 = vunpack.c.h.bf16 %v1786_v59  ;;  %v2166_v16 = vmul.f32 %v1532_v62, %v2029_v5  ;;  %v188_v18 = vmul.f32 %v1552_v9, %v2029_v5 }
  0x1f   :  { %1887 = vmatpush3.bf16.msra.mxu0 %v1975_v43  ;;  %1967 = vmatpush3.bf16.msra.mxu1 %v1975_v43  ;;  %v302_v43 = vmax.f32 %v238_v27, 0.0  ;;  %v305_v61 = vmax.f32 %v241_v48, 0.0  ;;  %v256_v17 = vadd.f32 %v2040_v10, %v187_v8  ;;  %v1560_v23 = vunpack.c.l.bf16 %v1788_v11 }
  0x20   :  { %v319_v20 = vmax.f32 %v255_v13, 0.0  ;;  %v189_v21 = vmul.f32 %v1553_v14, %v2029_v5  ;;  %v257_v27 = vadd.f32 %v2040_v10, %v188_v18  ;;  %v1561_v31 = vunpack.c.h.bf16 %v1788_v11  ;;  %v1793_v18 = vld [vmem:[%s2555_s0 + $0xc0] sm:$0xff]  }
  0x21   :  { %v2139_v58 = vpack.c.bf16 %v302_v43, %v301_v42  ;;  %v2175_v25 = vpack.c.bf16 %v306_v1, %v305_v61  ;;  %v320_v26 = vmax.f32 %v256_v17, 0.0  ;;  %v1564_v37 = vunpack.c.l.bf16 %v1789_v24  ;;  %v1792_v1 = vld [vmem:[%s2555_s0 + $0xb8] sm:$0xff]  }
  0x22   :  { %1889 = vmatmul.mubr.bf16.vlgmr.msra.gmra.mrb[0].mxu0 %v352_v60  ;;  %v2144_v60 = vpack.c.bf16 %v304_v47, %v303_v46  ;;  %v258_v29 = vadd.f32 %v2040_v10, %v189_v21  ;;  %v321_v35 = vmax.f32 %v257_v27, 0.0  ;;  %v193_v40 = vmul.f32 %v1561_v31, %v2029_v5  ;;  %v1791_v46 = vld [vmem:[%s2555_s0 + $0xb0] sm:$0xff]   ;;  %v1782_v47 = vld [vmem:[%s2555_s0 + $0x68] sm:$0xff]  }
  0x23   :  { %1892 = vmatprep.mubr.bf16.mxu0 %v353_v0  ;;  %v1787_v0 = vld [vmem:[%s2555_s0 + $0x90] sm:$0xff]   ;;  %v367_v34 = vpack.c.bf16 %v320_v26, %v319_v20  ;;  %v1565_v43 = vunpack.c.h.bf16 %v1789_v24  ;;  %v194_v44 = vmul.f32 %v1564_v37, %v2029_v5  ;;  %v1569_v54 = vunpack.c.h.bf16 %v1790_v33 }
  0x24   :  { %v1556_v15 = vunpack.c.l.bf16 %v1787_v0  ;;  %v1557_v19 = vunpack.c.h.bf16 %v1787_v0  ;;  %v322_v38 = vmax.f32 %v258_v29, 0.0  ;;  %v262_v49 = vadd.f32 %v2040_v10, %v193_v40  ;;  %v1795_v40 = vld [vmem:[%s2555_s0 + $0xd0] sm:$0xff]  }
  0x25   :  { %1920 = vmatprep.mubr.bf16.mxu1 %v367_v34  ;;  %v197_v62 = vmul.f32 %v1569_v54, %v2029_v5  ;;  %v1572_v63 = vunpack.c.l.bf16 %v1791_v46  ;;  %v1573_v0 = vunpack.c.h.bf16 %v1791_v46  ;;  %v309_v4 = vmax.f32 %v2152_v3, 0.0 }
  0x26   :  { %v190_v22 = vmul.f32 %v1556_v15, %v2029_v5  ;;  %v191_v28 = vmul.f32 %v1557_v19, %v2029_v5  ;;  %v368_v48 = vpack.c.bf16 %v322_v38, %v321_v35  ;;  %v326_v61 = vmax.f32 %v262_v49, 0.0 }
  0x27   :  { %v1536_v8 = vunpack.c.l.bf16 %v1782_v47  ;;  %v310_v13 = vmax.f32 %v2157_v7, 0.0  ;;  %v1537_v14 = vunpack.c.h.bf16 %v1782_v47  ;;  %v198_v15 = vmul.f32 %v1572_v63, %v2029_v5 }
  0x28   :  { %v259_v30 = vadd.f32 %v2040_v10, %v190_v22  ;;  %v260_v36 = vadd.f32 %v2040_v10, %v191_v28  ;;  %1921 = vmatmul.mubr.bf16.vlgmr.msra.gmra.mrb[0].mxu1 %v368_v48  ;;  %v199_v17 = vmul.f32 %v1573_v0, %v2029_v5  ;;  %v179_v3 = vmul.f32 %v1533_v12, %v2029_v5 }
  0x29   :  { %v1576_v19 = vunpack.c.l.bf16 %v1792_v1  ;;  %v1577_v20 = vunpack.c.h.bf16 %v1792_v1  ;;  %v267_v24 = vadd.f32 %v2040_v10, %v198_v15  ;;  %v1580_v27 = vunpack.c.l.bf16 %v1793_v18  ;;  %v1796_v15 = vld [vmem:[%s2555_s0 + $0xd8] sm:$0xff]  }
  0x2a   :  { %1893 = vmatmul.mubr.bf16.gmra.mrb[4].mxu0 %v354_v32  ;;  %v192_v32 = vmul.f32 %v1560_v23, %v2029_v5  ;;  %v323_v39 = vmax.f32 %v259_v30, 0.0  ;;  %v324_v42 = vmax.f32 %v260_v36, 0.0  ;;  %v266_v23 = vadd.f32 %v2040_v10, %v197_v62 }
  0x2b   :  { %1896 = vmatprep.mubr.bf16.mxu0 %v355_v45  ;;  %v1568_v45 = vunpack.c.l.bf16 %v1790_v33  ;;  %v1581_v52 = vunpack.c.h.bf16 %v1793_v18  ;;  %v361_v12 = vpack.c.bf16 %v308_v6, %v307_v2  ;;  %v247_v28 = vadd.f32 %v2040_v10, %v2166_v16  ;;  %v1784_v33 = vld [vmem:[%s2555_s0 + $0x78] sm:$0xff]   ;;  %v1794_v16 = vld [vmem:[%s2555_s0 + $0xc8] sm:$0xff]  }
  0x2c   :  { %v261_v41 = vadd.f32 %v2040_v10, %v192_v32  ;;  %v369_v55 = vpack.c.bf16 %v324_v42, %v323_v39  ;;  %v248_v31 = vadd.f32 %v2040_v10, %v179_v3  ;;  %v180_v32 = vmul.f32 %v1536_v8, %v2029_v5 }
  0x2d   :  { %v196_v59 = vmul.f32 %v1568_v45, %v2029_v5  ;;  %v200_v34 = vmul.f32 %v1576_v19, %v2029_v5  ;;  %v201_v50 = vmul.f32 %v1577_v20, %v2029_v5  ;;  %v362_v35 = vpack.c.bf16 %v310_v13, %v309_v4 }
  0x2e   :  { %v325_v51 = vmax.f32 %v261_v41, 0.0  ;;  %1924 = vmatprep.mubr.bf16.mxu1 %v369_v55  ;;  %v181_v53 = vmul.f32 %v1537_v14, %v2029_v5  ;;  %v330_v6 = vmax.f32 %v266_v23, 0.0  ;;  %v331_v36 = vmax.f32 %v267_v24, 0.0 }
  0x2f   :  { %v265_v22 = vadd.f32 %v2040_v10, %v196_v59  ;;  %v202_v38 = vmul.f32 %v1580_v27, %v2029_v5  ;;  %v203_v39 = vmul.f32 %v1581_v52, %v2029_v5  ;;  %v311_v41 = vmax.f32 %v247_v28, 0.0 }
  0x30   :  { %v370_v21 = vpack.c.bf16 %v326_v61, %v325_v51  ;;  %v312_v45 = vmax.f32 %v248_v31, 0.0  ;;  %v269_v46 = vadd.f32 %v2040_v10, %v200_v34  ;;  %v270_v47 = vadd.f32 %v2040_v10, %v201_v50 }
  0x31   :  { %v329_v2 = vmax.f32 %v265_v22, 0.0  ;;  %v1584_v48 = vunpack.c.l.bf16 %v1794_v16  ;;  %v1585_v51 = vunpack.c.h.bf16 %v1794_v16  ;;  %v1588_v54 = vunpack.c.l.bf16 %v1795_v40 }
  0x32   :  { %1897 = vmatmul.mubr.bf16.gmra.mrb[8].mxu0 %v356_v56  ;;  %v195_v56 = vmul.f32 %v1565_v43, %v2029_v5  ;;  %1925 = vmatmul.mubr.bf16.gmra.mrb[4].mxu1 %v370_v21  ;;  %v1589_v55 = vunpack.c.h.bf16 %v1795_v40  ;;  %v272_v59 = vadd.f32 %v2040_v10, %v203_v39  ;;  %v250_v61 = vadd.f32 %v2040_v10, %v181_v53  ;;  %v1797_v21 = vld [vmem:[%s2555_s0 + $0xe0] sm:$0xff]  }
  0x33   :  { %1900 = vmatprep.mubr.bf16.mxu0 %v357_v57  ;;  %v263_v57 = vadd.f32 %v2040_v10, %v194_v44  ;;  %v1544_v44 = vunpack.c.l.bf16 %v1784_v33  ;;  %v372_v49 = vpack.c.bf16 %v330_v6, %v329_v2  ;;  %v1545_v0 = vunpack.c.h.bf16 %v1784_v33 }
  0x34   :  { %v264_v9 = vadd.f32 %v2040_v10, %v195_v56  ;;  %v249_v56 = vadd.f32 %v2040_v10, %v180_v32  ;;  %v363_v1 = vpack.c.bf16 %v312_v45, %v311_v41  ;;  %v333_v4 = vmax.f32 %v269_v46, 0.0  ;;  %v1799_v41 = vld [vmem:[%s2555_s0 + $0xf0] sm:$0xff]  }
  0x35   :  { %v327_v11 = vmax.f32 %v263_v57, 0.0  ;;  %v271_v57 = vadd.f32 %v2040_v10, %v202_v38  ;;  %v334_v8 = vmax.f32 %v270_v47, 0.0  ;;  %v206_v13 = vmul.f32 %v1588_v54, %v2029_v5 }
  0x36   :  { %v328_v7 = vmax.f32 %v264_v9, 0.0  ;;  %v204_v9 = vmul.f32 %v1584_v48, %v2029_v5  ;;  %v207_v14 = vmul.f32 %v1589_v55, %v2029_v5  ;;  %v336_v3 = vmax.f32 %v272_v59, 0.0 }
  0x37   :  { %v335_v18 = vmax.f32 %v271_v57, 0.0  ;;  %v185_v20 = vmul.f32 %v1545_v0, %v2029_v5  ;;  %v374_v23 = vpack.c.bf16 %v334_v8, %v333_v4  ;;  %v275_v27 = vadd.f32 %v2040_v10, %v206_v13 }
  0x38   :  { %v371_v26 = vpack.c.bf16 %v328_v7, %v327_v11  ;;  %v205_v11 = vmul.f32 %v1585_v51, %v2029_v5  ;;  %v314_v7 = vmax.f32 %v250_v61, 0.0  ;;  %v273_v24 = vadd.f32 %v2040_v10, %v204_v9 }
  0x39   :  { %v276_v52 = vadd.f32 %v2040_v10, %v207_v14  ;;  %v375_v28 = vpack.c.bf16 %v336_v3, %v335_v18  ;;  %v254_v33 = vadd.f32 %v2040_v10, %v185_v20  ;;  %v339_v2 = vmax.f32 %v275_v27, 0.0 }
  0x3a   :  { %1901 = vmatmul.mubr.bf16.gmra.mrb[12].mxu0 %v2139_v58  ;;  %v1783_v58 = vld [vmem:[%s2555_s0 + $0x70] sm:$0xff]   ;;  %1928 = vmatprep.mubr.bf16.mxu1 %v371_v26  ;;  %v1592_v26 = vunpack.c.l.bf16 %v1796_v15  ;;  %v337_v50 = vmax.f32 %v273_v24, 0.0  ;;  %v1604_v51 = vunpack.c.l.bf16 %v1799_v41  ;;  %v1605_v54 = vunpack.c.h.bf16 %v1799_v41 }
  0x3b   :  { %1904 = vmatprep.mubr.bf16.mxu0 %v2144_v60  ;;  %v268_v60 = vadd.f32 %v2040_v10, %v199_v17  ;;  %v1540_v29 = vunpack.c.l.bf16 %v1783_v58  ;;  %v1541_v30 = vunpack.c.h.bf16 %v1783_v58  ;;  %1929 = vmatmul.mubr.bf16.gmra.mrb[8].mxu1 %v372_v49  ;;  %v184_v17 = vmul.f32 %v1544_v44, %v2029_v5 }
  0x3c   :  { %v313_v58 = vmax.f32 %v249_v56, 0.0  ;;  %v340_v6 = vmax.f32 %v276_v52, 0.0  ;;  %v318_v40 = vmax.f32 %v254_v33, 0.0  ;;  %v215_v0 = vmul.f32 %v1605_v54, %v2029_v5 }
  0x3d   :  { %v332_v37 = vmax.f32 %v268_v60, 0.0  ;;  %v182_v42 = vmul.f32 %v1540_v29, %v2029_v5  ;;  %v183_v43 = vmul.f32 %v1541_v30, %v2029_v5  ;;  %v274_v60 = vadd.f32 %v2040_v10, %v205_v11 }
  0x3e   :  { %v1596_v29 = vunpack.c.l.bf16 %v1797_v21  ;;  %v1597_v30 = vunpack.c.h.bf16 %v1797_v21  ;;  %v364_v31 = vpack.c.bf16 %v314_v7, %v313_v58  ;;  %v253_v32 = vadd.f32 %v2040_v10, %v184_v17 }
  0x3f   :  { %v251_v62 = vadd.f32 %v2040_v10, %v182_v42  ;;  %v252_v63 = vadd.f32 %v2040_v10, %v183_v43  ;;  %v338_v53 = vmax.f32 %v274_v60, 0.0  ;;  %v377_v45 = vpack.c.bf16 %v340_v6, %v339_v2 }
  0x40   :  { %v211_v38 = vmul.f32 %v1597_v30, %v2029_v5  ;;  %v317_v39 = vmax.f32 %v253_v32, 0.0  ;;  %v284_v17 = vadd.f32 %v2040_v10, %v215_v0 }
  0x41   :  { %v315_v19 = vmax.f32 %v251_v62, 0.0  ;;  %v316_v22 = vmax.f32 %v252_v63, 0.0  ;;  %v376_v44 = vpack.c.bf16 %v338_v53, %v337_v50  ;;  %v214_v63 = vmul.f32 %v1604_v51, %v2029_v5 }
  0x42   :  { %1905 = vmatmul.mubr.bf16.gmra.mrb[16].mxu0 %v2175_v25  ;;  %v373_v25 = vpack.c.bf16 %v332_v37, %v331_v36  ;;  %v1798_v36 = vld [vmem:[%s2555_s0 + $0xe8] sm:$0xff]   ;;  %v210_v37 = vmul.f32 %v1596_v29, %v2029_v5  ;;  %v280_v49 = vadd.f32 %v2040_v10, %v211_v38  ;;  %v366_v55 = vpack.c.bf16 %v318_v40, %v317_v39 }
  0x43   :  { %1908 = vmatprep.mubr.bf16.mxu0 %v361_v12  ;;  %v1593_v12 = vunpack.c.h.bf16 %v1796_v15  ;;  %v365_v34 = vpack.c.bf16 %v316_v22, %v315_v19  ;;  %v1600_v43 = vunpack.c.l.bf16 %v1798_v36  ;;  %v1601_v47 = vunpack.c.h.bf16 %v1798_v36 }
  0x44   :  { %1932 = vmatprep.mubr.bf16.mxu1 %v373_v25  ;;  %v279_v48 = vadd.f32 %v2040_v10, %v210_v37  ;;  %v344_v62 = vmax.f32 %v280_v49, 0.0  ;;  %v283_v15 = vadd.f32 %v2040_v10, %v214_v63  ;;  %v348_v20 = vmax.f32 %v284_v17, 0.0 }
  0x45   :  { %1933 = vmatmul.mubr.bf16.gmra.mrb[12].mxu1 %v374_v23  ;;  %v209_v16 = vmul.f32 %v1593_v12, %v2029_v5  ;;  %v212_v56 = vmul.f32 %v1600_v43, %v2029_v5  ;;  %v213_v59 = vmul.f32 %v1601_v47, %v2029_v5 }
  0x46   :  { %1936 = vmatprep.mubr.bf16.mxu1 %v375_v28  ;;  %v343_v61 = vmax.f32 %v279_v48, 0.0  ;;  %v347_v19 = vmax.f32 %v283_v15, 0.0 }
  0x47   :  { %v278_v46 = vadd.f32 %v2040_v10, %v209_v16  ;;  %v281_v4 = vadd.f32 %v2040_v10, %v212_v56  ;;  %v282_v9 = vadd.f32 %v2040_v10, %v213_v59 }
  0x48   :  { %v379_v14 = vpack.c.bf16 %v344_v62, %v343_v61  ;;  %v381_v24 = vpack.c.bf16 %v348_v20, %v347_v19 }
  0x49   :  { %v342_v57 = vmax.f32 %v278_v46, 0.0  ;;  %v345_v18 = vmax.f32 %v281_v4, 0.0  ;;  %v346_v3 = vmax.f32 %v282_v9, 0.0 }
  0x4a   :  { %1909 = vmatmul.mubr.bf16.gmra.mrb[20].mxu0 %v362_v35  ;;  %v208_v35 = vmul.f32 %v1592_v26, %v2029_v5 }
  0x4b   :  { %1912 = vmatprep.mubr.bf16.mxu0 %v363_v1  ;;  %v1800_v1 = vld [vmem:[%s2555_s0 + $0xf8] sm:$0xff]   ;;  %v380_v21 = vpack.c.bf16 %v346_v3, %v345_v18 }
  0x4c   :  { %v277_v42 = vadd.f32 %v2040_v10, %v208_v35  ;;  %v1608_v11 = vunpack.c.l.bf16 %v1800_v1  ;;  %v1609_v13 = vunpack.c.h.bf16 %v1800_v1 }
  0x4d   :  { %1937 = vmatmul.mubr.bf16.gmra.mrb[16].mxu1 %v376_v44 }
  0x4e   :  { %v341_v25 = vmax.f32 %v277_v42, 0.0  ;;  %1940 = vmatprep.mubr.bf16.mxu1 %v377_v45  ;;  %v216_v58 = vmul.f32 %v1608_v11, %v2029_v5  ;;  %v217_v7 = vmul.f32 %v1609_v13, %v2029_v5  ;;  %v2306_v5 = vld [vmem:[%s2557_s3] ss:$0 sm:$0xff] }
  0x50   :  { %v378_v8 = vpack.c.bf16 %v342_v57, %v341_v25  ;;  %v285_v22 = vadd.f32 %v2040_v10, %v216_v58  ;;  %v286_v23 = vadd.f32 %v2040_v10, %v217_v7 }
  0x52   :  { %1913 = vmatmul.mubr.bf16.gmra.mrb[24].mxu0 %v364_v31  ;;  %v349_v26 = vmax.f32 %v285_v22, 0.0  ;;  %v350_v60 = vmax.f32 %v286_v23, 0.0 }
  0x53   :  { %1916 = vmatprep.mubr.bf16.mxu0 %v365_v34 }
  0x54   :  { %v382_v27 = vpack.c.bf16 %v350_v60, %v349_v26 }
  0x55   :  { %1941 = vmatmul.mubr.bf16.gmra.mrb[20].mxu1 %v378_v8 }
  0x56   :  { %1944 = vmatprep.mubr.bf16.mxu1 %v379_v14 }
  0x5a   :  { %1917 = vmatmul.mubr.bf16.gmra.mrb[28].mxu0 %v366_v55 }
  0x5d   :  { %1945 = vmatmul.mubr.bf16.gmra.mrb[24].mxu1 %v380_v21 }
  0x5e   :  { %1948 = vmatprep.mubr.bf16.mxu1 %v381_v24 }
  0x65   :  { %1949 = vmatmul.mubr.bf16.gmra.mrb[28].mxu1 %v382_v27 }
  0xf5   :  { %v1890_v52 = vpop.f32.mrb[0].mxu0 }
  0xf6   :  { %v488_v12 = vpop.f32.mrb[1].mxu0  ;;  %v497_v29 = vadd.f32 %v1890_v52, %v2306_v5 }
  0xf7   :  { %v1891_v28 = vpop.f32.mrb[2].mxu0  ;;  %v489_v31 = vadd.f32 %v2306_v5, %v488_v12 }
  0xf8   :  { %v500_v30 = vadd.f32 %v1891_v28, %v2306_v5  ;;  %v491_v10 = vpop.f32.mrb[3].mxu0 }
  0xf9   :  { %v492_v32 = vadd.f32 %v2306_v5, %v491_v10 }
  0xfa   :  { %v744_v33 = vpack.c.bf16 %v500_v30, %v497_v29 }
  0xfb   :  { %v743_v34 = vpack.c.bf16 %v492_v32, %v489_v31  ;;  %v1922_v21 = vpop.f32.mrb[0].mxu1 }
  0xfc   :  { %1801 = vst [vmem:[%s2558_s4 + $0x8] sm:$0xff] %v744_v33   ;;  %v1065_v50 = vunpack.c.l.bf16 %v744_v33  ;;  %v1066_v16 = vunpack.c.h.bf16 %v744_v33  ;;  %v616_v23 = vpop.f32.mrb[1].mxu1  ;;  %v625_v10 = vadd.f32 %v1922_v21, %v2306_v5 }
  0xfd   :  { %1614 = vst [vmem:[%s2558_s4] sm:$0xff] %v743_v34   ;;  %v1063_v35 = vunpack.c.l.bf16 %v743_v34  ;;  %v1064_v53 = vunpack.c.h.bf16 %v743_v34  ;;  %v1894_v2 = vpop.f32.mrb[4].mxu0  ;;  %v1923_v12 = vpop.f32.mrb[2].mxu1  ;;  %v617_v31 = vadd.f32 %v2306_v5, %v616_v23 }
  0xfe   :  { %v504_v6 = vpop.f32.mrb[5].mxu0  ;;  %v1199_v40 = vmul.f32 %v1065_v50, %v1065_v50  ;;  %v513_v41 = vadd.f32 %v1894_v2, %v2306_v5  ;;  %v1200_v49 = vmul.f32 %v1066_v16, %v1066_v16  ;;  %v619_v32 = vpop.f32.mrb[3].mxu1 }
  0xff   :  { %v1127_v36 = vadd.f32 %v1064_v53, %v1063_v35  ;;  %v1197_v37 = vmul.f32 %v1063_v35, %v1063_v35  ;;  %v1198_v38 = vmul.f32 %v1064_v53, %v1064_v53  ;;  %v1895_v39 = vpop.f32.mrb[6].mxu0  ;;  %v505_v46 = vadd.f32 %v2306_v5, %v504_v6 }
 0x100   :  { %v516_v42 = vadd.f32 %v1895_v39, %v2306_v5  ;;  %v507_v43 = vpop.f32.mrb[7].mxu0 }
 0x101   :  { %v1128_v44 = vadd.f32 %v1127_v36, %v1065_v50  ;;  %v1261_v45 = vadd.f32 %v1198_v38, %v1197_v37  ;;  %v508_v47 = vadd.f32 %v2306_v5, %v507_v43  ;;  %v628_v36 = vadd.f32 %v1923_v12, %v2306_v5 }
 0x102   :  { %v746_v48 = vpack.c.bf16 %v516_v42, %v513_v41  ;;  %v620_v37 = vadd.f32 %v2306_v5, %v619_v32 }
 0x103   :  { %v1262_v51 = vadd.f32 %v1261_v45, %v1199_v40  ;;  %v745_v54 = vpack.c.bf16 %v508_v47, %v505_v46  ;;  %v1129_v55 = vadd.f32 %v1128_v44, %v1066_v16  ;;  %v2346_v43 = vpack.c.bf16 %v628_v36, %v625_v10 }
 0x104   :  { %1803 = vst [vmem:[%s2558_s4 + $0x18] sm:$0xff] %v746_v48   ;;  %v1069_v62 = vunpack.c.l.bf16 %v746_v48  ;;  %v1070_v4 = vunpack.c.h.bf16 %v746_v48  ;;  %v2348_v44 = vpack.c.bf16 %v620_v37, %v617_v31 }
 0x105   :  { %1802 = vst [vmem:[%s2558_s4 + $0x10] sm:$0xff] %v745_v54   ;;  %v1067_v56 = vunpack.c.l.bf16 %v745_v54  ;;  %v1068_v25 = vunpack.c.h.bf16 %v745_v54  ;;  %v1263_v57 = vadd.f32 %v1262_v51, %v1200_v49  ;;  %v1898_v59 = vpop.f32.mrb[8].mxu0  ;;  %v1926_v49 = vpop.f32.mrb[4].mxu1  ;;  %1817 = vst [vmem:[%s2558_s4 + $0x88] sm:$0xff] %v2346_v43  }
 0x106   :  { %v520_v61 = vpop.f32.mrb[9].mxu0  ;;  %v529_v9 = vadd.f32 %v1898_v59, %v2306_v5  ;;  %v1203_v58 = vmul.f32 %v1069_v62, %v1069_v62  ;;  %v1204_v22 = vmul.f32 %v1070_v4, %v1070_v4  ;;  %1816 = vst [vmem:[%s2558_s4 + $0x80] sm:$0xff] %v2348_v44   ;;  %v632_v54 = vpop.f32.mrb[5].mxu1 }
 0x107   :  { %v1130_v63 = vadd.f32 %v1129_v55, %v1067_v56  ;;  %v1201_v0 = vmul.f32 %v1067_v56, %v1067_v56  ;;  %v1899_v1 = vpop.f32.mrb[10].mxu0  ;;  %v1202_v8 = vmul.f32 %v1068_v25, %v1068_v25  ;;  %v521_v17 = vadd.f32 %v2306_v5, %v520_v61  ;;  %v1927_v61 = vpop.f32.mrb[6].mxu1 }
 0x108   :  { %v532_v11 = vadd.f32 %v1899_v1, %v2306_v5  ;;  %v523_v13 = vpop.f32.mrb[11].mxu0 }
 0x109   :  { %v1131_v14 = vadd.f32 %v1130_v63, %v1068_v25  ;;  %v1264_v15 = vadd.f32 %v1263_v57, %v1201_v0  ;;  %v524_v18 = vadd.f32 %v2306_v5, %v523_v13  ;;  %v635_v63 = vpop.f32.mrb[7].mxu1 }
 0x10a   :  { %v748_v3 = vpack.c.bf16 %v532_v11, %v529_v9  ;;  %v636_v12 = vadd.f32 %v2306_v5, %v635_v63 }
 0x10b   :  { %v1132_v7 = vadd.f32 %v1131_v14, %v1069_v62  ;;  %v1265_v19 = vadd.f32 %v1264_v15, %v1202_v8  ;;  %v747_v20 = vpack.c.bf16 %v524_v18, %v521_v17 }
 0x10c   :  { %1805 = vst [vmem:[%s2558_s4 + $0x28] sm:$0xff] %v748_v3   ;;  %v1073_v28 = vunpack.c.l.bf16 %v748_v3  ;;  %v1074_v29 = vunpack.c.h.bf16 %v748_v3 }
 0x10d   :  { %v1266_v24 = vadd.f32 %v1265_v19, %v1203_v58  ;;  %1804 = vst [vmem:[%s2558_s4 + $0x20] sm:$0xff] %v747_v20   ;;  %v1071_v26 = vunpack.c.l.bf16 %v747_v20  ;;  %v1072_v60 = vunpack.c.h.bf16 %v747_v20  ;;  %v1133_v27 = vadd.f32 %v1132_v7, %v1070_v4  ;;  %v1902_v52 = vpop.f32.mrb[12].mxu0 }
 0x10e   :  { %v536_v30 = vpop.f32.mrb[13].mxu0  ;;  %v545_v35 = vadd.f32 %v1902_v52, %v2306_v5  ;;  %v1207_v45 = vmul.f32 %v1073_v28, %v1073_v28  ;;  %v1208_v51 = vmul.f32 %v1074_v29, %v1074_v29  ;;  %v641_v20 = vadd.f32 %v1926_v49, %v2306_v5 }
 0x10f   :  { %v1134_v33 = vadd.f32 %v1133_v27, %v1071_v26  ;;  %v1205_v34 = vmul.f32 %v1071_v26, %v1071_v26  ;;  %v1267_v50 = vadd.f32 %v1266_v24, %v1204_v22  ;;  %v1903_v53 = vpop.f32.mrb[14].mxu0  ;;  %v1206_v2 = vmul.f32 %v1072_v60, %v1072_v60  ;;  %v1930_v26 = vpop.f32.mrb[8].mxu1 }
 0x110   :  { %v548_v6 = vadd.f32 %v1903_v53, %v2306_v5  ;;  %v539_v16 = vpop.f32.mrb[15].mxu0  ;;  %v537_v40 = vadd.f32 %v2306_v5, %v536_v30  ;;  %v633_v27 = vadd.f32 %v2306_v5, %v632_v54  ;;  %v644_v52 = vadd.f32 %v1927_v61, %v2306_v5 }
 0x111   :  { %v1135_v38 = vadd.f32 %v1134_v33, %v1072_v60  ;;  %v1268_v39 = vadd.f32 %v1267_v50, %v1205_v34  ;;  %v540_v41 = vadd.f32 %v2306_v5, %v539_v16 }
 0x112   :  { %v750_v42 = vpack.c.bf16 %v548_v6, %v545_v35  ;;  %v2378_v35 = vpack.c.bf16 %v644_v52, %v641_v20 }
 0x113   :  { %v1136_v46 = vadd.f32 %v1135_v38, %v1073_v28  ;;  %v1269_v47 = vadd.f32 %v1268_v39, %v1206_v2  ;;  %v749_v48 = vpack.c.bf16 %v540_v41, %v537_v40  ;;  %v648_v28 = vpop.f32.mrb[9].mxu1 }
 0x114   :  { %1807 = vst [vmem:[%s2558_s4 + $0x38] sm:$0xff] %v750_v42   ;;  %v1077_v0 = vunpack.c.l.bf16 %v750_v42  ;;  %v1078_v11 = vunpack.c.h.bf16 %v750_v42  ;;  %v1931_v33 = vpop.f32.mrb[10].mxu1  ;;  %1819 = vst [vmem:[%s2558_s4 + $0x98] sm:$0xff] %v2378_v35  }
 0x115   :  { %v1270_v55 = vadd.f32 %v1269_v47, %v1207_v45  ;;  %1806 = vst [vmem:[%s2558_s4 + $0x30] sm:$0xff] %v749_v48   ;;  %v1075_v56 = vunpack.c.l.bf16 %v749_v48  ;;  %v1076_v25 = vunpack.c.h.bf16 %v749_v48  ;;  %v1137_v57 = vadd.f32 %v1136_v46, %v1074_v29  ;;  %v1906_v59 = vpop.f32.mrb[16].mxu0  ;;  %v651_v53 = vpop.f32.mrb[11].mxu1 }
 0x116   :  { %v552_v62 = vpop.f32.mrb[17].mxu0  ;;  %v561_v14 = vadd.f32 %v1906_v59, %v2306_v5  ;;  %v1211_v21 = vmul.f32 %v1077_v0, %v1077_v0  ;;  %v1212_v60 = vmul.f32 %v1078_v11, %v1078_v11  ;;  %v2388_v48 = vpack.c.bf16 %v636_v12, %v633_v27 }
 0x117   :  { %v1138_v1 = vadd.f32 %v1137_v57, %v1075_v56  ;;  %v1209_v4 = vmul.f32 %v1075_v56, %v1075_v56  ;;  %v1271_v8 = vadd.f32 %v1270_v55, %v1208_v51  ;;  %v1907_v9 = vpop.f32.mrb[18].mxu0  ;;  %v1210_v13 = vmul.f32 %v1076_v25, %v1076_v25 }
 0x118   :  { %v564_v15 = vadd.f32 %v1907_v9, %v2306_v5  ;;  %v555_v17 = vpop.f32.mrb[19].mxu0  ;;  %v553_v58 = vadd.f32 %v2306_v5, %v552_v62  ;;  %1818 = vst [vmem:[%s2558_s4 + $0x90] sm:$0xff] %v2388_v48   ;;  %v652_v27 = vadd.f32 %v2306_v5, %v651_v53 }
 0x119   :  { %v1139_v18 = vadd.f32 %v1138_v1, %v1076_v25  ;;  %v1272_v3 = vadd.f32 %v1271_v8, %v1209_v4  ;;  %v556_v7 = vadd.f32 %v2306_v5, %v555_v17  ;;  %v1934_v25 = vpop.f32.mrb[12].mxu1 }
 0x11a   :  { %v752_v19 = vpack.c.bf16 %v564_v15, %v561_v14  ;;  %v664_v59 = vpop.f32.mrb[13].mxu1  ;;  %v649_v14 = vadd.f32 %v2306_v5, %v648_v28 }
 0x11b   :  { %v1140_v22 = vadd.f32 %v1139_v18, %v1077_v0  ;;  %v1273_v23 = vadd.f32 %v1272_v3, %v1210_v13  ;;  %v751_v24 = vpack.c.bf16 %v556_v7, %v553_v58  ;;  %v1935_v4 = vpop.f32.mrb[14].mxu1  ;;  %v657_v13 = vadd.f32 %v1930_v26, %v2306_v5 }
 0x11c   :  { %1809 = vst [vmem:[%s2558_s4 + $0x48] sm:$0xff] %v752_v19   ;;  %v1081_v34 = vunpack.c.l.bf16 %v752_v19  ;;  %v1082_v2 = vunpack.c.h.bf16 %v752_v19  ;;  %v667_v15 = vpop.f32.mrb[15].mxu1 }
 0x11d   :  { %v1274_v29 = vadd.f32 %v1273_v23, %v1211_v21  ;;  %1808 = vst [vmem:[%s2558_s4 + $0x40] sm:$0xff] %v751_v24   ;;  %v1079_v30 = vunpack.c.l.bf16 %v751_v24  ;;  %v1080_v10 = vunpack.c.h.bf16 %v751_v24  ;;  %v1141_v31 = vadd.f32 %v1140_v22, %v1078_v11  ;;  %v1910_v32 = vpop.f32.mrb[20].mxu0 }
 0x11e   :  { %v568_v50 = vpop.f32.mrb[21].mxu0  ;;  %v577_v39 = vadd.f32 %v1910_v32, %v2306_v5  ;;  %v1215_v51 = vmul.f32 %v1081_v34, %v1081_v34  ;;  %v1216_v57 = vmul.f32 %v1082_v2, %v1082_v2  ;;  %v660_v23 = vadd.f32 %v1931_v33, %v2306_v5 }
 0x11f   :  { %v1142_v6 = vadd.f32 %v1141_v31, %v1079_v30  ;;  %v1213_v16 = vmul.f32 %v1079_v30, %v1079_v30  ;;  %v1275_v36 = vadd.f32 %v1274_v29, %v1212_v60  ;;  %v1911_v37 = vpop.f32.mrb[22].mxu0  ;;  %v1214_v38 = vmul.f32 %v1080_v10, %v1080_v10 }
 0x120   :  { %v569_v40 = vadd.f32 %v2306_v5, %v568_v50  ;;  %v580_v41 = vadd.f32 %v1911_v37, %v2306_v5  ;;  %v571_v42 = vpop.f32.mrb[23].mxu0  ;;  %v2408_v28 = vpack.c.bf16 %v660_v23, %v657_v13  ;;  %v2410_v31 = vpack.c.bf16 %v652_v27, %v649_v14  ;;  %v1938_v32 = vpop.f32.mrb[16].mxu1 }
 0x121   :  { %v1143_v45 = vadd.f32 %v1142_v6, %v1080_v10  ;;  %v1276_v46 = vadd.f32 %v1275_v36, %v1213_v16  ;;  %v572_v47 = vadd.f32 %v2306_v5, %v571_v42  ;;  %v680_v33 = vpop.f32.mrb[17].mxu1 }
 0x122   :  { %v754_v49 = vpack.c.bf16 %v580_v41, %v577_v39  ;;  %1821 = vst [vmem:[%s2558_s4 + $0xa8] sm:$0xff] %v2408_v28   ;;  %1820 = vst [vmem:[%s2558_s4 + $0xa0] sm:$0xff] %v2410_v31   ;;  %v1939_v36 = vpop.f32.mrb[18].mxu1  ;;  %v665_v39 = vadd.f32 %v2306_v5, %v664_v59 }
 0x123   :  { %v1144_v54 = vadd.f32 %v1143_v45, %v1081_v34  ;;  %v1277_v55 = vadd.f32 %v1276_v46, %v1214_v38  ;;  %v753_v56 = vpack.c.bf16 %v572_v47, %v569_v40  ;;  %v673_v38 = vadd.f32 %v1934_v25, %v2306_v5  ;;  %v683_v40 = vpop.f32.mrb[19].mxu1 }
 0x124   :  { %1811 = vst [vmem:[%s2558_s4 + $0x58] sm:$0xff] %v754_v49   ;;  %v1085_v8 = vunpack.c.l.bf16 %v754_v49  ;;  %v1086_v9 = vunpack.c.h.bf16 %v754_v49 }
 0x125   :  { %v1278_v61 = vadd.f32 %v1277_v55, %v1215_v51  ;;  %1810 = vst [vmem:[%s2558_s4 + $0x50] sm:$0xff] %v753_v56   ;;  %v1083_v62 = vunpack.c.l.bf16 %v753_v56  ;;  %v1084_v63 = vunpack.c.h.bf16 %v753_v56  ;;  %v1145_v0 = vadd.f32 %v1144_v54, %v1082_v2  ;;  %v1914_v1 = vpop.f32.mrb[24].mxu0 }
 0x126   :  { %v584_v11 = vpop.f32.mrb[25].mxu0  ;;  %v593_v58 = vadd.f32 %v1914_v1, %v2306_v5  ;;  %v1219_v52 = vmul.f32 %v1085_v8, %v1085_v8  ;;  %v1220_v34 = vmul.f32 %v1086_v9, %v1086_v9 }
 0x127   :  { %v1146_v17 = vadd.f32 %v1145_v0, %v1083_v62  ;;  %v1217_v18 = vmul.f32 %v1083_v62, %v1083_v62  ;;  %v1279_v3 = vadd.f32 %v1278_v61, %v1216_v57  ;;  %v1915_v7 = vpop.f32.mrb[26].mxu0  ;;  %v1218_v19 = vmul.f32 %v1084_v63, %v1084_v63 }
 0x128   :  { %v585_v20 = vadd.f32 %v2306_v5, %v584_v11  ;;  %v596_v21 = vadd.f32 %v1915_v7, %v2306_v5  ;;  %v587_v22 = vpop.f32.mrb[27].mxu0  ;;  %v668_v0 = vadd.f32 %v2306_v5, %v667_v15  ;;  %v1942_v13 = vpop.f32.mrb[20].mxu1 }
 0x129   :  { %v1147_v24 = vadd.f32 %v1146_v17, %v1084_v63  ;;  %v1280_v60 = vadd.f32 %v1279_v3, %v1217_v18  ;;  %v588_v26 = vadd.f32 %v2306_v5, %v587_v22  ;;  %v676_v63 = vadd.f32 %v1935_v4, %v2306_v5  ;;  %v696_v3 = vpop.f32.mrb[21].mxu1 }
 0x12a   :  { %v756_v12 = vpack.c.bf16 %v596_v21, %v593_v58  ;;  %v2439_v18 = vpack.c.bf16 %v668_v0, %v665_v39  ;;  %v1099_v0 = vunpack.c.l.bf16 %v2388_v48 }
 0x12b   :  { %v1148_v29 = vadd.f32 %v1147_v24, %v1085_v8  ;;  %v1281_v30 = vadd.f32 %v1280_v60, %v1218_v19  ;;  %v755_v10 = vpack.c.bf16 %v588_v26, %v585_v20  ;;  %v2437_v17 = vpack.c.bf16 %v676_v63, %v673_v38  ;;  %v1943_v19 = vpop.f32.mrb[22].mxu1 }
 0x12c   :  { %1813 = vst [vmem:[%s2558_s4 + $0x68] sm:$0xff] %v756_v12   ;;  %v1089_v41 = vunpack.c.l.bf16 %v756_v12  ;;  %v1090_v49 = vunpack.c.h.bf16 %v756_v12  ;;  %1822 = vst [vmem:[%s2558_s4 + $0xb0] sm:$0xff] %v2439_v18   ;;  %v699_v21 = vpop.f32.mrb[23].mxu1  ;;  %v689_v12 = vadd.f32 %v1938_v32, %v2306_v5  ;;  %v708_v32 = vadd.f32 %v1943_v19, %v2306_v5 }
 0x12d   :  { %v1282_v50 = vadd.f32 %v1281_v30, %v1219_v52  ;;  %1812 = vst [vmem:[%s2558_s4 + $0x60] sm:$0xff] %v755_v10   ;;  %v1087_v53 = vunpack.c.l.bf16 %v755_v10  ;;  %v1088_v2 = vunpack.c.h.bf16 %v755_v10  ;;  %v1149_v6 = vadd.f32 %v1148_v29, %v1086_v9  ;;  %v1918_v16 = vpop.f32.mrb[28].mxu0  ;;  %1823 = vst [vmem:[%s2558_s4 + $0xb8] sm:$0xff] %v2437_v17  }
 0x12e   :  { %v600_v37 = vpop.f32.mrb[29].mxu0  ;;  %v609_v54 = vadd.f32 %v1918_v16, %v2306_v5  ;;  %v1223_v1 = vmul.f32 %v1089_v41, %v1089_v41  ;;  %v1224_v14 = vmul.f32 %v1090_v49, %v1090_v49  ;;  %v681_v29 = vadd.f32 %v2306_v5, %v680_v33 }
 0x12f   :  { %v1150_v42 = vadd.f32 %v1149_v6, %v1087_v53  ;;  %v1221_v45 = vmul.f32 %v1087_v53, %v1087_v53  ;;  %v1283_v46 = vadd.f32 %v1282_v50, %v1220_v34  ;;  %v1919_v47 = vpop.f32.mrb[30].mxu0  ;;  %v1222_v51 = vmul.f32 %v1088_v2, %v1088_v2 }
 0x130   :  { %v612_v55 = vadd.f32 %v1919_v47, %v2306_v5  ;;  %v603_v56 = vpop.f32.mrb[31].mxu0  ;;  %v601_v62 = vadd.f32 %v2306_v5, %v600_v37  ;;  %v1095_v10 = vunpack.c.l.bf16 %v2348_v44  ;;  %v692_v34 = vadd.f32 %v1939_v36, %v2306_v5  ;;  %v1946_v37 = vpop.f32.mrb[24].mxu1 }
 0x131   :  { %v1151_v57 = vadd.f32 %v1150_v42, %v1088_v2  ;;  %v1284_v61 = vadd.f32 %v1283_v46, %v1221_v45  ;;  %v604_v25 = vadd.f32 %v2306_v5, %v603_v56  ;;  %v684_v50 = vadd.f32 %v2306_v5, %v683_v40 }
 0x132   :  { %v758_v59 = vpack.c.bf16 %v612_v55, %v609_v54  ;;  %v705_v6 = vadd.f32 %v1942_v13, %v2306_v5  ;;  %v697_v16 = vadd.f32 %v2306_v5, %v696_v3  ;;  %v2459_v38 = vpack.c.bf16 %v692_v34, %v689_v12 }
 0x133   :  { %v1152_v8 = vadd.f32 %v1151_v57, %v1089_v41  ;;  %v1285_v9 = vadd.f32 %v1284_v61, %v1222_v51  ;;  %v757_v11 = vpack.c.bf16 %v604_v25, %v601_v62  ;;  %v2461_v39 = vpack.c.bf16 %v684_v50, %v681_v29  ;;  %v712_v41 = vpop.f32.mrb[25].mxu1 }
 0x134   :  { %1815 = vst [vmem:[%s2558_s4 + $0x78] sm:$0xff] %v758_v59   ;;  %v1093_v20 = vunpack.c.l.bf16 %v758_v59  ;;  %v1094_v60 = vunpack.c.h.bf16 %v758_v59  ;;  %v700_v33 = vadd.f32 %v2306_v5, %v699_v21  ;;  %v1096_v40 = vunpack.c.h.bf16 %v2348_v44  ;;  %v1947_v46 = vpop.f32.mrb[26].mxu1  ;;  %1825 = vst [vmem:[%s2558_s4 + $0xc8] sm:$0xff] %v2459_v38  }
 0x135   :  { %v1286_v58 = vadd.f32 %v1285_v9, %v1223_v1  ;;  %1814 = vst [vmem:[%s2558_s4 + $0x70] sm:$0xff] %v757_v11   ;;  %v1091_v4 = vunpack.c.l.bf16 %v757_v11  ;;  %v1092_v15 = vunpack.c.h.bf16 %v757_v11  ;;  %v1153_v7 = vadd.f32 %v1152_v8, %v1090_v49  ;;  %1824 = vst [vmem:[%s2558_s4 + $0xc0] sm:$0xff] %v2461_v39   ;;  %v715_v51 = vpop.f32.mrb[27].mxu1 }
 0x136   :  { %v1227_v30 = vmul.f32 %v1093_v20, %v1093_v20  ;;  %v1228_v42 = vmul.f32 %v1094_v60, %v1094_v60  ;;  %v1097_v47 = vunpack.c.l.bf16 %v2346_v43  ;;  %v1229_v49 = vmul.f32 %v1095_v10, %v1095_v10 }
 0x137   :  { %v1154_v22 = vadd.f32 %v1153_v7, %v1091_v4  ;;  %v1225_v23 = vmul.f32 %v1091_v4, %v1091_v4  ;;  %v1287_v24 = vadd.f32 %v1286_v58, %v1224_v14  ;;  %v1226_v26 = vmul.f32 %v1092_v15, %v1092_v15 }
 0x138   :  { %v2475_v56 = vpack.c.bf16 %v708_v32, %v705_v6  ;;  %v2477_v44 = vpack.c.bf16 %v700_v33, %v697_v16  ;;  %v1098_v57 = vunpack.c.h.bf16 %v2346_v43  ;;  %v721_v61 = vadd.f32 %v1946_v37, %v2306_v5  ;;  %v1950_v13 = vpop.f32.mrb[28].mxu1 }
 0x139   :  { %v1155_v27 = vadd.f32 %v1154_v22, %v1092_v15  ;;  %v1288_v52 = vadd.f32 %v1287_v24, %v1225_v23  ;;  %v713_v62 = vadd.f32 %v2306_v5, %v712_v41  ;;  %v1230_v59 = vmul.f32 %v1096_v40, %v1096_v40  ;;  %v728_v15 = vpop.f32.mrb[29].mxu1 }
 0x13a   :  { %1827 = vst [vmem:[%s2558_s4 + $0xd8] sm:$0xff] %v2475_v56   ;;  %1826 = vst [vmem:[%s2558_s4 + $0xd0] sm:$0xff] %v2477_v44   ;;  %v724_v43 = vadd.f32 %v1947_v46, %v2306_v5  ;;  %v716_v1 = vadd.f32 %v2306_v5, %v715_v51  ;;  %v1231_v8 = vmul.f32 %v1097_v47, %v1097_v47  ;;  %v1100_v3 = vunpack.c.h.bf16 %v2388_v48  ;;  %v1951_v22 = vpop.f32.mrb[30].mxu1 }
 0x13b   :  { %v1156_v53 = vadd.f32 %v1155_v27, %v1093_v20  ;;  %v1289_v2 = vadd.f32 %v1288_v52, %v1226_v26  ;;  %v1232_v14 = vmul.f32 %v1098_v57, %v1098_v57  ;;  %v737_v20 = vadd.f32 %v1950_v13, %v2306_v5  ;;  %v731_v48 = vpop.f32.mrb[31].mxu1 }
 0x13c   :  { %v2494_v58 = vpack.c.bf16 %v724_v43, %v721_v61  ;;  %v2496_v4 = vpack.c.bf16 %v716_v1, %v713_v62  ;;  %v729_v21 = vadd.f32 %v2306_v5, %v728_v15  ;;  %v1101_v23 = vunpack.c.l.bf16 %v2378_v35 }
 0x13d   :  { %v1290_v36 = vadd.f32 %v1289_v2, %v1227_v30  ;;  %v1157_v45 = vadd.f32 %v1156_v53, %v1094_v60  ;;  %v1233_v24 = vmul.f32 %v1099_v0, %v1099_v0  ;;  %v740_v27 = vadd.f32 %v1951_v22, %v2306_v5 }
 0x13e   :  { %1829 = vst [vmem:[%s2558_s4 + $0xe8] sm:$0xff] %v2494_v58   ;;  %1828 = vst [vmem:[%s2558_s4 + $0xe0] sm:$0xff] %v2496_v4   ;;  %v732_v52 = vadd.f32 %v2306_v5, %v731_v48  ;;  %v1102_v12 = vunpack.c.h.bf16 %v2378_v35  ;;  %v1234_v29 = vmul.f32 %v1100_v3, %v1100_v3  ;;  %v1235_v53 = vmul.f32 %v1101_v23, %v1101_v23 }
 0x13f   :  { %v1158_v54 = vadd.f32 %v1157_v45, %v1095_v10  ;;  %v1291_v55 = vadd.f32 %v1290_v36, %v1228_v42  ;;  %v2512_v34 = vpack.c.bf16 %v740_v27, %v737_v20  ;;  %v1103_v16 = vunpack.c.l.bf16 %v2410_v31 }
 0x140   :  { %v2514_v50 = vpack.c.bf16 %v732_v52, %v729_v21  ;;  %v1236_v5 = vmul.f32 %v1102_v12, %v1102_v12  ;;  %v1104_v37 = vunpack.c.h.bf16 %v2410_v31  ;;  %v1105_v33 = vunpack.c.l.bf16 %v2408_v28 }
 0x141   :  { %v1159_v25 = vadd.f32 %v1158_v54, %v1096_v40  ;;  %v1292_v63 = vadd.f32 %v1291_v55, %v1229_v49  ;;  %1831 = vst [vmem:[%s2558_s4 + $0xf8] sm:$0xff] %v2512_v34   ;;  %v1237_v42 = vmul.f32 %v1103_v16, %v1103_v16  ;;  %v1106_v40 = vunpack.c.h.bf16 %v2408_v28 }
 0x142   :  { %1830 = vst [vmem:[%s2558_s4 + $0xf0] sm:$0xff] %v2514_v50   ;;  %v1238_v46 = vmul.f32 %v1104_v37, %v1104_v37  ;;  %v1239_v49 = vmul.f32 %v1105_v33, %v1105_v33  ;;  %v1107_v55 = vunpack.c.l.bf16 %v2439_v18  ;;  %v1108_v31 = vunpack.c.h.bf16 %v2439_v18 }
 0x143   :  { %v1160_v9 = vadd.f32 %v1159_v25, %v1097_v47  ;;  %v1293_v11 = vadd.f32 %v1292_v63, %v1230_v59  ;;  %v1109_v25 = vunpack.c.l.bf16 %v2437_v17  ;;  %v1110_v28 = vunpack.c.h.bf16 %v2437_v17 }
 0x144   :  { %v1241_v63 = vmul.f32 %v1107_v55, %v1107_v55  ;;  %v1242_v1 = vmul.f32 %v1108_v31, %v1108_v31  ;;  %v1112_v18 = vunpack.c.h.bf16 %v2461_v39  ;;  %v1114_v17 = vunpack.c.h.bf16 %v2459_v38 }
 0x145   :  { %v1294_v7 = vadd.f32 %v1293_v11, %v1231_v8  ;;  %v1161_v19 = vadd.f32 %v1160_v9, %v1098_v57  ;;  %v1240_v57 = vmul.f32 %v1106_v40, %v1106_v40  ;;  %v1243_v9 = vmul.f32 %v1109_v25, %v1109_v25 }
 0x146   :  { %v1115_v52 = vunpack.c.l.bf16 %v2477_v44 }
 0x147   :  { %v1162_v60 = vadd.f32 %v1161_v19, %v1099_v0  ;;  %v1295_v26 = vadd.f32 %v1294_v7, %v1232_v14  ;;  %v1111_v14 = vunpack.c.l.bf16 %v2461_v39  ;;  %v1113_v19 = vunpack.c.l.bf16 %v2459_v38 }
 0x148   :  { %v1116_v39 = vunpack.c.h.bf16 %v2477_v44  ;;  %v1118_v38 = vunpack.c.h.bf16 %v2475_v56  ;;  %v1120_v44 = vunpack.c.h.bf16 %v2496_v4 }
 0x149   :  { %v1163_v30 = vadd.f32 %v1162_v60, %v1100_v3  ;;  %v1296_v10 = vadd.f32 %v1295_v26, %v1233_v24  ;;  %v1244_v3 = vmul.f32 %v1110_v28, %v1110_v28  ;;  %v1245_v21 = vmul.f32 %v1111_v14, %v1111_v14 }
 0x14a   :  { %v1246_v24 = vmul.f32 %v1112_v18, %v1112_v18  ;;  %v1247_v60 = vmul.f32 %v1113_v19, %v1113_v19 }
 0x14b   :  { %v1164_v2 = vadd.f32 %v1163_v30, %v1101_v23  ;;  %v1297_v6 = vadd.f32 %v1296_v10, %v1234_v29  ;;  %v1117_v10 = vunpack.c.l.bf16 %v2475_v56  ;;  %v1122_v56 = vunpack.c.h.bf16 %v2494_v58 }
 0x14d   :  { %v1298_v35 = vadd.f32 %v1297_v6, %v1235_v53  ;;  %v1165_v32 = vadd.f32 %v1164_v2, %v1102_v12  ;;  %v1248_v12 = vmul.f32 %v1114_v17, %v1114_v17  ;;  %v1249_v2 = vmul.f32 %v1115_v52, %v1115_v52 }
 0x14f   :  { %v1166_v41 = vadd.f32 %v1165_v32, %v1103_v16  ;;  %v1299_v36 = vadd.f32 %v1298_v35, %v1236_v5  ;;  %v1250_v5 = vmul.f32 %v1116_v39, %v1116_v39 }
 0x151   :  { %v1167_v45 = vadd.f32 %v1166_v41, %v1104_v37  ;;  %v1300_v47 = vadd.f32 %v1299_v36, %v1237_v42  ;;  %v1251_v37 = vmul.f32 %v1117_v10, %v1117_v10  ;;  %v1119_v41 = vunpack.c.l.bf16 %v2496_v4 }
 0x152   :  { %v1252_v42 = vmul.f32 %v1118_v38, %v1118_v38  ;;  %v1124_v4 = vunpack.c.h.bf16 %v2514_v50 }
 0x153   :  { %v1168_v51 = vadd.f32 %v1167_v45, %v1105_v33  ;;  %v1301_v54 = vadd.f32 %v1300_v47, %v1238_v46  ;;  %v1121_v45 = vunpack.c.l.bf16 %v2494_v58  ;;  %v1253_v47 = vmul.f32 %v1119_v41, %v1119_v41 }
 0x154   :  { %v1126_v58 = vunpack.c.h.bf16 %v2512_v34 }
 0x155   :  { %v1302_v61 = vadd.f32 %v1301_v54, %v1239_v49  ;;  %v1169_v62 = vadd.f32 %v1168_v51, %v1106_v40  ;;  %v1254_v54 = vmul.f32 %v1120_v44, %v1120_v44 }
 0x157   :  { %v1170_v59 = vadd.f32 %v1169_v62, %v1107_v55  ;;  %v1303_v0 = vadd.f32 %v1302_v61, %v1240_v57  ;;  %v1255_v57 = vmul.f32 %v1121_v45, %v1121_v45  ;;  %v1123_v62 = vunpack.c.l.bf16 %v2514_v50 }
 0x159   :  { %v1171_v43 = vadd.f32 %v1170_v59, %v1108_v31  ;;  %v1304_v8 = vadd.f32 %v1303_v0, %v1241_v63  ;;  %v1125_v0 = vunpack.c.l.bf16 %v2512_v34 }
 0x15b   :  { %v1172_v11 = vadd.f32 %v1171_v43, %v1109_v25  ;;  %v1305_v13 = vadd.f32 %v1304_v8, %v1242_v1  ;;  %v1256_v25 = vmul.f32 %v1122_v56, %v1122_v56  ;;  %v1257_v43 = vmul.f32 %v1123_v62, %v1123_v62 }
 0x15d   :  { %v1306_v15 = vadd.f32 %v1305_v13, %v1243_v9  ;;  %v1173_v7 = vadd.f32 %v1172_v11, %v1110_v28  ;;  %v1258_v9 = vmul.f32 %v1124_v4, %v1124_v4  ;;  %v1259_v13 = vmul.f32 %v1125_v0, %v1125_v0 }
 0x15f   :  { %v1174_v20 = vadd.f32 %v1173_v7, %v1111_v14  ;;  %v1307_v22 = vadd.f32 %v1306_v15, %v1244_v3  ;;  %v1260_v15 = vmul.f32 %v1126_v58, %v1126_v58 }
 0x161   :  { %v1175_v23 = vadd.f32 %v1174_v20, %v1112_v18  ;;  %v1308_v48 = vadd.f32 %v1307_v22, %v1245_v21 }
 0x163   :  { %v1176_v26 = vadd.f32 %v1175_v23, %v1113_v19  ;;  %v1309_v27 = vadd.f32 %v1308_v48, %v1246_v24 }
 0x165   :  { %v1310_v29 = vadd.f32 %v1309_v27, %v1247_v60  ;;  %v1177_v30 = vadd.f32 %v1176_v26, %v1114_v17 }
 0x167   :  { %v1178_v53 = vadd.f32 %v1177_v30, %v1115_v52  ;;  %v1311_v6 = vadd.f32 %v1310_v29, %v1248_v12 }
 0x169   :  { %v1179_v16 = vadd.f32 %v1178_v53, %v1116_v39  ;;  %v1312_v35 = vadd.f32 %v1311_v6, %v1249_v2 }
 0x16b   :  { %v1180_v32 = vadd.f32 %v1179_v16, %v1117_v10  ;;  %v1313_v33 = vadd.f32 %v1312_v35, %v1250_v5 }
 0x16d   :  { %v1314_v36 = vadd.f32 %v1313_v33, %v1251_v37  ;;  %v1181_v40 = vadd.f32 %v1180_v32, %v1118_v38 }
 0x16f   :  { %v1182_v46 = vadd.f32 %v1181_v40, %v1119_v41  ;;  %v1315_v49 = vadd.f32 %v1314_v36, %v1252_v42 }
 0x171   :  { %v1183_v51 = vadd.f32 %v1182_v46, %v1120_v44  ;;  %v1316_v55 = vadd.f32 %v1315_v49, %v1253_v47 }
 0x173   :  { %v1184_v61 = vadd.f32 %v1183_v51, %v1121_v45  ;;  %v1317_v31 = vadd.f32 %v1316_v55, %v1254_v54 }
 0x175   :  { %v1318_v59 = vadd.f32 %v1317_v31, %v1255_v57  ;;  %v1185_v63 = vadd.f32 %v1184_v61, %v1122_v56 }
 0x177   :  { %v1186_v28 = vadd.f32 %v1185_v63, %v1123_v62  ;;  %v1319_v1 = vadd.f32 %v1318_v59, %v1256_v25 }
 0x179   :  { %v1187_v8 = vadd.f32 %v1186_v28, %v1124_v4  ;;  %v1320_v11 = vadd.f32 %v1319_v1, %v1257_v43 }
 0x17b   :  { %v1188_v14 = vadd.f32 %v1187_v8, %v1125_v0  ;;  %v1321_v3 = vadd.f32 %v1320_v11, %v1258_v9 }
 0x17d   :  { %v1189_v18 = vadd.f32 %v1188_v14, %v1126_v58  ;;  %v1322_v7 = vadd.f32 %v1321_v3, %v1259_v13 }
 0x17f   :  { %v1190_v19 = vrot.slane %v1189_v18, 4  ;;  %v1323_v20 = vadd.f32 %v1322_v7, %v1260_v15 }
 0x181   :  { %v1191_v50 = vadd.f32 %v1190_v19, %v1189_v18  ;;  %v1324_v21 = vrot.slane %v1323_v20, 4 }
 0x183   :  { %v1192_v22 = vrot.slane %v1191_v50, 2  ;;  %v1325_v17 = vadd.f32 %v1324_v21, %v1323_v20 }
 0x185   :  { %v1193_v23 = vadd.f32 %v1192_v22, %v1191_v50  ;;  %v1326_v24 = vrot.slane %v1325_v17, 2 }
 0x187   :  { %v1194_v48 = vrot.slane %v1193_v23, 1  ;;  %v1327_v60 = vadd.f32 %v1326_v24, %v1325_v17 }
 0x189   :  { %v1195_v34 = vadd.f32 %v1194_v48, %v1193_v23  ;;  %v1328_v26 = vrot.slane %v1327_v60, 1 }
 0x18b   :  { %1196 = vst [vmem:[%s2559_s5] sm:$0x1] %v1195_v34  ;;  %v1329_v27 = vadd.f32 %v1328_v26, %v1327_v60 }
 0x18d   :  { %1330 = vst [vmem:[%s2560_s6] sm:$0x1] %v1329_v27 }

// kernel: block_forward.5
= control target key start
LH: loop header
LB: loop body
LE: loop exit
PB: predicated region body
PF: predicated region fallthrough
CT: control target
= control target key end

     0   :  { %s5506_s21 = smov 0   ;;  %s7397_s0 = inlined_call_operand.vmem [shape: bf16[512,128], index: 0, kind: input, shape index: {}]   ;;  %s7398_s1 = inlined_call_operand.vmem [shape: f32[2,128], index: 1, kind: input, shape index: {}]   ;;  %s7399_s2 = inlined_call_operand.vmem [shape: bf16[1152,128], index: 2, kind: input, shape index: {}]   ;;  %s7400_s3 = inlined_call_operand.vmem [shape: f32[1,128], index: 3, kind: input, shape index: {}]   ;;  %s7401_s4 = inlined_call_operand.vmem [shape: bf16[512,128], index: 4, kind: output, shape index: {0}]   ;;  %s7402_s5 = inlined_call_operand.vmem [shape: f32[2,1,128], index: 5, kind: output, shape index: {1}]   ;;  %s7403_s6 = inlined_call_operand.vmem [shape: f32[2,1,128], index: 6, kind: output, shape index: {2}]  }
   0x1 LB: > { %s5512_s22 = sadd.s32 4294967295, %s5467_s21   ;;  %p4244_p0 = scmp.ge.s32.totalorder %s5467_s21, 1  ;;  %s5467_s21 = sphi %s5506_s21, %s17_s21  }
   0x2   : > { %p218_p1 = scmp.lt.s32.totalorder %s5467_s21, 3 }
   0x4   : > { %p219_p2 = pnand %p4244_p0, %p218_p1 }
   0x6   : > { %222 = sbr.rel (%p219_p2) target bundleno = 571 (0x23b), region = 36 }
   0xd   : > { %v5386_v0 = vld [vmem:[%s7399_s2 + $0x40] sm:$0xff]   ;;  %v7408_v2 = vmov 0.0|0.0   ;;  %s4245_s27 = sshll.u32 %s5512_s22, 5  ;;  %v5388_v3 = vld [vmem:[%s7399_s2 + $0x48] sm:$0xff]   ;;  %v5390_v5 = vld [vmem:[%s7399_s2 + $0x50] sm:$0xff]   ;;  %v443_v6 = vlaneseq  ;;  %vm7439_vm4 = vmmov 1  }
   0xe   : > { %v5387_v1 = vld [vmem:[%s7399_s2] sm:$0xff]   ;;  %3061 = vmatprep.mubr.bf16.mxu0 %v7408_v2  ;;  %4840 = vmatprep.subr.bf16.mxu0 %v5386_v0  ;;  %p255_p3 = scmp.lt.s32.totalorder %s4245_s27, 63  ;;  %v5389_v4 = vld [vmem:[%s7399_s2 + $0x8] sm:$0xff]   ;;  %v5391_v7 = vld [vmem:[%s7399_s2 + $0x10] sm:$0xff]   ;;  %p266_p4 = scmp.lt.s32.totalorder %s5512_s22, 1 }
   0xf   : > { %5360 = vmatprep.subr.bf16.mxu1 %v5386_v0  ;;  %4841 = vmatpush3.bf16.msra.mxu0 %v5387_v1  ;;  %v5392_v8 = vld [vmem:[%s7399_s2 + $0x58] sm:$0xff]   ;;  %v5541_v9 = vshrl.u32 %v443_v6, 7  ;;  %v5394_v11 = vld [vmem:[%s7399_s2 + $0x60] sm:$0xff]   ;;  %v5396_v15 = vld [vmem:[%s7399_s2 + $0x68] sm:$0xff]  }
  0x10   : > { %5368 = vmatpush3.bf16.msra.mxu1 %v5387_v1  ;;  %4842 = vmatprep.subr.bf16.mxu0 %v5388_v3  ;;  %s7735_s27 = smov (!%p255_p3, %s4245_s27), 63  ;;  %v5393_v10 = vld [vmem:[%s7399_s2 + $0x18] sm:$0xff]   ;;  %v5395_v13 = vld [vmem:[%s7399_s2 + $0x20] sm:$0xff]   ;;  %v5397_v25 = vld [vmem:[%s7399_s2 + $0x28] sm:$0xff]   ;;  %s7737_s22 = smov (!%p266_p4, %s5512_s22), 1 }
  0x11   : > { %5361 = vmatprep.subr.bf16.mxu1 %v5388_v3  ;;  %s4246_s14 = sshll.u32 %s7735_s27, 2  ;;  %v468_v12 = vadd.s32 192, %v5541_v9  ;;  %v446_v14 = vadd.s32 16, %v5541_v9  ;;  %v5569_v17 = vld [vmem:[%s7398_s1] ss:$0 sm:$0xff]  ;;  %vm7437_vm0 = vcmp.lt.s32.totalorder %v5541_v9, 1  ;;  %s268_s30 = scalar_lea.vmem %s7402_s5, %s7737_s22 }
  0x12   : > { %s5556_s23 = scalar_lea.vmem %s7397_s0, %s4246_s14  ;;  %v470_v22 = vadd.s32 208, %v5541_v9  ;;  %v5579_v23 = vld [vmem:[%s7398_s1 + $0x1] ss:$0 sm:$0xff]  ;;  %v5398_v29 = vld [vmem:[%s7399_s2 + $0x70] sm:$0xff]   ;;  %v5602_v37 = vadd.s32 32, %v5541_v9  ;;  %v5614_v42 = vadd.s32 224, %v5541_v9  ;;  %s7318_s29 = scalar_lea.vmem %s7401_s4, %s4246_s14 }
  0x13   : > { %4843 = vmatpush3.bf16.msra.mxu0 %v5389_v4  ;;  %v4544_v16 = vld [vmem:[%s5556_s23 + $0x58] sm:$0xff]   ;;  %v648_v18 = vand.u32 15, %v468_v12  ;;  %v5572_v21 = vld [vmem:[%s5556_s23 + $0x50] sm:$0xff]   ;;  %v494_v28 = vand.u32 15, %v446_v14  ;;  %v4391_v40 = vld [vmem:[%s5556_s23] sm:$0xff]   ;;  %v5624_v49 = vadd.s32 48, %v5541_v9  ;;  %s271_s8 = scalar_lea.vmem %s7403_s6, %s7737_s22 }
  0x14   : > { %5369 = vmatpush3.bf16.msra.mxu1 %v5389_v4  ;;  %4844 = vmatprep.subr.bf16.mxu0 %v5390_v5  ;;  %v4436_v19 = vunpack.c.l.bf16 %v4544_v16  ;;  %v4437_v20 = vunpack.c.h.bf16 %v4544_v16  ;;  %v4433_v24 = vunpack.c.h.bf16 %v5572_v21  ;;  %v5399_v32 = vld [vmem:[%s7399_s2 + $0x30] sm:$0xff]   ;;  %v662_v36 = vand.u32 15, %v470_v22  ;;  %v5400_v43 = vld [vmem:[%s7399_s2 + $0x78] sm:$0xff]   ;;  %v4545_v47 = vld [vmem:[%s5556_s23 + $0x60] sm:$0xff]  }
  0x15   : > { %5362 = vmatprep.subr.bf16.mxu1 %v5390_v5  ;;  %vm5591_vm1 = vcmp.ne.s32.totalorder %v648_v18, 0  ;;  %vm5609_vm2 = vcmp.ne.s32.totalorder %v494_v28, 0  ;;  %v4392_v45 = vunpack.c.l.bf16 %v4391_v40  ;;  %v4393_v46 = vunpack.c.h.bf16 %v4391_v40  ;;  %v4548_v48 = vld [vmem:[%s5556_s23 + $0x78] sm:$0xff]   ;;  %v5402_v60 = vld [vmem:[%s7399_s2 + $0xc0] sm:$0xff]  }
  0x16   : > { %v364_v26 = vmul.f32 %v4436_v19, %v5569_v17  ;;  %v365_v27 = vmul.f32 %v4437_v20, %v5569_v17  ;;  %v363_v30 = vmul.f32 %v4433_v24, %v5569_v17  ;;  %v4440_v53 = vunpack.c.l.bf16 %v4545_v47  ;;  %v5401_v54 = vld [vmem:[%s7399_s2 + $0x38] sm:$0xff]   ;;  %v5403_v1 = vld [vmem:[%s7399_s2 + $0x140] sm:$0xff]   ;;  %vm5674_vm5 = vmpackc.low %vm7439_vm4, %vm5591_vm1 }
  0x17   : > { %4845 = vmatpush3.bf16.msra.mxu0 %v5391_v7  ;;  %v342_v56 = vmul.f32 %v4392_v45, %v5569_v17  ;;  %v343_v57 = vmul.f32 %v4393_v46, %v5569_v17  ;;  %v4441_v58 = vunpack.c.h.bf16 %v4545_v47  ;;  %v4453_v62 = vunpack.c.h.bf16 %v4548_v48  ;;  %v5404_v6 = vld [vmem:[%s7399_s2 + $0x80] sm:$0xff]   ;;  %vm5725_vm6 = vmpackc.low %vm7439_vm4, %vm5609_vm2  ;;  %v5410_v63 = vld [vmem:[%s7399_s2 + $0xd8] sm:$0xff]  }
  0x18   : > { %5370 = vmatpush3.bf16.msra.mxu1 %v5391_v7  ;;  %4846 = vmatprep.subr.bf16.mxu0 %v5392_v8  ;;  %v401_v33 = vadd.f32 %v5579_v23, %v364_v26  ;;  %v402_v34 = vadd.f32 %v5579_v23, %v365_v27  ;;  %v400_v35 = vadd.f32 %v5579_v23, %v363_v30  ;;  %vm5646_vm3 = vcmp.ne.s32.totalorder %v662_v36, 0  ;;  %v5405_v7 = vld [vmem:[%s7399_s2 + $0x100] sm:$0xff]   ;;  %v4546_v26 = vld [vmem:[%s5556_s23 + $0x68] sm:$0xff]  }
  0x19   : > { %5363 = vmatprep.subr.bf16.mxu1 %v5392_v8  ;;  %v366_v61 = vmul.f32 %v4440_v53, %v5569_v17  ;;  %v379_v3 = vadd.f32 %v5579_v23, %v342_v56  ;;  %v380_v4 = vadd.f32 %v5579_v23, %v343_v57  ;;  %v508_v5 = vand.u32 15, %v5602_v37  ;;  %v5411_v36 = vld [vmem:[%s7399_s2 + $0x148] sm:$0xff]   ;;  %vm5772_vm9 = vmpackc.low %vm7439_vm4, %vm5646_vm3 }
  0x1a   : > { %v5604_v38 = vmax.f32 %v401_v33, 0.0  ;;  %v5606_v39 = vmax.f32 %v402_v34, 0.0  ;;  %v5619_v44 = vmax.f32 %v400_v35, 0.0  ;;  %v367_v8 = vmul.f32 %v4441_v58, %v5569_v17  ;;  %v5413_v56 = vld [vmem:[%s7399_s2 + $0x108] sm:$0xff]  }
  0x1b   : > { %4847 = vmatpush3.bf16.msra.mxu0 %v5393_v10  ;;  %v676_v12 = vand.u32 15, %v5614_v42  ;;  %v5683_v16 = vmax.f32 %v379_v3, 0.0  ;;  %v5685_v18 = vmax.f32 %v380_v4, 0.0  ;;  %v522_v19 = vand.u32 15, %v5624_v49 }
  0x1c   : > { %5371 = vmatpush3.bf16.msra.mxu1 %v5393_v10  ;;  %4848 = vmatprep.subr.bf16.mxu0 %v5394_v11  ;;  %7495 = vst [vmem:[#allocation3_spill] sm:$0xff] %v5606_v39  ;;  %v5628_v50 = vpack.c.bf16 %v5606_v39, %v5604_v38  ;;  %v1010_v51 = vrot.slane %v5604_v38, 7  ;;  %v1011_v52 = vrot.slane %v5606_v39, 7  ;;  %v7406_v55 = vrot.slane %v5619_v44, 7 }
  0x1d   : > { %5364 = vmatprep.subr.bf16.mxu1 %v5394_v11  ;;  %v403_v10 = vadd.f32 %v5579_v23, %v366_v61  ;;  %v373_v11 = vmul.f32 %v4453_v62, %v5569_v17  ;;  %v404_v20 = vadd.f32 %v5579_v23, %v367_v8  ;;  %v5695_v27 = vadd.s32 240, %v5541_v9  ;;  %v5409_v8 = vld [vmem:[%s7399_s2 + $0x90] sm:$0xff]  }
  0x1e   : > { %7498 = vst [vmem:[#allocation4_spill] sm:$0xff] %v5628_v50  ;;  %v1029_v59 = vsel %vm7437_vm0, %v1010_v51, %v1011_v52  ;;  %v1030_v0 = vsel %vm7437_vm0, %v7406_v55, %v1010_v51  ;;  %3157 = vmatprep.mubr.bf16.mxu1 %v5628_v50  ;;  %v5699_v28 = vpack.c.bf16 %v5685_v18, %v5683_v16  ;;  %v989_v30 = vrot.slane %v5685_v18, 7 }
  0x1f   : > { %4849 = vmatpush3.bf16.msra.mxu0 %v5395_v13  ;;  %v5678_v14 = vpack.c.bf16 %v1029_v59, %v1030_v0  ;;  %v5689_v22 = vmax.f32 %v403_v10, 0.0  ;;  %v410_v24 = vadd.f32 %v5579_v23, %v373_v11  ;;  %v5706_v33 = vmax.f32 %v404_v20, 0.0 }
  0x20   : > { %5372 = vmatpush3.bf16.msra.mxu1 %v5395_v13  ;;  %4850 = vmatprep.subr.bf16.mxu0 %v5396_v15  ;;  %v7501_v13 = vmov 0  ;;  %v7504_v42 = vmov 0  ;;  %v4444_v45 = vunpack.c.l.bf16 %v4546_v26  ;;  %v4445_v46 = vunpack.c.h.bf16 %v4546_v26 }
  0x21   : > { %5365 = vmatprep.subr.bf16.mxu1 %v5396_v15  ;;  %v7502_v13 = vsel %vm5674_vm5, 4294967295, %v7501_v13  ;;  %v5406_v15 = vld [vmem:[%s7399_s2 + $0xc8] sm:$0xff]   ;;  %v5708_v34 = vmax.f32 %v410_v24, 0.0  ;;  %v1012_v35 = vrot.slane %v5689_v22, 7  ;;  %v7505_v42 = vsel %vm5725_vm6, 4294967295, %v7504_v42 }
  0x22   : > { %7503 = vst [vmem:[#allocation5_spill] sm:$0xff] %v7502_v13  ;;  %7506 = vst [vmem:[#allocation6_spill] sm:$0xff] %v7505_v42  ;;  %vm5730_vm7 = vcmp.ne.s32.totalorder %v508_v5, 0  ;;  %v5736_v48 = vpack.c.bf16 %v5706_v33, %v5689_v22  ;;  %v1013_v51 = vrot.slane %v5706_v33, 7  ;;  %vm5750_vm8 = vcmp.ne.s32.totalorder %v676_v12, 0  ;;  %v4547_v5 = vld [vmem:[%s5556_s23 + $0x70] sm:$0xff]  }
  0x23   : > { %4851 = vmatpush3.bf16.msra.mxu0 %v5397_v25  ;;  %v7404_v41 = vrot.slane %v5708_v34, 7  ;;  %v1028_v53 = vsel %vm7437_vm0, %v1011_v52, %v1012_v35  ;;  %v368_v59 = vmul.f32 %v4444_v45, %v5569_v17  ;;  %v690_v61 = vand.u32 15, %v5695_v27  ;;  %v5412_v45 = vld [vmem:[%s7399_s2 + $0x98] sm:$0xff]   ;;  %vm5850_vm10 = vmpackc.low %vm7439_vm4, %vm5730_vm7 }
  0x24   : > { %5373 = vmatpush3.bf16.msra.mxu1 %v5397_v25  ;;  %4852 = vmatprep.subr.bf16.mxu0 %v5398_v29  ;;  %v4534_v25 = vld [vmem:[%s5556_s23 + $0x8] sm:$0xff]   ;;  %7509 = vst [vmem:[#allocation7_spill] sm:$0xff] %v5736_v48  ;;  %v1027_v0 = vsel %vm7437_vm0, %v1012_v35, %v1013_v51  ;;  %v369_v3 = vmul.f32 %v4445_v46, %v5569_v17  ;;  %v4449_v35 = vunpack.c.h.bf16 %v4547_v5  ;;  %vm5867_vm11 = vmpackc.low %vm7439_vm4, %vm5750_vm8  ;;  %v7521_v47 = vmov 0 }
  0x25   : > { %5366 = vmatprep.subr.bf16.mxu1 %v5398_v29  ;;  %v988_v29 = vrot.slane %v5683_v16, 7  ;;  %v4396_v31 = vunpack.c.l.bf16 %v4534_v25  ;;  %v4397_v37 = vunpack.c.h.bf16 %v4534_v25  ;;  %v405_v12 = vadd.f32 %v5579_v23, %v368_v59  ;;  %v5419_v25 = vld [vmem:[%s7399_s2 + $0x150] sm:$0xff]  }
  0x26   : > { %v7522_v47 = vsel %vm5867_vm11, 4294967295, %v7521_v47  ;;  %vm5892_vm12 = vcmp.ne.s32.totalorder %v522_v19, 0  ;;  %vm5931_vm13 = vcmp.ne.s32.totalorder %v690_v61, 0  ;;  %v5418_v61 = vld [vmem:[%s7399_s2 + $0xf0] sm:$0xff]   ;;  %vm7438_vm7 = vcmp.lt.s32.totalorder %v5541_v9, 7 }
  0x27   : > { %4853 = vmatpush3.bf16.msra.mxu0 %v5399_v32  ;;  %v1051_v40 = vsel %vm7437_vm0, %v988_v29, %v989_v30  ;;  %v345_v58 = vmul.f32 %v4397_v37, %v5569_v17  ;;  %v1052_v62 = vsel %vm7437_vm0, %v7404_v41, %v988_v29  ;;  %7523 = vst [vmem:[#allocation13_spill] sm:$0xff] %v7522_v47  ;;  %vm5953_vm14 = vmpackc.low %vm7439_vm4, %vm5892_vm12  ;;  %v7558_v42 = vmov 0 }
  0x28   : > { %5374 = vmatpush3.bf16.msra.mxu1 %v5399_v32  ;;  %4854 = vmatprep.subr.bf16.mxu0 %v5400_v43  ;;  %v5407_v32 = vld [vmem:[%s7399_s2 + $0x88] sm:$0xff]   ;;  %vm5970_vm1 = vmpackc.low %vm7439_vm4, %vm5931_vm13 }
  0x29   : > { %5367 = vmatprep.subr.bf16.mxu1 %v5400_v43  ;;  %v344_v43 = vmul.f32 %v4396_v31, %v5569_v17  ;;  %v382_v10 = vadd.f32 %v5579_v23, %v345_v58  ;;  %v4448_v31 = vunpack.c.l.bf16 %v4547_v5  ;;  %v4536_v5 = vld [vmem:[%s5556_s23 + $0x18] sm:$0xff]  }
  0x2b   : > { %4855 = vmatpush3.bf16.msra.mxu0 %v5401_v54  ;;  %v381_v52 = vadd.f32 %v5579_v23, %v344_v43  ;;  %v5797_v26 = vmax.f32 %v382_v10, 0.0  ;;  %v5421_v43 = vld [vmem:[%s7399_s2 + $0x110] sm:$0xff]  }
  0x2c   : > { %5375 = vmatpush3.bf16.msra.mxu1 %v5401_v54  ;;  %5064 = vmatprep.subr.bf16.mxu0 %v5403_v1  ;;  %v5408_v54 = vld [vmem:[%s7399_s2 + $0xd0] sm:$0xff]   ;;  %v7512_v1 = vmov 0 }
  0x2d   : > { %4952 = vmatprep.subr.bf16.mxu1 %v5402_v60  ;;  %v4535_v60 = vld [vmem:[%s5556_s23 + $0x10] sm:$0xff]   ;;  %v7513_v1 = vsel %vm5772_vm9, 4294967295, %v7512_v1  ;;  %v5789_v11 = vmax.f32 %v381_v52, 0.0 }
  0x2e   : > { %3062 = vmatmul.mubr.bf16.vlgmr.msra.gmra.mrb[0].mxu0 %v7408_v2  ;;  %7514 = vst [vmem:[#allocation8_spill] sm:$0xff] %v7513_v1  ;;  %v4400_v4 = vunpack.c.l.bf16 %v4535_v60  ;;  %v4401_v20 = vunpack.c.h.bf16 %v4535_v60 }
  0x2f   : > { %4599 = vmatmul.mubr.msk.bf16.vlgmr.msra.gmra.mrb[0].mxu1 %vm5674_vm5, %v5678_v14  ;;  %5065 = vmatpush3.bf16.msra.mxu0 %v5405_v7  ;;  %v5780_v7 = vpack.c.bf16 %v1027_v0, %v1028_v53  ;;  %v990_v29 = vrot.slane %v5789_v11, 7  ;;  %v5820_v46 = vpack.c.bf16 %v5797_v26, %v5789_v11  ;;  %v991_v53 = vrot.slane %v5797_v26, 7 }
  0x30   : > { %4953 = vmatpush3.bf16.msra.mxu1 %v5404_v6  ;;  %3069 = vmatprep.mubr.bf16.mxu0 %v5699_v28  ;;  %v5778_v6 = vpack.c.bf16 %v1051_v40, %v1052_v62  ;;  %v346_v24 = vmul.f32 %v4400_v4, %v5569_v17  ;;  %v347_v37 = vmul.f32 %v4401_v20, %v5569_v17  ;;  %v5414_v62 = vld [vmem:[%s7399_s2 + $0xe0] sm:$0xff]  }
  0x31   : > { %4954 = vmatprep.subr.bf16.mxu1 %v5406_v15  ;;  %3165 = vmatprep.mubr.bf16.mxu1 %v5736_v48  ;;  %7515 = vst [vmem:[#allocation9_spill] sm:$0xff] %v5780_v7  ;;  %v406_v15 = vadd.f32 %v5579_v23, %v369_v3  ;;  %v371_v3 = vmul.f32 %v4449_v35, %v5569_v17  ;;  %v4404_v35 = vunpack.c.l.bf16 %v4536_v5 }
  0x32   : > { %5066 = vmatprep.subr.bf16.mxu0 %v5411_v36  ;;  %v383_v40 = vadd.f32 %v5579_v23, %v346_v24  ;;  %v384_v60 = vadd.f32 %v5579_v23, %v347_v37  ;;  %v4405_v37 = vunpack.c.h.bf16 %v4536_v5 }
  0x33   : > { %5067 = vmatpush3.bf16.msra.mxu0 %v5413_v56  ;;  %v5802_v36 = vmax.f32 %v406_v15, 0.0  ;;  %v370_v56 = vmul.f32 %v4448_v31, %v5569_v17  ;;  %v408_v24 = vadd.f32 %v5579_v23, %v371_v3  ;;  %v4537_v3 = vld [vmem:[%s5556_s23 + $0x20] sm:$0xff]  }
  0x34   : > { %4955 = vmatpush3.bf16.msra.mxu1 %v5407_v32  ;;  %v5800_v32 = vmax.f32 %v405_v12, 0.0  ;;  %5068 = vmatprep.subr.bf16.mxu0 %v5419_v25  ;;  %v5841_v0 = vmax.f32 %v383_v40, 0.0  ;;  %v5862_v15 = vmax.f32 %v384_v60, 0.0  ;;  %v5416_v40 = vld [vmem:[%s7399_s2 + $0xe8] sm:$0xff]   ;;  %v480_v60 = vand.u32 15, %v5541_v9 }
  0x35   : > { %4956 = vmatprep.subr.bf16.mxu1 %v5408_v54  ;;  %v1050_v54 = vsel %vm7437_vm0, %v989_v30, %v990_v29  ;;  %v1015_v59 = vrot.slane %v5802_v36, 7  ;;  %v1049_v30 = vsel %vm7437_vm0, %v990_v29, %v991_v53  ;;  %v407_v4 = vadd.f32 %v5579_v23, %v370_v56 }
  0x36   : > { %4566 = vmatmul.mubr.msk.bf16.gmra.mrb[4].mxu0 %vm5725_vm6, %v5778_v6  ;;  %v5830_v58 = vpack.c.bf16 %v5802_v36, %v5800_v32  ;;  %v1014_v52 = vrot.slane %v5800_v32, 7  ;;  %v992_v29 = vrot.slane %v5841_v0, 7  ;;  %v5882_v57 = vpack.c.bf16 %v5862_v15, %v5841_v0 }
  0x37   : > { %4602 = vmatmul.mubr.msk.bf16.gmra.mrb[4].mxu1 %vm5772_vm9, %v5780_v7  ;;  %5069 = vmatpush3.bf16.msra.mxu0 %v5421_v43  ;;  %v5874_v25 = vmax.f32 %v407_v4, 0.0  ;;  %v993_v31 = vrot.slane %v5862_v15, 7  ;;  %v5888_v43 = vmax.f32 %v408_v24, 0.0  ;;  %v348_v56 = vmul.f32 %v4404_v35, %v5569_v17 }
  0x38   : > { %4957 = vmatpush3.bf16.msra.mxu1 %v5409_v8  ;;  %7516 = vst [vmem:[#allocation10_spill] sm:$0xff] %v5830_v58  ;;  %3077 = vmatprep.mubr.bf16.mxu0 %v5820_v46  ;;  %v7517_v8 = vmov 0  ;;  %v1025_v10 = vsel %vm7437_vm0, %v1014_v52, %v1015_v59  ;;  %v1026_v12 = vsel %vm7437_vm0, %v1013_v51, %v1014_v52  ;;  %v5415_v51 = vld [vmem:[%s7399_s2 + $0xa0] sm:$0xff]   ;;  %vm5963_vm15 = vcmp.ne.s32.totalorder %v480_v60, 0  ;;  %v5420_v60 = vld [vmem:[%s7399_s2 + $0xb0] sm:$0xff]  }
  0x39   : > { %4958 = vmatprep.subr.bf16.mxu1 %v5410_v63  ;;  %3173 = vmatprep.mubr.bf16.mxu1 %v5830_v58  ;;  %v7518_v8 = vsel %vm5850_vm10, 4294967295, %v7517_v8  ;;  %v5854_v63 = vpack.c.bf16 %v1049_v30, %v1050_v54  ;;  %v5871_v20 = vpack.c.bf16 %v1025_v10, %v1026_v12  ;;  %v1016_v54 = vrot.slane %v5874_v25, 7  ;;  %v5427_v10 = vld [vmem:[%s7399_s2 + $0x118] sm:$0xff]   ;;  %v5417_v12 = vld [vmem:[%s7399_s2 + $0xa8] sm:$0xff]   ;;  %vm5994_vm2 = vmpackc.low %vm7439_vm4, %vm5963_vm15 }
  0x3a   : > { %7519 = vst [vmem:[#allocation11_spill] sm:$0xff] %v7518_v8  ;;  %v349_v52 = vmul.f32 %v4405_v37, %v5569_v17  ;;  %v452_v30 = vadd.s32 64, %v5541_v9  ;;  %v5913_v49 = vpack.c.bf16 %v5888_v43, %v5874_v25  ;;  %v1047_v19 = vsel %vm7437_vm0, %v992_v29, %v993_v31  ;;  %v5439_v8 = vld [vmem:[%s7399_s2 + $0x198] sm:$0xff]  }
  0x3b   : > { %7520 = vst [vmem:[#allocation12_spill] sm:$0xff] %v5854_v63  ;;  %7524 = vst [vmem:[#allocation14_spill] sm:$0xff] %v5871_v20  ;;  %v1048_v4 = vsel %vm7437_vm0, %v991_v53, %v992_v29  ;;  %v7405_v5 = vrot.slane %v5888_v43, 7  ;;  %v1024_v53 = vsel %vm7437_vm0, %v1015_v59, %v1016_v54  ;;  %v385_v29 = vadd.f32 %v5579_v23, %v348_v56 }
  0x3c   : > { %4959 = vmatpush3.bf16.msra.mxu1 %v5412_v45  ;;  %7527 = vst [vmem:[#allocation15_spill] sm:$0xff] %v5913_v49  ;;  %v386_v35 = vadd.f32 %v5579_v23, %v349_v52  ;;  %v4408_v59 = vunpack.c.l.bf16 %v4537_v3  ;;  %v4409_v37 = vunpack.c.h.bf16 %v4537_v3  ;;  %v7530_v56 = vmov 0 }
  0x3d   : > { %4960 = vmatprep.subr.bf16.mxu1 %v5414_v62  ;;  %v5426_v62 = vld [vmem:[%s7399_s2 + $0x158] sm:$0xff]   ;;  %v1023_v27 = vsel %vm7437_vm0, %v1016_v54, %v7405_v5  ;;  %v7531_v56 = vsel %vm5953_vm14, 4294967295, %v7530_v56  ;;  %v5959_v52 = vmax.f32 %v385_v29, 0.0  ;;  %v7536_v45 = vmov 0 }
  0x3e   : > { %4569 = vmatmul.mubr.msk.bf16.gmra.mrb[8].mxu0 %vm5850_vm10, %v5854_v63  ;;  %7532 = vst [vmem:[#allocation16_spill] sm:$0xff] %v7531_v56  ;;  %v5961_v41 = vmax.f32 %v386_v35, 0.0  ;;  %5070 = vmatprep.subr.bf16.mxu0 %v5426_v62  ;;  %v7537_v45 = vsel %vm5970_vm1, 4294967295, %v7536_v45  ;;  %v5974_v3 = vpack.c.bf16 %v1023_v27, %v1024_v53  ;;  %v351_v29 = vmul.f32 %v4409_v37, %v5569_v17  ;;  %v5422_v62 = vld [vmem:[%s7399_s2 + $0xf8] sm:$0xff]   ;;  %v4538_v53 = vld [vmem:[%s5556_s23 + $0x28] sm:$0xff]   ;;  %v5430_v37 = vld [vmem:[%s7399_s2 + $0x120] sm:$0xff]  }
  0x3f   : > { %4605 = vmatmul.mubr.msk.bf16.gmra.mrb[8].mxu1 %vm5867_vm11, %v5871_v20  ;;  %3085 = vmatprep.mubr.bf16.mxu0 %v5882_v57  ;;  %7538 = vst [vmem:[#allocation18_spill] sm:$0xff] %v7537_v45  ;;  %v447_v5 = vadd.s32 24, %v5541_v9  ;;  %v4412_v2 = vunpack.c.l.bf16 %v4538_v53  ;;  %v1342_v58 = vrot.slane %v5685_v18, 1  ;;  %v5425_v18 = vld [vmem:[%s7399_s2 + $0x180] sm:$0xff]   ;;  %v4540_v45 = vld [vmem:[%s5556_s23 + $0x38] sm:$0xff]   ;;  %v5447_v56 = vld [vmem:[%s7399_s2 + $0x1a8] sm:$0xff]  }
  0x40   : > { %4961 = vmatpush3.bf16.msra.mxu1 %v5415_v51  ;;  %v5428_v51 = vld [vmem:[%s7399_s2 + $0x160] sm:$0xff]   ;;  %3181 = vmatprep.mubr.bf16.mxu1 %v5913_v49  ;;  %7539 = vst [vmem:[#allocation19_spill] sm:$0xff] %v5974_v3  ;;  %v5986_v24 = vpack.c.bf16 %v5961_v41, %v5959_v52  ;;  %v388_v27 = vadd.f32 %v5579_v23, %v351_v29  ;;  %v7425_v49 = vrot.slane %v5683_v16, 1 }
  0x41   : > { %4962 = vmatprep.subr.bf16.mxu1 %v5416_v40  ;;  %v5957_v40 = vpack.c.bf16 %v1047_v19, %v1048_v4  ;;  %v536_v19 = vand.u32 15, %v452_v30  ;;  %5071 = vmatpush3.bf16.msra.mxu0 %v5427_v10  ;;  %v350_v4 = vmul.f32 %v4408_v59, %v5569_v17  ;;  %v994_v30 = vrot.slane %v5959_v52, 7  ;;  %v5424_v29 = vld [vmem:[%s7399_s2 + $0x1c0] sm:$0xff]  }
  0x42   : > { %7540 = vst [vmem:[#allocation20_spill] sm:$0xff] %v5986_v24  ;;  %v7407_v10 = vrot.slane %v5961_v41, 7  ;;  %5072 = vmatprep.subr.bf16.mxu0 %v5428_v51  ;;  %v454_v59 = vadd.s32 80, %v5541_v9  ;;  %v5423_v51 = vld [vmem:[%s7399_s2 + $0xb8] sm:$0xff]   ;;  %v352_v48 = vmul.f32 %v4412_v2, %v5569_v17  ;;  %v7548_v2 = vmov 0 }
  0x43   : > { %7533 = vst [vmem:[#allocation17_spill] sm:$0xff] %v5957_v40  ;;  %v387_v35 = vadd.f32 %v5579_v23, %v350_v4  ;;  %vm6013_vm3 = vcmp.ne.s32.totalorder %v536_v19, 0  ;;  %v1046_v4 = vsel %vm7437_vm0, %v993_v31, %v994_v30  ;;  %v5432_v19 = vld [vmem:[%s7399_s2 + $0x168] sm:$0xff]   ;;  %v4413_v31 = vunpack.c.h.bf16 %v4538_v53 }
  0x44   : > { %4963 = vmatpush3.bf16.msra.mxu1 %v5417_v12  ;;  %v7541_v12 = vmov 0  ;;  %v1045_v54 = vsel %vm7437_vm0, %v994_v30, %v7407_v10  ;;  %v6035_v10 = vmax.f32 %v388_v27, 0.0  ;;  %v550_v30 = vand.u32 15, %v454_v59  ;;  %v4539_v27 = vld [vmem:[%s5556_s23 + $0x30] sm:$0xff]   ;;  %vm6059_vm8 = vmpackc.low %vm7439_vm4, %vm6013_vm3 }
  0x45   : > { %4964 = vmatprep.subr.bf16.mxu1 %v5418_v61  ;;  %v7542_v12 = vsel %vm5994_vm2, 4294967295, %v7541_v12  ;;  %v6033_v55 = vmax.f32 %v387_v35, 0.0  ;;  %v353_v35 = vmul.f32 %v4413_v31, %v5569_v17  ;;  %5073 = vmatpush3.bf16.msra.mxu0 %v5430_v37  ;;  %v6049_v53 = vpack.c.bf16 %v1045_v54, %v1046_v4  ;;  %v5437_v54 = vld [vmem:[%s7399_s2 + $0x130] sm:$0xff]  }
  0x46   : > { %7543 = vst [vmem:[#allocation21_spill] sm:$0xff] %v7542_v12  ;;  %4572 = vmatmul.mubr.msk.bf16.gmra.mrb[12].mxu0 %vm5953_vm14, %v5957_v40  ;;  %v501_v59 = vand.u32 15, %v447_v5  ;;  %5074 = vmatprep.subr.bf16.mxu0 %v5432_v19  ;;  %v7549_v2 = vsel %vm6059_vm8, 4294967295, %v7548_v2  ;;  %v389_v5 = vadd.f32 %v5579_v23, %v352_v48  ;;  %v4416_v61 = vunpack.c.l.bf16 %v4539_v27 }
  0x47   : > { %4608 = vmatmul.mubr.msk.bf16.gmra.mrb[12].mxu1 %vm5970_vm1, %v5974_v3  ;;  %3093 = vmatprep.mubr.bf16.mxu0 %v5986_v24  ;;  %7546 = vst [vmem:[#allocation22_spill] sm:$0xff] %v6049_v53  ;;  %7550 = vst [vmem:[#allocation24_spill] sm:$0xff] %v7549_v2  ;;  %v996_v37 = vrot.slane %v6033_v55, 7  ;;  %v390_v4 = vadd.f32 %v5579_v23, %v353_v35  ;;  %vm6073_vm12 = vcmp.ne.s32.totalorder %v550_v30, 0  ;;  %v456_v48 = vadd.s32 96, %v5541_v9  ;;  %v5436_v30 = vld [vmem:[%s7399_s2 + $0x170] sm:$0xff]  }
  0x48   : > { %4965 = vmatpush3.bf16.msra.mxu1 %v5420_v60  ;;  %4611 = vmatprep.mubr.msk.bf16.mxu1 %vm5994_vm2, %v5778_v6  ;;  %v7416_v60 = vrot.slane %v5789_v11, 1  ;;  %v6053_v6 = vpack.c.bf16 %v6035_v10, %v6033_v55  ;;  %v4417_v35 = vunpack.c.h.bf16 %v4539_v27  ;;  %v1404_v27 = vsel %vm7438_vm7, %v7425_v49, %v1342_v58  ;;  %vm6136_vm15 = vmpackc.low %vm7439_vm4, %vm6073_vm12 }
  0x49   : > { %4966 = vmatprep.subr.bf16.mxu1 %v5422_v62  ;;  %v5433_v62 = vld [vmem:[%s7399_s2 + $0x128] sm:$0xff]   ;;  %v6101_v50 = vmax.f32 %v390_v4, 0.0  ;;  %v354_v12 = vmul.f32 %v4416_v61, %v5569_v17  ;;  %v7554_v47 = vrot.slane %v6035_v10, 7  ;;  %v7555_v3 = vrot.slane %v5961_v41, 7 }
  0x4a   : > { %7547 = vst [vmem:[#allocation23_spill] sm:$0xff] %v6053_v6  ;;  %v1403_v31 = vsel %vm7438_vm7, %v1342_v58, %v7416_v60  ;;  %5075 = vmatpush3.bf16.msra.mxu0 %v5433_v62  ;;  %v7553_v60 = vmov 0.0|0.0   ;;  %v6099_v62 = vmax.f32 %v389_v5, 0.0  ;;  %vm6114_vm13 = vcmp.ne.s32.totalorder %v501_v59, 15 }
  0x4b   : > { %v1044_v58 = vsel %vm7437_vm0, %v7555_v3, %v996_v37  ;;  %v449_v4 = vadd.s32 40, %v5541_v9  ;;  %v5434_v3 = vld [vmem:[%s7399_s2 + $0x1d0] sm:$0xff]   ;;  %v6129_v59 = vpack.c.bf16 %v1403_v31, %v1404_v27  ;;  %v1344_v61 = vrot.slane %v5797_v26, 1  ;;  %5076 = vmatprep.subr.bf16.mxu0 %v5436_v30  ;;  %vm6148_vm3 = vmpackc.low %vm6114_vm13, %vm7439_vm4 }
  0x4c   : > { %4967 = vmatpush3.bf16.msra.mxu1 %v5423_v51  ;;  %v5429_v51 = vld [vmem:[%s7399_s2 + $0x1c8] sm:$0xff]   ;;  %v7427_v49 = vrot.slane %v5841_v0, 1  ;;  %v7559_v42 = vsel %vm6136_vm15, 4294967295, %v7558_v42  ;;  %v7431_v31 = vrot.slane %v6101_v50, 7  ;;  %v7561_v26 = vmov 0 }
  0x4d   : > { %5176 = vmatprep.subr.bf16.mxu1 %v5424_v29  ;;  %v5431_v29 = vld [vmem:[%s7399_s2 + $0x188] sm:$0xff]   ;;  %v7562_v26 = vsel %vm6148_vm3, 4294967295, %v7561_v26  ;;  %v6154_v19 = vpack.c.bf16 %v6101_v50, %v6099_v62  ;;  %v4420_v30 = vunpack.c.l.bf16 %v4540_v45  ;;  %v4421_v27 = vunpack.c.h.bf16 %v4540_v45  ;;  %v5438_v45 = vld [vmem:[%s7399_s2 + $0x1d8] sm:$0xff]  }
  0x4e   : > { %4575 = vmatmul.mubr.msk.bf16.gmra.mrb[16].mxu0 %vm6059_vm8, %v6049_v53  ;;  %v7564_v5 = vrot.slane %v5789_v11, 1 }
  0x4f   : > { %3223 = vmatmul.mubr.bf16.vlgmr.msra.gmra.mrb[16].mxu1 %v7553_v60  ;;  %3101 = vmatprep.mubr.bf16.mxu0 %v6053_v6  ;;  %v1043_v60 = vsel %vm7437_vm0, %v996_v37, %v7554_v47  ;;  %v355_v47 = vmul.f32 %v4417_v35, %v5569_v17  ;;  %v564_v37 = vand.u32 15, %v456_v48  ;;  %v998_v35 = vrot.slane %v6099_v62, 7  ;;  %7563 = vst [vmem:[#allocation26_spill] sm:$0xff] %v6154_v19 }
  0x50   : > { %5177 = vmatpush3.bf16.msra.mxu1 %v5425_v18  ;;  %v5440_v18 = vld [vmem:[%s7399_s2 + $0x178] sm:$0xff]   ;;  %4614 = vmatprep.mubr.msk.bf16.mxu1 %vm5725_vm6, %v5854_v63  ;;  %v391_v48 = vadd.f32 %v5579_v23, %v354_v12  ;;  %v5435_v12 = vld [vmem:[%s7399_s2 + $0x190] sm:$0xff]  }
  0x51   : > { %5178 = vmatprep.subr.bf16.mxu1 %v5429_v51  ;;  %v6140_v51 = vpack.c.bf16 %v1043_v60, %v1044_v58  ;;  %5077 = vmatpush3.bf16.msra.mxu0 %v5437_v54  ;;  %v392_v60 = vadd.f32 %v5579_v23, %v355_v47  ;;  %v515_v54 = vand.u32 15, %v449_v4  ;;  %v5441_v58 = vld [vmem:[%s7399_s2 + $0x138] sm:$0xff]   ;;  %v1402_v47 = vsel %vm7438_vm7, %v7564_v5, %v1344_v61  ;;  %v6178_v4 = vld [vmem:[%s7399_s2 + $0x200] sm:$0xff]  }
  0x52   : > { %5078 = vmatprep.subr.bf16.mxu0 %v5440_v18  ;;  %v458_v18 = vadd.s32 112, %v5541_v9  ;;  %vm6186_vm12 = vcmp.ne.s32.totalorder %v564_v37, 0  ;;  %v451_v5 = vadd.s32 56, %v5541_v9  ;;  %v7567_v37 = vrot.slane %v6035_v10, 7 }
  0x53   : > { %7560 = vst [vmem:[#allocation25_spill] sm:$0xff] %v6140_v51  ;;  %v6206_v1 = vmax.f32 %v392_v60, 0.0  ;;  %vm6210_vm13 = vcmp.ne.s32.totalorder %v515_v54, 15 }
  0x54   : > { %5179 = vmatpush3.bf16.msra.mxu1 %v5431_v29  ;;  %v1401_v29 = vsel %vm7438_vm7, %v1344_v61, %v7427_v49  ;;  %v6194_v61 = vmax.f32 %v391_v48, 0.0  ;;  %v4541_v49 = vld [vmem:[%s5556_s23 + $0x40] sm:$0xff]   ;;  %v1042_v63 = vsel %vm7437_vm0, %v7567_v37, %v998_v35  ;;  %v357_v48 = vmul.f32 %v4421_v27, %v5569_v17  ;;  %vm6239_vm7 = vmpackc.low %vm6210_vm13, %vm7439_vm4 }
  0x55   : > { %5180 = vmatprep.subr.bf16.mxu1 %v5434_v3  ;;  %v1041_v3 = vsel %vm7437_vm0, %v998_v35, %v7431_v31  ;;  %v356_v31 = vmul.f32 %v4420_v30, %v5569_v17  ;;  %5079 = vmatpush3.bf16.msra.mxu0 %v5441_v58  ;;  %v4432_v35 = vunpack.c.l.bf16 %v5572_v21  ;;  %v578_v60 = vand.u32 15, %v458_v18  ;;  %v5442_v27 = vld [vmem:[%s7399_s2 + $0x1e0] sm:$0xff]   ;;  %vm6229_vm0 = vmpackc.low %vm7439_vm4, %vm6186_vm12 }
  0x56   : > { %4578 = vmatmul.mubr.msk.bf16.gmra.mrb[20].mxu0 %vm6136_vm15, %v6140_v51  ;;  %v1346_v37 = vrot.slane %v5862_v15, 1  ;;  %v4424_v54 = vunpack.c.l.bf16 %v4541_v49  ;;  %5312 = vmatprep.subr.bf16.mxu0 %v6178_v4  ;;  %v6233_v21 = vpack.c.bf16 %v1041_v3, %v1042_v63  ;;  %v1000_v15 = vrot.slane %v6194_v61, 7 }
  0x57   : > { %4617 = vmatmul.mubr.msk.bf16.gmra.mrb[20].mxu1 %vm6148_vm3, %v6129_v59  ;;  %3109 = vmatprep.mubr.bf16.mxu0 %v6154_v19  ;;  %v6214_v19 = vpack.c.bf16 %v1401_v29, %v1402_v47  ;;  %v529_v58 = vand.u32 15, %v451_v5  ;;  %v4425_v29 = vunpack.c.h.bf16 %v4541_v49  ;;  %v7573_v47 = vmov 0  ;;  %v4542_v49 = vld [vmem:[%s5556_s23 + $0x48] sm:$0xff]   ;;  %v5444_v5 = vld [vmem:[%s7399_s2 + $0x1a0] sm:$0xff]  }
  0x58   : > { %4620 = vmatprep.mubr.msk.bf16.mxu1 %vm5850_vm10, %v5957_v40  ;;  %5181 = vmatpush3.bf16.msra.mxu1 %v5435_v12  ;;  %v7570_v12 = vmov 0  ;;  %v7574_v47 = vsel %vm6239_vm7, 4294967295, %v7573_v47  ;;  %v6245_v18 = vpack.c.bf16 %v6206_v1, %v6194_v61  ;;  %v393_v63 = vadd.f32 %v5579_v23, %v356_v31 }
  0x59   : > { %5182 = vmatprep.subr.bf16.mxu1 %v5438_v45  ;;  %v7571_v12 = vsel %vm6229_vm0, 4294967295, %v7570_v12  ;;  %v394_v11 = vadd.f32 %v5579_v23, %v357_v48  ;;  %v460_v3 = vadd.s32 128, %v5541_v9  ;;  %v362_v20 = vmul.f32 %v4432_v35, %v5569_v17 }
  0x5a   : > { %7572 = vst [vmem:[#allocation27_spill] sm:$0xff] %v7571_v12  ;;  %7575 = vst [vmem:[#allocation28_spill] sm:$0xff] %v6245_v18  ;;  %vm6256_vm12 = vcmp.ne.s32.totalorder %v578_v60, 0  ;;  %v7578_v45 = vrot.slane %v5959_v52, 1  ;;  %vm7579_vm13 = vcmp.lt.s32.totalorder %v5541_v9, 7  ;;  %v358_v48 = vmul.f32 %v4424_v54, %v5569_v17 }
  0x5b   : > { %vm6274_vm4 = vcmp.ne.s32.totalorder %v529_v58, 15  ;;  %v7582_v60 = vrot.slane %v5841_v0, 1  ;;  %v7583_v58 = vrot.slane %v6206_v1, 7  ;;  %vm7584_vm10 = vcmp.lt.s32.totalorder %v5541_v9, 1 }
  0x5c   : > { %5183 = vmatpush3.bf16.msra.mxu1 %v5439_v8  ;;  %v1399_v31 = vsel %vm7579_vm13, %v1346_v37, %v7578_v45  ;;  %v5445_v8 = vld [vmem:[%s7399_s2 + $0x1e8] sm:$0xff]   ;;  %v359_v45 = vmul.f32 %v4425_v29, %v5569_v17  ;;  %v7585_v0 = vrot.slane %v6101_v50, 7  ;;  %vm7586_vm6 = vmmov %vm7584_vm10  ;;  %v6298_v6 = vmax.f32 %v394_v11, 0.0 }
  0x5d   : > { %5184 = vmatprep.subr.bf16.mxu1 %v5442_v27  ;;  %v1400_v54 = vsel %vm7579_vm13, %v7582_v60, %v1346_v37  ;;  %v453_v27 = vadd.s32 72, %v5541_v9  ;;  %v1039_v40 = vsel %vm7584_vm10, %v1000_v15, %v7583_v58  ;;  %v6296_v60 = vmax.f32 %v393_v63, 0.0  ;;  %v5448_v63 = vld [vmem:[%s7399_s2 + $0x1f0] sm:$0xff]  }
  0x5e   : > { %4581 = vmatmul.mubr.msk.bf16.gmra.mrb[24].mxu0 %vm6229_vm0, %v6233_v21  ;;  %v1040_v37 = vsel %vm7586_vm6, %v7585_v0, %v1000_v15  ;;  %v592_v17 = vand.u32 15, %v460_v3  ;;  %v4428_v29 = vunpack.c.l.bf16 %v4542_v49  ;;  %v1348_v58 = vrot.slane %v5961_v41, 1 }
  0x5f   : > { %4623 = vmatmul.mubr.msk.bf16.gmra.mrb[24].mxu1 %vm6239_vm7, %v6214_v19  ;;  %3117 = vmatprep.mubr.bf16.mxu0 %v6245_v18  ;;  %v399_v18 = vadd.f32 %v5579_v23, %v362_v20  ;;  %v395_v13 = vadd.f32 %v5579_v23, %v358_v48  ;;  %v4429_v15 = vunpack.c.h.bf16 %v4542_v49  ;;  %vm7587_vm6 = vmmov 1   ;;  %v6324_v23 = vld [vmem:[%s7398_s1 + $0x1] ss:$0 sm:$0xff]  ;;  %v6343_v48 = vld [vmem:[%s7398_s1] ss:$0 sm:$0xff] }
  0x60   : > { %4626 = vmatprep.mubr.msk.bf16.mxu1 %vm5953_vm14, %v6049_v53  ;;  %5185 = vmatpush3.bf16.msra.mxu1 %v5444_v5  ;;  %v7454_v53 = vrot.slane %v6033_v55, 1  ;;  %vm6313_vm10 = vmpackc.low %vm7587_vm6, %vm6256_vm12  ;;  %v7588_v11 = vmov 0  ;;  %v6317_v3 = vpack.c.bf16 %v1039_v40, %v1040_v37  ;;  %v6319_v41 = vpack.c.bf16 %v1399_v31, %v1400_v54 }
  0x61   : > { %5186 = vmatprep.subr.bf16.mxu1 %v5445_v8  ;;  %v7589_v11 = vsel %vm6313_vm10, 4294967295, %v7588_v11  ;;  %v543_v20 = vand.u32 15, %v453_v27  ;;  %v396_v49 = vadd.f32 %v6324_v23, %v359_v45  ;;  %vm6330_vm13 = vmpackc.low %vm6274_vm4, %vm7587_vm6  ;;  %v7590_v30 = vmov 0  ;;  %v5450_v27 = vld [vmem:[%s7399_s2 + $0x1b0] sm:$0xff]  }
  0x62   : > { %v7591_v30 = vsel %vm6330_vm13, 4294967295, %v7590_v30  ;;  %v6336_v40 = vpack.c.bf16 %v6298_v6, %v6296_v60  ;;  %v1002_v5 = vrot.slane %v6296_v60, 7  ;;  %v1003_v31 = vrot.slane %v6298_v6, 7 }
  0x63   : > { %7592 = vst [vmem:[#allocation29_spill] sm:$0xff] %v7591_v30  ;;  %v361_v8 = vmul.f32 %v6343_v48, %v4429_v15  ;;  %vm6346_vm12 = vcmp.ne.s32.totalorder %v592_v17, 0  ;;  %v360_v54 = vmul.f32 %v6343_v48, %v4428_v29  ;;  %vm7596_vm4 = vcmp.lt.s32.totalorder %v5541_v9, 7  ;;  %v5451_v17 = vld [vmem:[%s7399_s2 + $0x1f8] sm:$0xff]  }
  0x64   : > { %7593 = vst [vmem:[#allocation30_spill] sm:$0xff] %v6336_v40  ;;  %5187 = vmatpush3.bf16.msra.mxu1 %v5447_v56  ;;  %v1397_v45 = vsel %vm7596_vm4, %v1348_v58, %v7454_v53  ;;  %v6358_v0 = vmax.f32 %v395_v13, 0.0  ;;  %v7597_v56 = vrot.slane %v5959_v52, 1  ;;  %v6374_v29 = vmax.f32 %v396_v49, 0.0 }
  0x65   : > { %v398_v37 = vadd.f32 %v6324_v23, %v361_v8  ;;  %5188 = vmatprep.subr.bf16.mxu1 %v5448_v63  ;;  %v462_v15 = vadd.s32 144, %v5541_v9  ;;  %v6377_v63 = vmax.f32 %v399_v18, 0.0  ;;  %vm7598_vm14 = vcmp.lt.s32.totalorder %v5541_v9, 1 }
  0x66   : > { %4584 = vmatmul.mubr.msk.bf16.gmra.mrb[28].mxu0 %vm6313_vm10, %v6317_v3  ;;  %v1398_v13 = vsel %vm7596_vm4, %v7597_v56, %v1348_v58  ;;  %v1037_v8 = vsel %vm7598_vm14, %v1002_v5, %v1003_v31  ;;  %v7599_v52 = vrot.slane %v6206_v1, 7  ;;  %vm7600_vm2 = vmmov %vm7598_vm14  ;;  %v455_v49 = vadd.s32 88, %v5541_v9 }
  0x67   : > { %4629 = vmatmul.mubr.msk.bf16.gmra.mrb[28].mxu1 %vm6330_vm13, %v6319_v41  ;;  %3125 = vmatprep.mubr.bf16.mxu0 %v6336_v40  ;;  %v6390_v56 = vmax.f32 %v398_v37, 0.0  ;;  %vm6392_vm4 = vcmp.ne.s32.totalorder %v543_v20, 15  ;;  %v397_v53 = vadd.f32 %v6324_v23, %v360_v54  ;;  %v1008_v2 = vrot.slane %v6377_v63, 7  ;;  %vm6408_vm14 = vmpackc.low %vm7587_vm6, %vm6346_vm12 }
  0x68   : > { %4632 = vmatprep.mubr.msk.bf16.mxu1 %vm6059_vm8, %v6140_v51  ;;  %v1038_v58 = vsel %vm7600_vm2, %v7599_v52, %v1002_v5  ;;  %5189 = vmatpush3.bf16.msra.mxu1 %v5450_v27  ;;  %v5453_v51 = vld [vmem:[%s7399_s2 + $0x1b8] sm:$0xff]   ;;  %v1004_v40 = vrot.slane %v6358_v0, 7  ;;  %v1350_v5 = vrot.slane %v6035_v10, 1  ;;  %v1351_v37 = vrot.slane %v6099_v62, 1  ;;  %vm6424_vm8 = vmpackc.low %vm6392_vm4, %vm7587_vm6 }
  0x69   : > { %v7468_v20 = vrot.slane %v6390_v56, 7  ;;  %5190 = vmatprep.subr.bf16.mxu1 %v5451_v17  ;;  %v6412_v27 = vpack.c.bf16 %v1037_v8, %v1038_v58  ;;  %v6414_v52 = vpack.c.bf16 %v1397_v45, %v1398_v13  ;;  %v1005_v7 = vrot.slane %v6374_v29, 7  ;;  %vm7608_vm12 = vmmov %vm7600_vm2 }
  0x6a   : > { %v7605_v10 = vrot.slane %v5619_v44, 7  ;;  %v7606_v35 = vmov 0  ;;  %v6430_v17 = vpack.c.bf16 %v6374_v29, %v6358_v0  ;;  %v606_v45 = vand.u32 15, %v462_v15  ;;  %vm7609_vm4 = vmmov %vm7600_vm2 }
  0x6b   : > { %v7607_v35 = vsel %vm6424_vm8, 4294967295, %v7606_v35  ;;  %v557_v13 = vand.u32 15, %v455_v49  ;;  %v1032_v8 = vsel %vm7608_vm12, %v7468_v20, %v1008_v2  ;;  %v429_v58 = vmax.f32 %v397_v53, 0.0  ;;  %vm7613_vm12 = vmmov %vm7609_vm4 }
  0x6c   : > { %v1031_v62 = vsel %vm7600_vm2, %v1008_v2, %v7605_v10  ;;  %v464_v10 = vadd.s32 160, %v5541_v9  ;;  %v457_v18 = vadd.s32 104, %v5541_v9  ;;  %5191 = vmatpush3.bf16.msra.mxu1 %v5453_v51  ;;  %v1036_v39 = vsel %vm7609_vm4, %v1003_v31, %v1004_v40 }
  0x6d   : > { %v6438_v24 = vpack.c.bf16 %v1031_v62, %v1032_v8  ;;  %vm7610_vm2 = vcmp.lt.s32.totalorder %v5541_v9, 7  ;;  %v7611_v49 = vrot.slane %v6033_v55, 1  ;;  %v1352_v53 = vrot.slane %v6101_v50, 1 }
  0x6e   : > { %v1395_v15 = vsel %vm7610_vm2, %v1350_v5, %v1351_v37  ;;  %vm7612_vm1 = vmmov %vm7610_vm2  ;;  %4587 = vmatmul.mubr.msk.bf16.gmra.mrb[32].mxu0 %vm6408_vm14, %v6412_v27  ;;  %v1035_v2 = vsel %vm7613_vm12, %v1004_v40, %v1005_v7  ;;  %v7476_v51 = vrot.slane %v6194_v61, 1  ;;  %v1358_v55 = vrot.slane %v6374_v29, 1 }
  0x6f   : > { %v1396_v30 = vsel %vm7612_vm1, %v7611_v49, %v1350_v5  ;;  %4635 = vmatmul.mubr.msk.bf16.gmra.mrb[32].mxu1 %vm6424_vm8, %v6414_v52  ;;  %v1359_v31 = vrot.slane %v429_v58, 1  ;;  %3133 = vmatprep.mubr.bf16.mxu0 %v6430_v17  ;;  %vm942_vm1 = vcmp.ne.s32.totalorder %v606_v45, 0  ;;  %vm6463_vm4 = vcmp.ne.s32.totalorder %v557_v13, 15  ;;  %vm7616_vm12 = vmmov %vm7610_vm2 }
  0x70   : > { %4638 = vmatprep.mubr.msk.bf16.mxu1 %vm6136_vm15, %v6233_v21  ;;  %v7472_v5 = vrot.slane %v6358_v0, 1  ;;  %v6468_v62 = vpack.c.bf16 %v1395_v15, %v1396_v30  ;;  %v620_v40 = vand.u32 15, %v464_v10  ;;  %v571_v8 = vand.u32 15, %v457_v18  ;;  %vm7617_vm15 = vmmov %vm7610_vm2 }
  0x71   : > { %v1387_v29 = vsel %vm7610_vm2, %v1358_v55, %v1359_v31  ;;  %v6472_v49 = vpack.c.bf16 %v1035_v2, %v1036_v39  ;;  %v1394_v20 = vsel %vm7616_vm12, %v1351_v37, %v1352_v53  ;;  %v1360_v13 = vrot.slane %v6390_v56, 1  ;;  %vm6482_vm11 = vmpackc.low %vm7587_vm6, %vm942_vm1 }
  0x72   : > { %v1388_v45 = vsel %vm7617_vm15, %v7472_v5, %v1358_v55  ;;  %v7618_v30 = vmov 0  ;;  %v1006_v10 = vrot.slane %v429_v58, 7  ;;  %v1393_v39 = vsel %vm7610_vm2, %v1352_v53, %v7476_v51  ;;  %vm6496_vm15 = vmpackc.low %vm6463_vm4, %vm7587_vm6 }
  0x73   : > { %v7619_v30 = vsel %vm6482_vm11, 4294967295, %v7618_v30  ;;  %v6490_v18 = vpack.c.bf16 %v1387_v29, %v1388_v45  ;;  %v1361_v37 = vrot.slane %v6377_v63, 1  ;;  %v7620_v15 = vmov 0  ;;  %vm7622_vm1 = vmmov %vm7610_vm2 }
  0x74   : > { %v7621_v15 = vsel %vm6496_vm15, 4294967295, %v7620_v15  ;;  %v6501_v2 = vpack.c.bf16 %v6390_v56, %v429_v58  ;;  %v1386_v55 = vsel %vm7622_vm1, %v1359_v31, %v1360_v13  ;;  %v1362_v5 = vrot.slane %v5619_v44, 1  ;;  %vm7625_vm2 = vmmov %vm7622_vm1 }
  0x75   : > { %v7475_v53 = vrot.slane %v5604_v38, 1  ;;  %vm6507_vm12 = vcmp.ne.s32.totalorder %v620_v40, 0  ;;  %v1385_v50 = vsel %vm7625_vm2, %v1360_v13, %v1361_v37  ;;  %vm6513_vm4 = vcmp.ne.s32.totalorder %v571_v8, 15  ;;  %vm7628_vm9 = vmmov %vm7622_vm1 }
  0x76   : > { %v6517_v58 = vpack.c.bf16 %v1385_v50, %v1386_v55  ;;  %v1384_v40 = vsel %vm7628_vm9, %v1361_v37, %v1362_v5  ;;  %4590 = vmatmul.mubr.msk.bf16.gmra.mrb[36].mxu0 %vm6482_vm11, %v6472_v49  ;;  %vm7629_vm2 = vcmp.lt.s32.totalorder %v5541_v9, 1  ;;  %v6533_v13 = vpack.c.bf16 %v1393_v39, %v1394_v20 }
  0x77   : > { %v1383_v31 = vsel %vm7622_vm1, %v1362_v5, %v7475_v53  ;;  %4641 = vmatmul.mubr.msk.bf16.gmra.mrb[36].mxu1 %vm6496_vm15, %v6468_v62  ;;  %v1034_v8 = vsel %vm7629_vm2, %v1005_v7, %v1006_v10  ;;  %v466_v55 = vadd.s32 176, %v5541_v9  ;;  %3141 = vmatprep.mubr.bf16.mxu0 %v6501_v2  ;;  %v7630_v5 = vrot.slane %v6390_v56, 7  ;;  %vm7631_vm9 = vmmov %vm7629_vm2 }
  0x78   : > { %v6536_v50 = vpack.c.bf16 %v1383_v31, %v1384_v40  ;;  %4644 = vmatprep.mubr.msk.bf16.mxu1 %vm6229_vm0, %v6317_v3  ;;  %v1365_v7 = vrot.slane %v5689_v22, 1  ;;  %v1366_v20 = vrot.slane %v5706_v33, 1  ;;  %v1367_v39 = vrot.slane %v5800_v32, 1  ;;  %vm7632_vm2 = vmmov %vm7622_vm1 }
  0x79   : > { %v1033_v37 = vsel %vm7631_vm9, %v1006_v10, %v7630_v5  ;;  %v6551_v31 = vpack.c.bf16 %v5619_v44, %v6377_v63  ;;  %v459_v40 = vadd.s32 120, %v5541_v9  ;;  %v1354_v53 = vrot.slane %v6206_v1, 1  ;;  %vm6567_vm9 = vmpackc.low %vm7587_vm6, %vm6507_vm12  ;;  %v5460_v5 = vld [vmem:[%s5556_s23 + $0x78] sm:$0xff]  }
  0x7a   : > { %v1368_v56 = vrot.slane %v5802_v36, 1  ;;  %v445_v51 = vadd.s32 8, %v5541_v9  ;;  %v1379_v10 = vsel %vm7622_vm1, %v1366_v20, %v1367_v39  ;;  %v1380_v33 = vsel %vm7632_vm2, %v1365_v7, %v1366_v20  ;;  %vm6581_vm2 = vmpackc.low %vm6513_vm4, %vm7587_vm6 }
  0x7b   : > { %v1369_v32 = vrot.slane %v5874_v25, 1  ;;  %v7633_v44 = vmov 0  ;;  %v6571_v1 = vpack.c.bf16 %v1033_v37, %v1034_v8  ;;  %v6573_v36 = vpack.c.bf16 %v1379_v10, %v1380_v33  ;;  %vm7637_vm12 = vmmov %vm7622_vm1 }
  0x7c   : > { %v7634_v44 = vsel %vm6567_vm9, 4294967295, %v7633_v44  ;;  %v1378_v63 = vsel %vm7622_vm1, %v1367_v39, %v1368_v56  ;;  %v4452_v12 = vunpack.c.l.bf16 %v5460_v5  ;;  %v7635_v25 = vmov 0 }
  0x7d   : > { %v7636_v25 = vsel %vm6581_vm2, 4294967295, %v7635_v25  ;;  %v634_v29 = vand.u32 15, %v466_v55  ;;  %v1355_v20 = vrot.slane %v6296_v60, 1  ;;  %v1377_v8 = vsel %vm7637_vm12, %v1368_v56, %v1369_v32  ;;  %vm7638_vm12 = vmmov %vm7622_vm1 }
  0x7e   : > { %v1370_v37 = vrot.slane %v5888_v43, 1  ;;  %v585_v10 = vand.u32 15, %v459_v40  ;;  %v6589_v33 = vpack.c.bf16 %v1377_v8, %v1378_v63  ;;  %v372_v39 = vmul.f32 %v6343_v48, %v4452_v12  ;;  %4593 = vmatmul.mubr.msk.bf16.gmra.mrb[40].mxu0 %vm6567_vm9, %v6571_v1 }
  0x7f   : > { %v487_v5 = vand.u32 15, %v445_v51  ;;  %4647 = vmatmul.mubr.msk.bf16.gmra.mrb[40].mxu1 %vm6581_vm2, %v6533_v13  ;;  %3149 = vmatprep.mubr.bf16.mxu0 %v6551_v31  ;;  %vm946_vm4 = vcmp.ne.s32.totalorder %v634_v29, 0  ;;  %v1391_v12 = vsel %vm7638_vm12, %v1354_v53, %v1355_v20  ;;  %v7639_v48 = vrot.slane %v6194_v61, 1  ;;  %vm7643_vm12 = vmmov %vm7622_vm1 }
  0x80   : > { %v1376_v45 = vsel %vm7622_vm1, %v1369_v32, %v1370_v37  ;;  %v409_v60 = vadd.f32 %v6324_v23, %v372_v39  ;;  %4650 = vmatprep.mubr.msk.bf16.mxu1 %vm6313_vm10, %v6412_v27  ;;  %vm971_vm0 = vcmp.ne.s32.totalorder %v585_v10, 15  ;;  %v461_v55 = vadd.s32 136, %v5541_v9  ;;  %vm6616_vm15 = vmpackc.low %vm7587_vm6, %vm946_vm4 }
  0x81   : > { %v1392_v51 = vsel %vm7622_vm1, %v7639_v48, %v1354_v53  ;;  %v1372_v23 = vrot.slane %v5708_v34, 1  ;;  %vm957_vm2 = vcmp.ne.s32.totalorder %v487_v5, 15  ;;  %v7640_v56 = vmov 0  ;;  %vm6628_vm1 = vmpackc.low %vm971_vm0, %vm7587_vm6 }
  0x82   : > { %v6612_v40 = vmax.f32 %v409_v60, 0.0  ;;  %v7641_v56 = vsel %vm6616_vm15, 4294967295, %v7640_v56  ;;  %v6620_v32 = vpack.c.bf16 %v1391_v12, %v1392_v51  ;;  %v7642_v63 = vrot.slane %v5683_v16, 1  ;;  %vm6634_vm4 = vmpackc.low %vm957_vm2, %vm7587_vm6 }
  0x83   : > { %v1356_v8 = vrot.slane %v6298_v6, 1  ;;  %v599_v39 = vand.u32 15, %v461_v55  ;;  %vm7648_vm10 = vmmov %vm7643_vm12  ;;  %v7650_v6 = vrot.slane %v6358_v0, 1  ;;  %v463_v48 = vadd.s32 152, %v5541_v9 }
  0x84   : > { %v1371_v61 = vrot.slane %v6612_v40, 1  ;;  %v1405_v53 = vsel %vm7643_vm12, %v1372_v23, %v7642_v63  ;;  %vm7649_vm8 = vmmov %vm7648_vm10  ;;  %v465_v0 = vadd.s32 168, %v5541_v9  ;;  %v467_v63 = vadd.s32 184, %v5541_v9 }
  0x85   : > { %vm7651_vm0 = vmmov %vm7649_vm8 }
  0x86   : > { %v1375_v5 = vsel %vm7648_vm10, %v1370_v37, %v1371_v61  ;;  %v1374_v16 = vsel %vm7649_vm8, %v1371_v61, %v1372_v23  ;;  %4596 = vmatmul.mubr.msk.bf16.gmra.mrb[44].mxu0 %vm6616_vm15, %v6438_v24  ;;  %v1389_v37 = vsel %vm7651_vm0, %v1356_v8, %v7650_v6  ;;  %vm7652_vm8 = vmmov %vm7651_vm0  ;;  %vm973_vm10 = vcmp.ne.s32.totalorder %v599_v39, 15  ;;  %v5452_v61 = vld [vmem:[%s7399_s2 + $0x218] sm:$0xff]  }
  0x87   : > { %v6642_v60 = vpack.c.bf16 %v1375_v5, %v1376_v45  ;;  %v6644_v12 = vpack.c.bf16 %v1405_v53, %v1374_v16  ;;  %4653 = vmatmul.mubr.msk.bf16.gmra.mrb[44].mxu1 %vm6628_vm1, %v6620_v32  ;;  %4704 = vmatprep.mubr.msk.bf16.mxu0 %vm6634_vm4, %v6129_v59  ;;  %v1390_v45 = vsel %vm7652_vm8, %v1355_v20, %v1356_v8  ;;  %vm6668_vm2 = vmpackc.low %vm973_vm10, %vm7587_vm6  ;;  %v613_v23 = vand.u32 15, %v463_v48  ;;  %v5446_v59 = vld [vmem:[%s7399_s2 + $0x208] sm:$0xff]   ;;  %v5449_v20 = vld [vmem:[%s7399_s2 + $0x210] sm:$0xff]  }
  0x88   : > { %4656 = vmatprep.mubr.msk.bf16.mxu1 %vm6408_vm14, %v6472_v49  ;;  %v6665_v51 = vpack.c.bf16 %v1389_v37, %v1390_v45  ;;  %v5454_v53 = vld [vmem:[%s7399_s2 + $0x220] sm:$0xff]   ;;  %v641_v39 = vand.u32 15, %v467_v63  ;;  %v5455_v5 = vld [vmem:[%s7399_s2 + $0x228] sm:$0xff]   ;;  %v7659_v16 = vld [vmem:[#allocation29_spill] sm:$0xff]  ;;  %v469_v6 = vadd.s32 200, %v5541_v9 }
  0x89   : > { %vm975_vm12 = vcmp.ne.s32.totalorder %v613_v23, 15  ;;  %v5456_v37 = vld [vmem:[%s7399_s2 + $0x230] sm:$0xff]   ;;  %v7662_v48 = vld [vmem:[#allocation3_spill] sm:$0xff] }
  0x8a   : > { %vm6691_vm0 = vmpackc.low %vm975_vm12, %vm7587_vm6  ;;  %vm979_vm12 = vcmp.ne.s32.totalorder %v641_v39, 15  ;;  %v1364_v23 = vrot.slane %v7662_v48, 1 }
  0x8e   : > { %3384 = vmatmul.mubr.bf16.vlgmr.msra.gmra.mrb[48].mxu0 %v5699_v28 }
  0x8f   : > { %4659 = vmatmul.mubr.msk.bf16.gmra.mrb[48].mxu1 %vm6668_vm2, %v6665_v51  ;;  %5313 = vmatpush3.bf16.msra.mxu0 %v6178_v4  ;;  %v627_v4 = vand.u32 15, %v465_v0  ;;  %v5457_v0 = vld [vmem:[%s7399_s2 + $0x238] sm:$0xff]  }
  0x90   : > { %4662 = vmatprep.mubr.msk.bf16.mxu1 %vm6482_vm11, %v6571_v1  ;;  %4707 = vmatprep.mubr.msk.bf16.mxu0 %vm6148_vm3, %v6214_v19  ;;  %vm7685_vm11 = vcmp.lt.s32.totalorder %v5541_v9, 1 }
  0x91   : > { %5314 = vmatprep.subr.bf16.mxu0 %v5446_v59  ;;  %vm977_vm8 = vcmp.ne.s32.totalorder %v627_v4, 15  ;;  %v7664_v4 = vld [vmem:[#allocation9_spill] sm:$0xff] }
  0x92   : > { %vm6713_vm10 = vmpackc.low %vm977_vm8, %vm7587_vm6 }
  0x93   : > { %5315 = vmatpush3.bf16.msra.mxu0 %v5446_v59  ;;  %vm6735_vm8 = vmpackc.low %vm979_vm12, %vm7587_vm6  ;;  %v655_v59 = vand.u32 15, %v469_v6  ;;  %vm7666_vm12 = vnez %v7607_v35 }
  0x94   : > { %5316 = vmatprep.subr.bf16.mxu0 %v5449_v20 }
  0x96   : > { %3392 = vmatmul.mubr.bf16.gmra.mrb[52].mxu0 %v5820_v46 }
  0x97   : > { %4665 = vmatmul.mubr.msk.bf16.gmra.mrb[52].mxu1 %vm6691_vm0, %v6490_v18  ;;  %4710 = vmatprep.mubr.msk.bf16.mxu0 %vm6239_vm7, %v6319_v41  ;;  %vm7687_vm7 = vmmov %vm7685_vm11 }
  0x98   : > { %4668 = vmatprep.mubr.msk.bf16.mxu1 %vm6567_vm9, %v6438_v24  ;;  %5317 = vmatpush3.bf16.msra.mxu0 %v5449_v20  ;;  %v7663_v20 = vld [vmem:[#allocation20_spill] sm:$0xff] }
  0x99   : > { %5318 = vmatprep.subr.bf16.mxu0 %v5452_v61 }
  0x9c   : > { %5319 = vmatpush3.bf16.msra.mxu0 %v5452_v61 }
  0x9d   : > { %5320 = vmatprep.subr.bf16.mxu0 %v5454_v53 }
  0x9e   : > { %3400 = vmatmul.mubr.bf16.gmra.mrb[56].mxu0 %v5882_v57 }
  0x9f   : > { %4671 = vmatmul.mubr.msk.bf16.gmra.mrb[56].mxu1 %vm6713_vm10, %v6517_v58  ;;  %4713 = vmatprep.mubr.msk.bf16.mxu0 %vm6330_vm13, %v6414_v52  ;;  %vm981_vm13 = vcmp.ne.s32.totalorder %v655_v59, 15 }
  0xa0   : > { %4674 = vmatprep.mubr.msk.bf16.mxu1 %vm6616_vm15, %v5678_v14  ;;  %5321 = vmatpush3.bf16.msra.mxu0 %v5454_v53  ;;  %vm7667_vm15 = vcmp.lt.s32.totalorder %v5541_v9, 7  ;;  %v7668_v53 = vrot.slane %v5604_v38, 1  ;;  %v7672_v38 = vld [vmem:[#allocation23_spill] sm:$0xff] }
  0xa1   : > { %5322 = vmatprep.subr.bf16.mxu0 %v5455_v5  ;;  %v1381_v63 = vsel %vm7667_vm15, %v1364_v23, %v1365_v7  ;;  %vm7669_vm9 = vmmov %vm7667_vm15  ;;  %v7673_v7 = vld [vmem:[#allocation14_spill] sm:$0xff] }
  0xa2   : > { %v1382_v39 = vsel %vm7669_vm9, %v7668_v53, %v1364_v23  ;;  %v7674_v23 = vld [vmem:[#allocation8_spill] sm:$0xff]  ;;  %vm7676_vm9 = vnez %v7621_v15  ;;  %v7679_v53 = vld [vmem:[#allocation26_spill] sm:$0xff] }
  0xa3   : > { %v6762_v6 = vpack.c.bf16 %v1381_v63, %v1382_v39  ;;  %vm7675_vm15 = vnez %v7674_v23  ;;  %v1018_v63 = vrot.slane %v6612_v40, 7  ;;  %v7680_v39 = vld [vmem:[#allocation19_spill] sm:$0xff]  ;;  %v7686_v23 = vrot.slane %v5888_v43, 7  ;;  %v7691_v43 = vld [vmem:[#allocation18_spill] sm:$0xff] }
  0xa4   : > { %5323 = vmatpush3.bf16.msra.mxu0 %v5455_v5  ;;  %v471_v5 = vadd.s32 216, %v5541_v9 }
  0xa5   : > { %5324 = vmatprep.subr.bf16.mxu0 %v5456_v37  ;;  %v1022_v61 = vsel %vm7687_vm7, %v7686_v23, %v1018_v63  ;;  %v7697_v23 = vld [vmem:[#allocation21_spill] sm:$0xff] }
  0xa6   : > { %3408 = vmatmul.mubr.bf16.gmra.mrb[60].mxu0 %v7663_v20  ;;  %v669_v22 = vand.u32 15, %v471_v5  ;;  %v7681_v5 = vld [vmem:[#allocation13_spill] sm:$0xff] }
  0xa7   : > { %4677 = vmatmul.mubr.msk.bf16.gmra.mrb[60].mxu1 %vm6735_vm8, %v6536_v50  ;;  %4716 = vmatprep.mubr.msk.bf16.mxu0 %vm7666_vm12, %v6468_v62 }
  0xa8   : > { %4680 = vmatprep.mubr.msk.bf16.mxu1 %vm5674_vm5, %v7664_v4  ;;  %5325 = vmatpush3.bf16.msra.mxu0 %v5456_v37  ;;  %vm6765_vm5 = vmpackc.low %vm981_vm13, %vm7587_vm6  ;;  %vm983_vm13 = vcmp.ne.s32.totalorder %v669_v22, 15  ;;  %v473_v37 = vadd.s32 232, %v5541_v9  ;;  %v7684_v22 = vrot.slane %v5708_v34, 7 }
  0xa9   : > { %5326 = vmatprep.subr.bf16.mxu0 %v5457_v0  ;;  %vm6781_vm12 = vmpackc.low %vm983_vm13, %vm7587_vm6 }
  0xac   : > { %5327 = vmatpush3.bf16.msra.mxu0 %v5457_v0  ;;  %v683_v0 = vand.u32 15, %v473_v37  ;;  %v1021_v37 = vsel %vm7685_vm11, %v1018_v63, %v7684_v22  ;;  %v7690_v22 = vld [vmem:[#allocation28_spill] sm:$0xff]  ;;  %vm7692_vm11 = vnez %v7691_v43  ;;  %v7699_v63 = vld [vmem:[#allocation17_spill] sm:$0xff] }
  0xad   : > { %v7706_v43 = vld [vmem:[#allocation25_spill] sm:$0xff] }
  0xae   : > { %3416 = vmatmul.mubr.bf16.gmra.mrb[64].mxu0 %v7672_v38  ;;  %vm985_vm13 = vcmp.ne.s32.totalorder %v683_v0, 15 }
  0xaf   : > { %4683 = vmatmul.mubr.msk.bf16.gmra.mrb[64].mxu1 %vm6765_vm5, %v6762_v6  ;;  %4719 = vmatprep.mubr.msk.bf16.mxu0 %vm7676_vm9, %v6533_v13  ;;  %vm7683_vm9 = vnez %v7636_v25  ;;  %vm6806_vm3 = vmpackc.low %vm985_vm13, %vm7587_vm6 }
  0xb0   : > { %4686 = vmatprep.mubr.msk.bf16.mxu1 %vm7675_vm15, %v7673_v7  ;;  %vm7682_vm15 = vnez %v7681_v5  ;;  %v475_v7 = vadd.s32 248, %v5541_v9 }
  0xb2   : > { %v697_v0 = vand.u32 15, %v475_v7  ;;  %v7696_v7 = vld [vmem:[#allocation12_spill] sm:$0xff] }
  0xb4   : > { %vm987_vm7 = vcmp.ne.s32.totalorder %v697_v0, 15  ;;  %v7703_v0 = vld [vmem:[#allocation11_spill] sm:$0xff] }
  0xb5   : > { %vm6823_vm13 = vmpackc.low %vm987_vm7, %vm7587_vm6  ;;  %vm7698_vm6 = vnez %v7697_v23  ;;  %vm7704_vm7 = vnez %v7703_v0  ;;  %v7710_v23 = vld [vmem:[#allocation24_spill] sm:$0xff] }
  0xb6   : > { %3424 = vmatmul.mubr.bf16.gmra.mrb[68].mxu0 %v7679_v53 }
  0xb7   : > { %4689 = vmatmul.mubr.msk.bf16.gmra.mrb[68].mxu1 %vm6781_vm12, %v6573_v36  ;;  %4722 = vmatprep.mubr.msk.bf16.mxu0 %vm7683_vm9, %v6620_v32 }
  0xb8   : > { %4692 = vmatprep.mubr.msk.bf16.mxu1 %vm7682_vm15, %v7680_v39  ;;  %v6810_v39 = vpack.c.bf16 %v1021_v37, %v1022_v61  ;;  %v7695_v61 = vld [vmem:[#allocation30_spill] sm:$0xff] }
  0xb9   : > { %v7700_v37 = vld [vmem:[#allocation6_spill] sm:$0xff] }
  0xbe   : > { %3432 = vmatmul.mubr.bf16.gmra.mrb[72].mxu0 %v7690_v22 }
  0xbf   : > { %4695 = vmatmul.mubr.msk.bf16.gmra.mrb[72].mxu1 %vm6806_vm3, %v6589_v33  ;;  %4725 = vmatprep.mubr.msk.bf16.mxu0 %vm6628_vm1, %v6665_v51 }
  0xc0   : > { %4698 = vmatprep.mubr.msk.bf16.mxu1 %vm7692_vm11, %v6810_v39  ;;  %vm7701_vm11 = vnez %v7700_v37  ;;  %v6893_v37 = vpack.c.bf16 %v5708_v34, %v6612_v40 }
  0xc6   : > { %3440 = vmatmul.mubr.bf16.gmra.mrb[76].mxu0 %v7695_v61 }
  0xc7   : > { %4701 = vmatmul.mubr.msk.bf16.gmra.mrb[76].mxu1 %vm6823_vm13, %v6642_v60  ;;  %4728 = vmatprep.mubr.msk.bf16.mxu0 %vm6668_vm2, %v6490_v18 }
  0xc8   : > { %3544 = vmatprep.mubr.bf16.mxu1 %v5820_v46  ;;  %v7702_v46 = vld [vmem:[#allocation22_spill] sm:$0xff] }
  0xce   : > { %3448 = vmatmul.mubr.bf16.gmra.mrb[80].mxu0 %v6430_v17 }
  0xcf   : > { %4752 = vmatmul.mubr.msk.bf16.vlgmr.msra.gmra.mrb[80].mxu1 %vm7698_vm6, %v7696_v7  ;;  %4731 = vmatprep.mubr.msk.bf16.mxu0 %vm6691_vm0, %v6517_v58  ;;  %v7707_v7 = vld [vmem:[#allocation16_spill] sm:$0xff] }
  0xd0   : > { %3552 = vmatprep.mubr.bf16.mxu1 %v5882_v57  ;;  %v7705_v57 = vld [vmem:[#allocation4_spill] sm:$0xff]  ;;  %vm7708_vm6 = vnez %v7707_v7 }
  0xd6   : > { %3456 = vmatmul.mubr.bf16.gmra.mrb[84].mxu0 %v6501_v2 }
  0xd7   : > { %4755 = vmatmul.mubr.msk.bf16.gmra.mrb[84].mxu1 %vm7701_vm11, %v7699_v63  ;;  %4734 = vmatprep.mubr.msk.bf16.mxu0 %vm6713_vm10, %v6536_v50  ;;  %vm7711_vm11 = vnez %v7710_v23 }
  0xd8   : > { %3560 = vmatprep.mubr.bf16.mxu1 %v7663_v20  ;;  %v7709_v20 = vld [vmem:[#allocation7_spill] sm:$0xff] }
  0xde   : > { %3464 = vmatmul.mubr.bf16.gmra.mrb[88].mxu0 %v6551_v31 }
  0xdf   : > { %4758 = vmatmul.mubr.msk.bf16.gmra.mrb[88].mxu1 %vm7704_vm7, %v7702_v46  ;;  %4737 = vmatprep.mubr.msk.bf16.mxu0 %vm6735_vm8, %v6762_v6  ;;  %vm7713_vm7 = vnez %v7559_v42 }
  0xe0   : > { %3568 = vmatprep.mubr.bf16.mxu1 %v7672_v38  ;;  %v7712_v38 = vld [vmem:[#allocation10_spill] sm:$0xff] }
  0xe6   : > { %3472 = vmatmul.mubr.bf16.gmra.mrb[92].mxu0 %v7705_v57 }
  0xe7   : > { %4761 = vmatmul.mubr.msk.bf16.gmra.mrb[92].mxu1 %vm7708_vm6, %v7706_v43  ;;  %4740 = vmatprep.mubr.msk.bf16.mxu0 %vm6765_vm5, %v6573_v36 }
  0xe8   : > { %3576 = vmatprep.mubr.bf16.mxu1 %v7679_v53  ;;  %v7714_v53 = vld [vmem:[#allocation15_spill] sm:$0xff] }
  0xee   : > { %3480 = vmatmul.mubr.bf16.gmra.mrb[96].mxu0 %v7709_v20 }
  0xef   : > { %4764 = vmatmul.mubr.msk.bf16.gmra.mrb[96].mxu1 %vm7711_vm11, %v6233_v21  ;;  %4743 = vmatprep.mubr.msk.bf16.mxu0 %vm6781_vm12, %v6589_v33  ;;  %v7715_v21 = vld [vmem:[#allocation27_spill] sm:$0xff]  ;;  %vm7719_vm11 = vnez %v7574_v47 }
  0xf0   : > { %3584 = vmatprep.mubr.bf16.mxu1 %v7690_v22  ;;  %vm7716_vm6 = vnez %v7715_v21 }
  0xf6   : > { %3488 = vmatmul.mubr.bf16.gmra.mrb[100].mxu0 %v7712_v38 }
  0xf7   : > { %4767 = vmatmul.mubr.msk.bf16.gmra.mrb[100].mxu1 %vm7713_vm7, %v6317_v3  ;;  %4746 = vmatprep.mubr.msk.bf16.mxu0 %vm6806_vm3, %v6642_v60  ;;  %vm7721_vm7 = vnez %v7659_v16 }
  0xf8   : > { %3592 = vmatprep.mubr.bf16.mxu1 %v7695_v61 }
  0xfe   : > { %3496 = vmatmul.mubr.bf16.gmra.mrb[104].mxu0 %v7714_v53 }
  0xff   : > { %4770 = vmatmul.mubr.msk.bf16.gmra.mrb[104].mxu1 %vm7716_vm6, %v6412_v27  ;;  %4749 = vmatprep.mubr.msk.bf16.mxu0 %vm6823_vm13, %v6644_v12  ;;  %vm7717_vm13 = vnez %v7589_v11  ;;  %vm7722_vm6 = vnez %v7607_v35  ;;  %v6968_v35 = vld [vmem:[%s7400_s3] ss:$0 sm:$0xff] }
 0x100   : > { %3600 = vmatprep.mubr.bf16.mxu1 %v6430_v17 }
 0x101   : > { %v4856_v42 = vpop.f32.mrb[0].mxu0 }
 0x102   : > { %v4928_v3 = vpop.f32.mrb[0].mxu1  ;;  %v4857_v22 = vpop.f32.mrb[1].mxu0 }
 0x103   : > { %v4929_v63 = vpop.f32.mrb[1].mxu1  ;;  %v6895_v61 = vadd.f32 %v4857_v22, %v4856_v42  ;;  %v4859_v0 = vpop.f32.mrb[2].mxu0 }
 0x104   : > { %v6897_v46 = vadd.f32 %v4929_v63, %v4928_v3  ;;  %v4931_v27 = vpop.f32.mrb[2].mxu1  ;;  %v4860_v43 = vpop.f32.mrb[3].mxu0 }
 0x105   : > { %v4932_v7 = vpop.f32.mrb[3].mxu1  ;;  %v6899_v9 = vadd.f32 %v4860_v43, %v4859_v0 }
 0x106   : > { %v6901_v23 = vadd.f32 %v4932_v7, %v4931_v27  ;;  %3504 = vmatmul.mubr.bf16.gmra.mrb[108].mxu0 %v6893_v37 }
 0x107   : > { %4773 = vmatmul.mubr.msk.bf16.gmra.mrb[108].mxu1 %vm7717_vm13, %v6472_v49  ;;  %5328 = vmatprep.mubr.msk.bf16.mxu0 %vm6634_vm4, %v6214_v19  ;;  %vm7718_vm4 = vnez %v7562_v26  ;;  %vm7723_vm13 = vnez %v7634_v44 }
 0x108   : > { %3608 = vmatprep.mubr.bf16.mxu1 %v6501_v2 }
 0x109   : > { %v4862_v34 = vpop.f32.mrb[4].mxu0 }
 0x10a   : > { %v4934_v17 = vpop.f32.mrb[4].mxu1  ;;  %v4863_v40 = vpop.f32.mrb[5].mxu0 }
 0x10b   : > { %v4935_v21 = vpop.f32.mrb[5].mxu1  ;;  %v6911_v42 = vadd.f32 %v4863_v40, %v4862_v34  ;;  %v4865_v22 = vpop.f32.mrb[6].mxu0 }
 0x10c   : > { %v6913_v3 = vadd.f32 %v4935_v21, %v4934_v17  ;;  %v4937_v63 = vpop.f32.mrb[6].mxu1  ;;  %v4866_v0 = vpop.f32.mrb[7].mxu0 }
 0x10d   : > { %v4938_v27 = vpop.f32.mrb[7].mxu1  ;;  %v6915_v11 = vadd.f32 %v4866_v0, %v4865_v22 }
 0x10e   : > { %v6917_v49 = vadd.f32 %v4938_v27, %v4937_v63  ;;  %5329 = vmatmul.mubr.msk.bf16.vlgmr.msra.gmra.mrb[112].mxu0 %vm7718_vm4, %v6319_v41  ;;  %vm7724_vm4 = vnez %v7621_v15 }
 0x10f   : > { %4776 = vmatmul.mubr.msk.bf16.gmra.mrb[112].mxu1 %vm6408_vm14, %v6571_v1  ;;  %5332 = vmatprep.mubr.msk.bf16.mxu0 %vm7719_vm11, %v6414_v52  ;;  %vm7720_vm14 = vnez %v7619_v30 }
 0x110   : > { %3616 = vmatprep.mubr.bf16.mxu1 %v6551_v31 }
 0x111   : > { %v4868_v19 = vpop.f32.mrb[8].mxu0 }
 0x112   : > { %v4940_v2 = vpop.f32.mrb[8].mxu1  ;;  %v4869_v10 = vpop.f32.mrb[9].mxu0 }
 0x113   : > { %v4941_v43 = vpop.f32.mrb[9].mxu1  ;;  %v6929_v7 = vadd.f32 %v4869_v10, %v4868_v19  ;;  %v4871_v54 = vpop.f32.mrb[10].mxu0 }
 0x114   : > { %v6931_v34 = vadd.f32 %v4941_v43, %v4940_v2  ;;  %v4943_v1 = vpop.f32.mrb[10].mxu1  ;;  %v4872_v17 = vpop.f32.mrb[11].mxu0 }
 0x115   : > { %v4944_v40 = vpop.f32.mrb[11].mxu1  ;;  %v6933_v26 = vadd.f32 %v4872_v17, %v4871_v54 }
 0x116   : > { %v6935_v41 = vadd.f32 %v4944_v40, %v4943_v1  ;;  %5333 = vmatmul.mubr.msk.bf16.gmra.mrb[116].mxu0 %vm7721_vm7, %v6468_v62 }
 0x117   : > { %4779 = vmatmul.mubr.msk.bf16.gmra.mrb[116].mxu1 %vm7720_vm14, %v6438_v24  ;;  %5336 = vmatprep.mubr.msk.bf16.mxu0 %vm7722_vm6, %v6533_v13 }
 0x118   : > { %3624 = vmatprep.mubr.bf16.mxu1 %v7705_v57 }
 0x119   : > { %v4874_v47 = vpop.f32.mrb[12].mxu0 }
 0x11a   : > { %v4946_v52 = vpop.f32.mrb[12].mxu1  ;;  %v4875_v31 = vpop.f32.mrb[13].mxu0 }
 0x11b   : > { %v4947_v21 = vpop.f32.mrb[13].mxu1  ;;  %v6947_v22 = vadd.f32 %v4875_v31, %v4874_v47  ;;  %v4877_v30 = vpop.f32.mrb[14].mxu0 }
 0x11c   : > { %v6949_v63 = vadd.f32 %v4947_v21, %v4946_v52  ;;  %v4949_v24 = vpop.f32.mrb[14].mxu1  ;;  %v4878_v0 = vpop.f32.mrb[15].mxu0 }
 0x11d   : > { %v4950_v27 = vpop.f32.mrb[15].mxu1  ;;  %v6951_v16 = vadd.f32 %v4878_v0, %v4877_v30  ;;  %v7727_v0 = vld [vmem:[#allocation5_spill] sm:$0xff] }
 0x11e   : > { %v6953_v62 = vadd.f32 %v4950_v27, %v4949_v24  ;;  %5337 = vmatmul.mubr.msk.bf16.gmra.mrb[120].mxu0 %vm7724_vm4, %v6620_v32  ;;  %v7726_v24 = vld [vmem:[#allocation14_spill] sm:$0xff] }
 0x11f   : > { %4782 = vmatmul.mubr.msk.bf16.gmra.mrb[120].mxu1 %vm7723_vm13, %v5678_v14  ;;  %5340 = vmatprep.mubr.msk.bf16.mxu0 %vm7683_vm9, %v6665_v51  ;;  %v3064_v14 = vadd.f32 %v6895_v61, %v6968_v35  ;;  %v3067_v51 = vadd.f32 %v6899_v9, %v6968_v35  ;;  %vm7725_vm9 = vnez %v7641_v56  ;;  %v3072_v56 = vadd.f32 %v6911_v42, %v6968_v35 }
 0x120   : > { %3632 = vmatprep.mubr.bf16.mxu1 %v7709_v20 }
 0x121   : > { %v4880_v13 = vpop.f32.mrb[16].mxu0 }
 0x122   : > { %v4968_v57 = vpop.f32.mrb[16].mxu1  ;;  %v4881_v19 = vpop.f32.mrb[17].mxu0 }
 0x123   : > { %v4969_v44 = vpop.f32.mrb[17].mxu1  ;;  %v6972_v15 = vadd.f32 %v4881_v19, %v4880_v13  ;;  %v4883_v20 = vpop.f32.mrb[18].mxu0  ;;  %v3080_v19 = vadd.f32 %v6929_v7, %v6968_v35 }
 0x124   : > { %v4970_v32 = vadd.f32 %v4969_v44, %v4968_v57  ;;  %v4971_v2 = vpop.f32.mrb[18].mxu1  ;;  %v4884_v10 = vpop.f32.mrb[19].mxu0 }
 0x125   : > { %v4972_v25 = vpop.f32.mrb[19].mxu1  ;;  %v6978_v54 = vadd.f32 %v4884_v10, %v4883_v20  ;;  %v7729_v10 = vld [vmem:[#allocation19_spill] sm:$0xff] }
 0x126   : > { %v6976_v43 = vadd.f32 %v4970_v32, %v3064_v14  ;;  %v4973_v1 = vadd.f32 %v4972_v25, %v4971_v2  ;;  %5341 = vmatmul.mubr.msk.bf16.gmra.mrb[124].mxu0 %vm6628_vm1, %v6490_v18  ;;  %vm7728_vm1 = vnez %v7727_v0  ;;  %v7730_v25 = vld [vmem:[#allocation8_spill] sm:$0xff] }
 0x127   : > { %4785 = vmatmul.mubr.msk.bf16.gmra.mrb[124].mxu1 %vm7725_vm9, %v7664_v4  ;;  %5344 = vmatprep.mubr.msk.bf16.mxu0 %vm6668_vm2, %v6517_v58  ;;  %vm7731_vm2 = vnez %v7730_v25 }
 0x128   : > { %v6986_v61 = vadd.f32 %v4973_v1, %v3067_v51  ;;  %3640 = vmatprep.mubr.bf16.mxu1 %v7712_v38  ;;  %v3075_v38 = vadd.f32 %v6915_v11, %v6968_v35 }
 0x129   : > { %v4886_v9 = vpop.f32.mrb[20].mxu0 }
 0x12a   : > { %v4974_v17 = vpop.f32.mrb[20].mxu1  ;;  %v4887_v40 = vpop.f32.mrb[21].mxu0 }
 0x12b   : > { %v4975_v47 = vpop.f32.mrb[21].mxu1  ;;  %v6994_v4 = vadd.f32 %v4887_v40, %v4886_v9  ;;  %v4889_v29 = vpop.f32.mrb[22].mxu0 }
 0x12c   : > { %v4976_v52 = vadd.f32 %v4975_v47, %v4974_v17  ;;  %v4977_v18 = vpop.f32.mrb[22].mxu1  ;;  %v4890_v31 = vpop.f32.mrb[23].mxu0  ;;  %v3088_v17 = vadd.f32 %v6947_v22, %v6968_v35 }
 0x12d   : > { %v4978_v21 = vpop.f32.mrb[23].mxu1  ;;  %v7000_v58 = vadd.f32 %v4890_v31, %v4889_v29  ;;  %v7733_v31 = vmov 0.0|0.0  }
 0x12e   : > { %v6998_v30 = vadd.f32 %v4976_v52, %v3072_v56  ;;  %v4979_v55 = vadd.f32 %v4978_v21, %v4977_v18  ;;  %5345 = vmatmul.mubr.msk.bf16.gmra.mrb[128].mxu0 %vm6691_vm0, %v6536_v50 }
 0x12f   : > { %4788 = vmatmul.mubr.msk.bf16.gmra.mrb[128].mxu1 %vm7728_vm1, %v7726_v24  ;;  %5348 = vmatprep.mubr.msk.bf16.mxu0 %vm6713_vm10, %v6762_v6  ;;  %v3096_v24 = vadd.f32 %v6972_v15, %v6968_v35 }
 0x130   : > { %v7008_v42 = vadd.f32 %v4979_v55, %v3075_v38  ;;  %3648 = vmatprep.mubr.bf16.mxu1 %v7714_v53  ;;  %v3083_v53 = vadd.f32 %v6933_v26, %v6968_v35 }
 0x131   : > { %v4892_v11 = vpop.f32.mrb[24].mxu0 }
 0x132   : > { %v4980_v27 = vpop.f32.mrb[24].mxu1  ;;  %v4893_v13 = vpop.f32.mrb[25].mxu0 }
 0x133   : > { %v4981_v57 = vpop.f32.mrb[25].mxu1  ;;  %v7016_v44 = vadd.f32 %v4893_v13, %v4892_v11  ;;  %v4895_v28 = vpop.f32.mrb[26].mxu0  ;;  %v3099_v13 = vadd.f32 %v6978_v54, %v6968_v35 }
 0x134   : > { %v4982_v14 = vadd.f32 %v4981_v57, %v4980_v27  ;;  %v4983_v50 = vpop.f32.mrb[26].mxu1  ;;  %v4896_v32 = vpop.f32.mrb[27].mxu0 }
 0x135   : > { %v4984_v20 = vpop.f32.mrb[27].mxu1  ;;  %v7022_v8 = vadd.f32 %v4896_v32, %v4895_v28  ;;  %v3104_v32 = vadd.f32 %v6994_v4, %v6968_v35 }
 0x136   : > { %v7020_v2 = vadd.f32 %v4982_v14, %v3080_v19  ;;  %v4985_v6 = vadd.f32 %v4984_v20, %v4983_v50  ;;  %5349 = vmatmul.mubr.msk.bf16.gmra.mrb[132].mxu0 %vm6735_vm8, %v6573_v36 }
 0x137   : > { %4791 = vmatmul.mubr.msk.bf16.gmra.mrb[132].mxu1 %vm7731_vm2, %v7729_v10  ;;  %5352 = vmatprep.mubr.msk.bf16.mxu0 %vm6765_vm5, %v6589_v33 }
 0x138   : > { %v7030_v7 = vadd.f32 %v4985_v6, %v3083_v53  ;;  %3656 = vmatprep.mubr.bf16.mxu1 %v6893_v37  ;;  %v3091_v37 = vadd.f32 %v6951_v16, %v6968_v35 }
 0x139   : > { %v4898_v26 = vpop.f32.mrb[28].mxu0 }
 0x13a   : > { %v4986_v51 = vpop.f32.mrb[28].mxu1  ;;  %v4899_v1 = vpop.f32.mrb[29].mxu0 }
 0x13b   : > { %v4987_v9 = vpop.f32.mrb[29].mxu1  ;;  %v7038_v40 = vadd.f32 %v4899_v1, %v4898_v26  ;;  %v4901_v45 = vpop.f32.mrb[30].mxu0  ;;  %v3107_v26 = vadd.f32 %v7000_v58, %v6968_v35 }
 0x13c   : > { %v4988_v47 = vadd.f32 %v4987_v9, %v4986_v51  ;;  %v4989_v36 = vpop.f32.mrb[30].mxu1  ;;  %v4902_v56 = vpop.f32.mrb[31].mxu0 }
 0x13d   : > { %v4990_v52 = vpop.f32.mrb[31].mxu1  ;;  %v7044_v33 = vadd.f32 %v4902_v56, %v4901_v45  ;;  %v3112_v56 = vadd.f32 %v7016_v44, %v6968_v35 }
 0x13e   : > { %v7042_v29 = vadd.f32 %v4988_v47, %v3088_v17  ;;  %v4991_v48 = vadd.f32 %v4990_v52, %v4989_v36  ;;  %5353 = vmatmul.mubr.msk.bf16.gmra.mrb[136].mxu0 %vm6781_vm12, %v6642_v60 }
 0x13f   : > { %4794 = vmatmul.mubr.msk.bf16.gmra.mrb[136].mxu1 %vm7682_vm15, %v6810_v39  ;;  %5356 = vmatprep.mubr.msk.bf16.mxu0 %vm6806_vm3, %v6644_v12 }
 0x140   : > { %v7052_v22 = vadd.f32 %v4991_v48, %v3091_v37  ;;  %3664 = vmatprep.mubr.bf16.mxu1 %v7733_v31 }
 0x141   : > { %v4904_v16 = vpop.f32.mrb[32].mxu0 }
 0x142   : > { %v4992_v21 = vpop.f32.mrb[32].mxu1  ;;  %v4905_v38 = vpop.f32.mrb[33].mxu0 }
 0x143   : > { %v4993_v55 = vpop.f32.mrb[33].mxu1  ;;  %v7060_v39 = vadd.f32 %v4905_v38, %v4904_v16  ;;  %v4907_v59 = vpop.f32.mrb[34].mxu0  ;;  %v3115_v16 = vadd.f32 %v7022_v8, %v6968_v35 }
 0x144   : > { %v4994_v0 = vadd.f32 %v4993_v55, %v4992_v21  ;;  %v4995_v60 = vpop.f32.mrb[34].mxu1  ;;  %v4908_v11 = vpop.f32.mrb[35].mxu0 }
 0x145   : > { %v4996_v27 = vpop.f32.mrb[35].mxu1  ;;  %v4909_v12 = vadd.f32 %v4908_v11, %v4907_v59  ;;  %v3120_v11 = vadd.f32 %v7038_v40, %v6968_v35 }
 0x146   : > { %v7064_v57 = vadd.f32 %v4994_v0, %v3096_v24  ;;  %v4997_v5 = vadd.f32 %v4996_v27, %v4995_v60  ;;  %5357 = vmatmul.mubr.bf16.gmra.mrb[140].mxu0 %v7733_v31 }
 0x147   : > { %3665 = vmatmul.mubr.bf16.gmra.mrb[140].mxu1 %v7733_v31 }
 0x148   : > { %v7068_v19 = vadd.f32 %v4997_v5, %v3099_v13 }
 0x149   : > { %v4910_v15 = vpop.f32.mrb[36].mxu0 }
 0x14a   : > { %v4998_v14 = vpop.f32.mrb[36].mxu1  ;;  %v4911_v28 = vpop.f32.mrb[37].mxu0 }
 0x14b   : > { %v4999_v50 = vpop.f32.mrb[37].mxu1  ;;  %v7072_v20 = vadd.f32 %v4911_v28, %v4910_v15  ;;  %v4913_v53 = vpop.f32.mrb[38].mxu0  ;;  %v3123_v28 = vadd.f32 %v7044_v33, %v6968_v35  ;;  %v3131_v33 = vadd.f32 %v4909_v12, %v6968_v35 }
 0x14c   : > { %v5000_v54 = vadd.f32 %v4999_v50, %v4998_v14  ;;  %v5001_v6 = vpop.f32.mrb[38].mxu1  ;;  %v4914_v10 = vpop.f32.mrb[39].mxu0 }
 0x14d   : > { %v5002_v25 = vpop.f32.mrb[39].mxu1  ;;  %v4915_v1 = vadd.f32 %v4914_v10, %v4913_v53  ;;  %v3136_v12 = vadd.f32 %v7072_v20, %v6968_v35 }
 0x14e   : > { %v7076_v51 = vadd.f32 %v5000_v54, %v3104_v32  ;;  %v5003_v9 = vadd.f32 %v5002_v25, %v5001_v6 }
 0x150   : > { %v7078_v17 = vadd.f32 %v5003_v9, %v3107_v26  ;;  %v3128_v26 = vadd.f32 %v7060_v39, %v6968_v35 }
 0x151   : > { %v4916_v47 = vpop.f32.mrb[40].mxu0 }
 0x152   : > { %v5004_v45 = vpop.f32.mrb[40].mxu1  ;;  %v4917_v36 = vpop.f32.mrb[41].mxu0 }
 0x153   : > { %v5005_v4 = vpop.f32.mrb[41].mxu1  ;;  %v7082_v52 = vadd.f32 %v4917_v36, %v4916_v47  ;;  %v4919_v48 = vpop.f32.mrb[42].mxu0 }
 0x154   : > { %v5006_v37 = vadd.f32 %v5005_v4, %v5004_v45  ;;  %v5007_v18 = vpop.f32.mrb[42].mxu1  ;;  %v4920_v31 = vpop.f32.mrb[43].mxu0 }
 0x155   : > { %v5008_v58 = vpop.f32.mrb[43].mxu1  ;;  %v7088_v38 = vadd.f32 %v4920_v31, %v4919_v48 }
 0x156   : > { %v7086_v21 = vadd.f32 %v5006_v37, %v3112_v56  ;;  %v5009_v55 = vadd.f32 %v5008_v58, %v5007_v18 }
 0x158   : > { %v7090_v24 = vadd.f32 %v5009_v55, %v3115_v16 }
 0x159   : > { %v4922_v0 = vpop.f32.mrb[44].mxu0 }
 0x15a   : > { %v5010_v59 = vpop.f32.mrb[44].mxu1  ;;  %v4923_v44 = vpop.f32.mrb[45].mxu0 }
 0x15b   : > { %v5011_v60 = vpop.f32.mrb[45].mxu1  ;;  %v7094_v27 = vadd.f32 %v4923_v44, %v4922_v0  ;;  %v4925_v5 = vpop.f32.mrb[46].mxu0 }
 0x15c   : > { %v5012_v13 = vadd.f32 %v5011_v60, %v5010_v59  ;;  %v5013_v15 = vpop.f32.mrb[46].mxu1  ;;  %v4926_v8 = vpop.f32.mrb[47].mxu0 }
 0x15d   : > { %v5014_v14 = vpop.f32.mrb[47].mxu1  ;;  %v7100_v32 = vadd.f32 %v4926_v8, %v4925_v5 }
 0x15e   : > { %v7098_v50 = vadd.f32 %v5012_v13, %v3120_v11  ;;  %v5015_v54 = vadd.f32 %v5014_v14, %v5013_v15 }
 0x160   : > { %v7102_v53 = vadd.f32 %v5015_v54, %v3123_v28 }
 0x161   : > { %v5080_v10 = vpop.f32.mrb[48].mxu0 }
 0x162   : > { %v5016_v6 = vpop.f32.mrb[48].mxu1  ;;  %v5081_v25 = vpop.f32.mrb[49].mxu0 }
 0x163   : > { %v5017_v40 = vpop.f32.mrb[49].mxu1  ;;  %v5082_v47 = vadd.f32 %v5081_v25, %v5080_v10  ;;  %v5083_v36 = vpop.f32.mrb[50].mxu0 }
 0x164   : > { %v5018_v9 = vadd.f32 %v5017_v40, %v5016_v6  ;;  %v5019_v45 = vpop.f32.mrb[50].mxu1  ;;  %v5084_v56 = vpop.f32.mrb[51].mxu0 }
 0x165   : > { %v5020_v4 = vpop.f32.mrb[51].mxu1  ;;  %v7110_v48 = vadd.f32 %v5082_v47, %v6976_v43  ;;  %v5085_v31 = vadd.f32 %v5084_v56, %v5083_v36  ;;  %v3139_v43 = vadd.f32 %v4915_v1, %v6968_v35  ;;  %v3144_v1 = vadd.f32 %v7082_v52, %v6968_v35 }
 0x166   : > { %v7107_v37 = vadd.f32 %v5018_v9, %v3128_v26  ;;  %v5021_v18 = vadd.f32 %v5020_v4, %v5019_v45 }
 0x167   : > { %v7115_v16 = vadd.f32 %v5085_v31, %v6986_v61 }
 0x168   : > { %v7112_v58 = vadd.f32 %v5021_v18, %v3131_v33 }
 0x169   : > { %v5086_v55 = vpop.f32.mrb[52].mxu0 }
 0x16a   : > { %v5022_v39 = vpop.f32.mrb[52].mxu1  ;;  %v5087_v59 = vpop.f32.mrb[53].mxu0 }
 0x16b   : > { %v5023_v0 = vpop.f32.mrb[53].mxu1  ;;  %v5088_v60 = vadd.f32 %v5087_v59, %v5086_v55  ;;  %v5089_v13 = vpop.f32.mrb[54].mxu0 }
 0x16c   : > { %v5024_v44 = vadd.f32 %v5023_v0, %v5022_v39  ;;  %v5025_v11 = vpop.f32.mrb[54].mxu1  ;;  %v5090_v15 = vpop.f32.mrb[55].mxu0 }
 0x16d   : > { %v5026_v5 = vpop.f32.mrb[55].mxu1  ;;  %v7123_v61 = vadd.f32 %v5088_v60, %v6998_v30  ;;  %v5091_v28 = vadd.f32 %v5090_v15, %v5089_v13  ;;  %v3147_v30 = vadd.f32 %v7088_v38, %v6968_v35  ;;  %v3152_v38 = vadd.f32 %v7094_v27, %v6968_v35 }
 0x16e   : > { %v7120_v8 = vadd.f32 %v5024_v44, %v3136_v12  ;;  %v5027_v14 = vadd.f32 %v5026_v5, %v5025_v11 }
 0x16f   : > { %v7128_v6 = vadd.f32 %v5091_v28, %v7008_v42 }
 0x170   : > { %v7125_v54 = vadd.f32 %v5027_v14, %v3139_v43 }
 0x171   : > { %v5092_v10 = vpop.f32.mrb[56].mxu0 }
 0x172   : > { %v5028_v20 = vpop.f32.mrb[56].mxu1  ;;  %v5093_v25 = vpop.f32.mrb[57].mxu0 }
 0x173   : > { %v5029_v40 = vpop.f32.mrb[57].mxu1  ;;  %v5094_v9 = vadd.f32 %v5093_v25, %v5092_v10  ;;  %v5095_v45 = vpop.f32.mrb[58].mxu0 }
 0x174   : > { %v5030_v26 = vadd.f32 %v5029_v40, %v5028_v20  ;;  %v5031_v47 = vpop.f32.mrb[58].mxu1  ;;  %v5096_v33 = vpop.f32.mrb[59].mxu0 }
 0x175   : > { %v5032_v36 = vpop.f32.mrb[59].mxu1  ;;  %v7137_v42 = vadd.f32 %v5094_v9, %v7020_v2  ;;  %v5097_v18 = vadd.f32 %v5096_v33, %v5095_v45  ;;  %v3155_v2 = vadd.f32 %v7100_v32, %v6968_v35  ;;  %v3160_v32 = vadd.f32 %v6897_v46, %v6968_v35 }
 0x176   : > { %v7134_v4 = vadd.f32 %v5030_v26, %v3144_v1  ;;  %v5033_v56 = vadd.f32 %v5032_v36, %v5031_v47 }
 0x177   : > { %v7142_v52 = vadd.f32 %v5097_v18, %v7030_v7 }
 0x178   : > { %v7139_v31 = vadd.f32 %v5033_v56, %v3147_v30 }
 0x179   : > { %v5098_v55 = vpop.f32.mrb[60].mxu0 }
 0x17a   : > { %v5034_v39 = vpop.f32.mrb[60].mxu1  ;;  %v5099_v59 = vpop.f32.mrb[61].mxu0 }
 0x17b   : > { %v5035_v0 = vpop.f32.mrb[61].mxu1  ;;  %v5100_v44 = vadd.f32 %v5099_v59, %v5098_v55  ;;  %v5101_v11 = vpop.f32.mrb[62].mxu0 }
 0x17c   : > { %v5036_v12 = vadd.f32 %v5035_v0, %v5034_v39  ;;  %v5037_v60 = vpop.f32.mrb[62].mxu1  ;;  %v5102_v43 = vpop.f32.mrb[63].mxu0 }
 0x17d   : > { %v5038_v13 = vpop.f32.mrb[63].mxu1  ;;  %v7151_v7 = vadd.f32 %v5100_v44, %v7042_v29  ;;  %v5103_v14 = vadd.f32 %v5102_v43, %v5101_v11  ;;  %v3163_v29 = vadd.f32 %v6901_v23, %v6968_v35  ;;  %v3168_v23 = vadd.f32 %v6913_v3, %v6968_v35 }
 0x17e   : > { %v7148_v5 = vadd.f32 %v5036_v12, %v3152_v38  ;;  %v5039_v15 = vadd.f32 %v5038_v13, %v5037_v60 }
 0x17f   : > { %v7156_v27 = vadd.f32 %v5103_v14, %v7052_v22 }
 0x180   : > { %v7153_v28 = vadd.f32 %v5039_v15, %v3155_v2 }
 0x181   : > { %v5104_v10 = vpop.f32.mrb[64].mxu0 }
 0x182   : > { %v5040_v20 = vpop.f32.mrb[64].mxu1  ;;  %v5105_v25 = vpop.f32.mrb[65].mxu0 }
 0x183   : > { %v5041_v40 = vpop.f32.mrb[65].mxu1  ;;  %v5106_v26 = vadd.f32 %v5105_v25, %v5104_v10  ;;  %v5107_v47 = vpop.f32.mrb[66].mxu0 }
 0x184   : > { %v5042_v1 = vadd.f32 %v5041_v40, %v5040_v20  ;;  %v5043_v9 = vpop.f32.mrb[66].mxu1  ;;  %v5108_v30 = vpop.f32.mrb[67].mxu0 }
 0x185   : > { %v5044_v45 = vpop.f32.mrb[67].mxu1  ;;  %v7165_v22 = vadd.f32 %v5106_v26, %v7064_v57  ;;  %v5109_v56 = vadd.f32 %v5108_v30, %v5107_v47  ;;  %v3171_v57 = vadd.f32 %v6917_v49, %v6968_v35  ;;  %v3176_v49 = vadd.f32 %v6931_v34, %v6968_v35 }
 0x186   : > { %v7162_v36 = vadd.f32 %v5042_v1, %v3160_v32  ;;  %v5045_v33 = vadd.f32 %v5044_v45, %v5043_v9 }
 0x187   : > { %v7170_v46 = vadd.f32 %v5109_v56, %v7068_v19 }
 0x188   : > { %v7167_v18 = vadd.f32 %v5045_v33, %v3163_v29 }
 0x189   : > { %v5110_v55 = vpop.f32.mrb[68].mxu0 }
 0x18a   : > { %v5046_v39 = vpop.f32.mrb[68].mxu1  ;;  %v5111_v59 = vpop.f32.mrb[69].mxu0 }
 0x18b   : > { %v5047_v0 = vpop.f32.mrb[69].mxu1  ;;  %v5112_v12 = vadd.f32 %v5111_v59, %v5110_v55  ;;  %v5113_v60 = vpop.f32.mrb[70].mxu0 }
 0x18c   : > { %v5048_v38 = vadd.f32 %v5047_v0, %v5046_v39  ;;  %v5049_v44 = vpop.f32.mrb[70].mxu1  ;;  %v5114_v2 = vpop.f32.mrb[71].mxu0 }
 0x18d   : > { %v5050_v11 = vpop.f32.mrb[71].mxu1  ;;  %v7179_v19 = vadd.f32 %v5112_v12, %v7076_v51  ;;  %v5115_v15 = vadd.f32 %v5114_v2, %v5113_v60  ;;  %v3179_v51 = vadd.f32 %v6935_v41, %v6968_v35  ;;  %v3184_v41 = vadd.f32 %v6949_v63, %v6968_v35 }
 0x18e   : > { %v7176_v13 = vadd.f32 %v5048_v38, %v3168_v23  ;;  %v5051_v43 = vadd.f32 %v5050_v11, %v5049_v44 }
 0x18f   : > { %v7184_v3 = vadd.f32 %v5115_v15, %v7078_v17 }
 0x190   : > { %v7181_v14 = vadd.f32 %v5051_v43, %v3171_v57 }
 0x191   : > { %v5116_v10 = vpop.f32.mrb[72].mxu0 }
 0x192   : > { %v5052_v20 = vpop.f32.mrb[72].mxu1  ;;  %v5117_v25 = vpop.f32.mrb[73].mxu0 }
 0x193   : > { %v5053_v40 = vpop.f32.mrb[73].mxu1  ;;  %v5118_v1 = vadd.f32 %v5117_v25, %v5116_v10  ;;  %v5119_v9 = vpop.f32.mrb[74].mxu0 }
 0x194   : > { %v5054_v32 = vadd.f32 %v5053_v40, %v5052_v20  ;;  %v5055_v26 = vpop.f32.mrb[74].mxu1  ;;  %v5120_v29 = vpop.f32.mrb[75].mxu0 }
 0x195   : > { %v5056_v47 = vpop.f32.mrb[75].mxu1  ;;  %v7193_v17 = vadd.f32 %v5118_v1, %v7086_v21  ;;  %v5121_v33 = vadd.f32 %v5120_v29, %v5119_v9  ;;  %v3187_v21 = vadd.f32 %v6953_v62, %v6968_v35 }
 0x196   : > { %v7190_v45 = vadd.f32 %v5054_v32, %v3176_v49  ;;  %v5057_v30 = vadd.f32 %v5056_v47, %v5055_v26 }
 0x197   : > { %v7198_v34 = vadd.f32 %v5121_v33, %v7090_v24 }
 0x198   : > { %v7195_v56 = vadd.f32 %v5057_v30, %v3179_v51 }
 0x199   : > { %v5122_v55 = vpop.f32.mrb[76].mxu0 }
 0x19a   : > { %v5058_v39 = vpop.f32.mrb[76].mxu1  ;;  %v5123_v59 = vpop.f32.mrb[77].mxu0 }
 0x19b   : > { %v5059_v0 = vpop.f32.mrb[77].mxu1  ;;  %v5124_v38 = vadd.f32 %v5123_v59, %v5122_v55  ;;  %v5125_v44 = vpop.f32.mrb[78].mxu0 }
 0x19c   : > { %v5060_v23 = vadd.f32 %v5059_v0, %v5058_v39  ;;  %v5061_v12 = vpop.f32.mrb[78].mxu1  ;;  %v5126_v57 = vpop.f32.mrb[79].mxu0 }
 0x19d   : > { %v5062_v60 = vpop.f32.mrb[79].mxu1  ;;  %v7207_v24 = vadd.f32 %v5124_v38, %v7098_v50  ;;  %v5127_v43 = vadd.f32 %v5126_v57, %v5125_v44 }
 0x19e   : > { %v7204_v11 = vadd.f32 %v5060_v23, %v3184_v41  ;;  %v5063_v2 = vadd.f32 %v5062_v60, %v5061_v12 }
 0x19f   : > { %v7212_v63 = vadd.f32 %v5127_v43, %v7102_v53 }
 0x1a0   : > { %v7209_v15 = vadd.f32 %v5063_v2, %v3187_v21 }
 0x1a1   : > { %v5128_v20 = vpop.f32.mrb[80].mxu0 }
 0x1a2   : > { %v5192_v10 = vpop.f32.mrb[80].mxu1  ;;  %v5129_v40 = vpop.f32.mrb[81].mxu0 }
 0x1a3   : > { %v5193_v25 = vpop.f32.mrb[81].mxu1  ;;  %v5130_v49 = vadd.f32 %v5129_v40, %v5128_v20  ;;  %v5131_v35 = vpop.f32.mrb[82].mxu0 }
 0x1a4   : > { %v5194_v62 = vadd.f32 %v5193_v25, %v5192_v10  ;;  %v5195_v32 = vpop.f32.mrb[82].mxu1  ;;  %v5132_v1 = vpop.f32.mrb[83].mxu0 }
 0x1a5   : > { %v5196_v26 = vpop.f32.mrb[83].mxu1  ;;  %v7215_v50 = vadd.f32 %v5130_v49, %v7107_v37  ;;  %v5133_v9 = vadd.f32 %v5132_v1, %v5131_v35 }
 0x1a6   : > { %v5197_v51 = vadd.f32 %v5196_v26, %v5195_v32  ;;  %v7218_v47 = vadd.f32 %v5194_v62, %v7110_v48 }
 0x1a7   : > { %v7221_v53 = vadd.f32 %v5133_v9, %v7112_v58 }
 0x1a8   : > { %v7224_v29 = vadd.f32 %v5197_v51, %v7115_v16 }
 0x1a9   : > { %v5134_v30 = vpop.f32.mrb[84].mxu0 }
 0x1aa   : > { %v5198_v33 = vpop.f32.mrb[84].mxu1  ;;  %v5135_v39 = vpop.f32.mrb[85].mxu0 }
 0x1ab   : > { %v5199_v55 = vpop.f32.mrb[85].mxu1  ;;  %v5136_v0 = vadd.f32 %v5135_v39, %v5134_v30  ;;  %v5137_v41 = vpop.f32.mrb[86].mxu0 }
 0x1ac   : > { %v5200_v59 = vadd.f32 %v5199_v55, %v5198_v33  ;;  %v5201_v37 = vpop.f32.mrb[86].mxu1  ;;  %v5138_v23 = vpop.f32.mrb[87].mxu0 }
 0x1ad   : > { %v5202_v38 = vpop.f32.mrb[87].mxu1  ;;  %v7227_v12 = vadd.f32 %v5136_v0, %v7120_v8  ;;  %v5139_v48 = vadd.f32 %v5138_v23, %v5137_v41 }
 0x1ae   : > { %v5203_v44 = vadd.f32 %v5202_v38, %v5201_v37  ;;  %v7230_v58 = vadd.f32 %v5200_v59, %v7123_v61 }
 0x1af   : > { %v7233_v16 = vadd.f32 %v5139_v48, %v7125_v54 }
 0x1b0   : > { %v7236_v21 = vadd.f32 %v5203_v44, %v7128_v6 }
 0x1b1   : > { %v5140_v60 = vpop.f32.mrb[88].mxu0 }
 0x1b2   : > { %v5204_v57 = vpop.f32.mrb[88].mxu1  ;;  %v5141_v2 = vpop.f32.mrb[89].mxu0 }
 0x1b3   : > { %v5205_v43 = vpop.f32.mrb[89].mxu1  ;;  %v5142_v20 = vadd.f32 %v5141_v2, %v5140_v60  ;;  %v5143_v40 = vpop.f32.mrb[90].mxu0 }
 0x1b4   : > { %v5206_v10 = vadd.f32 %v5205_v43, %v5204_v57  ;;  %v5207_v8 = vpop.f32.mrb[90].mxu1  ;;  %v5144_v25 = vpop.f32.mrb[91].mxu0 }
 0x1b5   : > { %v5208_v49 = vpop.f32.mrb[91].mxu1  ;;  %v7239_v62 = vadd.f32 %v5142_v20, %v7134_v4  ;;  %v5145_v61 = vadd.f32 %v5144_v25, %v5143_v40 }
 0x1b6   : > { %v5209_v35 = vadd.f32 %v5208_v49, %v5207_v8  ;;  %v7242_v54 = vadd.f32 %v5206_v10, %v7137_v42 }
 0x1b7   : > { %v7245_v6 = vadd.f32 %v5145_v61, %v7139_v31 }
 0x1b8   : > { %v7248_v32 = vadd.f32 %v5209_v35, %v7142_v52 }
 0x1b9   : > { %v5146_v1 = vpop.f32.mrb[92].mxu0 }
 0x1ba   : > { %v5210_v26 = vpop.f32.mrb[92].mxu1  ;;  %v5147_v9 = vpop.f32.mrb[93].mxu0 }
 0x1bb   : > { %v5211_v51 = vpop.f32.mrb[93].mxu1  ;;  %v5148_v30 = vadd.f32 %v5147_v9, %v5146_v1  ;;  %v5149_v39 = vpop.f32.mrb[94].mxu0 }
 0x1bc   : > { %v5212_v33 = vadd.f32 %v5211_v51, %v5210_v26  ;;  %v5213_v4 = vpop.f32.mrb[94].mxu1  ;;  %v5150_v55 = vpop.f32.mrb[95].mxu0 }
 0x1bd   : > { %v5214_v0 = vpop.f32.mrb[95].mxu1  ;;  %v7251_v59 = vadd.f32 %v5148_v30, %v7148_v5  ;;  %v5151_v42 = vadd.f32 %v5150_v55, %v5149_v39 }
 0x1be   : > { %v5215_v41 = vadd.f32 %v5214_v0, %v5213_v4  ;;  %v7254_v31 = vadd.f32 %v5212_v33, %v7151_v7 }
 0x1bf   : > { %v7257_v52 = vadd.f32 %v5151_v42, %v7153_v28 }
 0x1c0   : > { %v7260_v37 = vadd.f32 %v5215_v41, %v7156_v27 }
 0x1c1   : > { %v5152_v23 = vpop.f32.mrb[96].mxu0 }
 0x1c2   : > { %v5216_v38 = vpop.f32.mrb[96].mxu1  ;;  %v5153_v48 = vpop.f32.mrb[97].mxu0 }
 0x1c3   : > { %v5217_v44 = vpop.f32.mrb[97].mxu1  ;;  %v5154_v60 = vadd.f32 %v5153_v48, %v5152_v23  ;;  %v5155_v2 = vpop.f32.mrb[98].mxu0 }
 0x1c4   : > { %v5218_v57 = vadd.f32 %v5217_v44, %v5216_v38  ;;  %v5219_v5 = vpop.f32.mrb[98].mxu1  ;;  %v5156_v43 = vpop.f32.mrb[99].mxu0 }
 0x1c5   : > { %v5220_v20 = vpop.f32.mrb[99].mxu1  ;;  %v7263_v10 = vadd.f32 %v5154_v60, %v7162_v36  ;;  %v5157_v7 = vadd.f32 %v5156_v43, %v5155_v2 }
 0x1c6   : > { %v5221_v40 = vadd.f32 %v5220_v20, %v5219_v5  ;;  %v7266_v28 = vadd.f32 %v5218_v57, %v7165_v22 }
 0x1c7   : > { %v7269_v27 = vadd.f32 %v5157_v7, %v7167_v18 }
 0x1c8   : > { %v7272_v8 = vadd.f32 %v5221_v40, %v7170_v46 }
 0x1c9   : > { %v5158_v25 = vpop.f32.mrb[100].mxu0 }
 0x1ca   : > { %v5222_v49 = vpop.f32.mrb[100].mxu1  ;;  %v5159_v61 = vpop.f32.mrb[101].mxu0 }
 0x1cb   : > { %v5223_v35 = vpop.f32.mrb[101].mxu1  ;;  %v5160_v1 = vadd.f32 %v5159_v61, %v5158_v25  ;;  %v5161_v9 = vpop.f32.mrb[102].mxu0 }
 0x1cc   : > { %v5224_v26 = vadd.f32 %v5223_v35, %v5222_v49  ;;  %v5225_v36 = vpop.f32.mrb[102].mxu1  ;;  %v5162_v51 = vpop.f32.mrb[103].mxu0 }
 0x1cd   : > { %v5226_v30 = vpop.f32.mrb[103].mxu1  ;;  %v7275_v33 = vadd.f32 %v5160_v1, %v7176_v13  ;;  %v5163_v22 = vadd.f32 %v5162_v51, %v5161_v9 }
 0x1ce   : > { %v5227_v39 = vadd.f32 %v5226_v30, %v5225_v36  ;;  %v7278_v18 = vadd.f32 %v5224_v26, %v7179_v19 }
 0x1cf   : > { %v7281_v46 = vadd.f32 %v5163_v22, %v7181_v14 }
 0x1d0   : > { %v7284_v4 = vadd.f32 %v5227_v39, %v7184_v3 }
 0x1d1   : > { %v5164_v55 = vpop.f32.mrb[104].mxu0 }
 0x1d2   : > { %v5228_v0 = vpop.f32.mrb[104].mxu1  ;;  %v5165_v42 = vpop.f32.mrb[105].mxu0 }
 0x1d3   : > { %v5229_v41 = vpop.f32.mrb[105].mxu1  ;;  %v5166_v23 = vadd.f32 %v5165_v42, %v5164_v55  ;;  %v5167_v48 = vpop.f32.mrb[106].mxu0 }
 0x1d4   : > { %v5230_v38 = vadd.f32 %v5229_v41, %v5228_v0  ;;  %v5231_v13 = vpop.f32.mrb[106].mxu1  ;;  %v5168_v44 = vpop.f32.mrb[107].mxu0 }
 0x1d5   : > { %v5232_v60 = vpop.f32.mrb[107].mxu1  ;;  %v7287_v57 = vadd.f32 %v5166_v23, %v7190_v45  ;;  %v5169_v19 = vadd.f32 %v5168_v44, %v5167_v48 }
 0x1d6   : > { %v5233_v2 = vadd.f32 %v5232_v60, %v5231_v13  ;;  %v7290_v14 = vadd.f32 %v5230_v38, %v7193_v17 }
 0x1d7   : > { %v7293_v3 = vadd.f32 %v5169_v19, %v7195_v56 }
 0x1d8   : > { %v7296_v5 = vadd.f32 %v5233_v2, %v7198_v34 }
 0x1d9   : > { %v5170_v43 = vpop.f32.mrb[108].mxu0 }
 0x1da   : > { %v5234_v20 = vpop.f32.mrb[108].mxu1  ;;  %v5171_v7 = vpop.f32.mrb[109].mxu0 }
 0x1db   : > { %v5235_v40 = vpop.f32.mrb[109].mxu1  ;;  %v5172_v25 = vadd.f32 %v5171_v7, %v5170_v43  ;;  %v5173_v61 = vpop.f32.mrb[110].mxu0 }
 0x1dc   : > { %v5236_v49 = vadd.f32 %v5235_v40, %v5234_v20  ;;  %v5237_v45 = vpop.f32.mrb[110].mxu1  ;;  %v5174_v35 = vpop.f32.mrb[111].mxu0 }
 0x1dd   : > { %v5238_v1 = vpop.f32.mrb[111].mxu1  ;;  %v7299_v26 = vadd.f32 %v5172_v25, %v7204_v11  ;;  %v5175_v17 = vadd.f32 %v5174_v35, %v5173_v61 }
 0x1de   : > { %v5239_v9 = vadd.f32 %v5238_v1, %v5237_v45  ;;  %v7302_v56 = vadd.f32 %v5236_v49, %v7207_v24 }
 0x1df   : > { %v7305_v34 = vadd.f32 %v5175_v17, %v7209_v15 }
 0x1e0   : > { %v7308_v36 = vadd.f32 %v5239_v9, %v7212_v63 }
 0x1e1   : > { %v5330_v30 = vpop.f32.mrb[112].mxu0 }
 0x1e2   : > { %v5240_v51 = vpop.f32.mrb[112].mxu1  ;;  %v3716_v22 = vadd.f32 %v5330_v30, %v7230_v58  ;;  %v3707_v55 = vpop.f32.mrb[113].mxu0 }
 0x1e3   : > { %v5241_v39 = vpop.f32.mrb[113].mxu1  ;;  %v3708_v0 = vadd.f32 %v3707_v55, %v7218_v47  ;;  %v5331_v41 = vpop.f32.mrb[114].mxu0 }
 0x1e4   : > { %v5242_v11 = vadd.f32 %v5241_v39, %v5240_v51  ;;  %v5243_v42 = vpop.f32.mrb[114].mxu1  ;;  %v3719_v24 = vadd.f32 %v5331_v41, %v7236_v21  ;;  %v3710_v38 = vpop.f32.mrb[115].mxu0 }
 0x1e5   : > { %v5244_v23 = vpop.f32.mrb[115].mxu1  ;;  %v3711_v63 = vadd.f32 %v3710_v38, %v7224_v29 }
 0x1e6   : > { %v5245_v15 = vadd.f32 %v5244_v23, %v5243_v42  ;;  %v7322_v58 = vadd.f32 %v5242_v11, %v7215_v50  ;;  %v3835_v47 = vpack.c.bf16 %v3719_v24, %v3716_v22 }
 0x1e7   : > { %v3834_v48 = vpack.c.bf16 %v3711_v63, %v3708_v0 }
 0x1e8   : > { %v7325_v21 = vadd.f32 %v5245_v15, %v7221_v53  ;;  %4549 = vst [vmem:[%s7318_s29 + $0x8] sm:$0xff] %v3835_v47   ;;  %v3996_v13 = vunpack.c.l.bf16 %v3835_v47  ;;  %v3997_v43 = vunpack.c.h.bf16 %v3835_v47 }
 0x1e9   : > { %4458 = vst [vmem:[%s7318_s29] sm:$0xff] %v3834_v48   ;;  %v3994_v44 = vunpack.c.l.bf16 %v3834_v48  ;;  %v3995_v60 = vunpack.c.h.bf16 %v3834_v48  ;;  %v5334_v2 = vpop.f32.mrb[116].mxu0 }
 0x1ea   : > { %v5246_v19 = vpop.f32.mrb[116].mxu1  ;;  %v3732_v20 = vadd.f32 %v5334_v2, %v7254_v31  ;;  %v3723_v29 = vpop.f32.mrb[117].mxu0  ;;  %v4066_v53 = vmul.f32 %v3996_v13, %v3996_v13  ;;  %v4067_v39 = vmul.f32 %v3997_v43, %v3997_v43 }
 0x1eb   : > { %v5247_v7 = vpop.f32.mrb[117].mxu1  ;;  %v4026_v40 = vadd.f32 %v3995_v60, %v3994_v44  ;;  %v4064_v50 = vmul.f32 %v3994_v44, %v3994_v44  ;;  %v4065_v25 = vmul.f32 %v3995_v60, %v3995_v60  ;;  %v5335_v45 = vpop.f32.mrb[118].mxu0  ;;  %v3724_v35 = vadd.f32 %v3723_v29, %v7242_v54 }
 0x1ec   : > { %v5248_v49 = vadd.f32 %v5247_v7, %v5246_v19  ;;  %v5249_v61 = vpop.f32.mrb[118].mxu1  ;;  %v3735_v1 = vadd.f32 %v5335_v45, %v7260_v37  ;;  %v3726_v9 = vpop.f32.mrb[119].mxu0 }
 0x1ed   : > { %v5250_v17 = vpop.f32.mrb[119].mxu1  ;;  %v4027_v51 = vadd.f32 %v4026_v40, %v3996_v13  ;;  %v4096_v30 = vadd.f32 %v4065_v25, %v4064_v50  ;;  %v3727_v22 = vadd.f32 %v3726_v9, %v7248_v32 }
 0x1ee   : > { %v5251_v31 = vadd.f32 %v5250_v17, %v5249_v61  ;;  %v3837_v55 = vpack.c.bf16 %v3735_v1, %v3732_v20  ;;  %v7334_v11 = vadd.f32 %v5248_v49, %v7227_v12 }
 0x1ef   : > { %v4097_v0 = vadd.f32 %v4096_v30, %v4066_v53  ;;  %v3836_v42 = vpack.c.bf16 %v3727_v22, %v3724_v35  ;;  %v4028_v41 = vadd.f32 %v4027_v51, %v3997_v43 }
 0x1f0   : > { %v7337_v54 = vadd.f32 %v5251_v31, %v7233_v16  ;;  %4551 = vst [vmem:[%s7318_s29 + $0x18] sm:$0xff] %v3837_v55   ;;  %v4000_v63 = vunpack.c.l.bf16 %v3837_v55  ;;  %v4001_v2 = vunpack.c.h.bf16 %v3837_v55 }
 0x1f1   : > { %4550 = vst [vmem:[%s7318_s29 + $0x10] sm:$0xff] %v3836_v42   ;;  %v3998_v37 = vunpack.c.l.bf16 %v3836_v42  ;;  %v3999_v24 = vunpack.c.h.bf16 %v3836_v42  ;;  %v4098_v23 = vadd.f32 %v4097_v0, %v4067_v39  ;;  %v5338_v15 = vpop.f32.mrb[120].mxu0 }
 0x1f2   : > { %v5252_v38 = vpop.f32.mrb[120].mxu1  ;;  %v3748_v32 = vadd.f32 %v5338_v15, %v7278_v18  ;;  %v3739_v48 = vpop.f32.mrb[121].mxu0  ;;  %v4070_v49 = vmul.f32 %v4000_v63, %v4000_v63 }
 0x1f3   : > { %v5253_v47 = vpop.f32.mrb[121].mxu1  ;;  %v4029_v12 = vadd.f32 %v4028_v41, %v3998_v37  ;;  %v4068_v13 = vmul.f32 %v3998_v37, %v3998_v37  ;;  %v5339_v19 = vpop.f32.mrb[122].mxu0  ;;  %v4069_v16 = vmul.f32 %v3999_v24, %v3999_v24  ;;  %v3740_v43 = vadd.f32 %v3739_v48, %v7266_v28 }
 0x1f4   : > { %v5254_v44 = vadd.f32 %v5253_v47, %v5252_v38  ;;  %v5255_v60 = vpop.f32.mrb[122].mxu1  ;;  %v3751_v20 = vadd.f32 %v5339_v19, %v7284_v4  ;;  %v3742_v29 = vpop.f32.mrb[123].mxu0  ;;  %v4071_v4 = vmul.f32 %v4001_v2, %v4001_v2 }
 0x1f5   : > { %v5256_v7 = vpop.f32.mrb[123].mxu1  ;;  %v4030_v40 = vadd.f32 %v4029_v12, %v3999_v24  ;;  %v4099_v50 = vadd.f32 %v4098_v23, %v4068_v13  ;;  %v3743_v25 = vadd.f32 %v3742_v29, %v7272_v8 }
 0x1f6   : > { %v5257_v18 = vadd.f32 %v5256_v7, %v5255_v60  ;;  %v3839_v61 = vpack.c.bf16 %v3751_v20, %v3748_v32  ;;  %v7346_v45 = vadd.f32 %v5254_v44, %v7239_v62 }
 0x1f7   : > { %v4031_v53 = vadd.f32 %v4030_v40, %v4000_v63  ;;  %v4100_v35 = vadd.f32 %v4099_v50, %v4069_v16  ;;  %v3838_v1 = vpack.c.bf16 %v3743_v25, %v3740_v43 }
 0x1f8   : > { %v7349_v28 = vadd.f32 %v5257_v18, %v7245_v6  ;;  %4553 = vst [vmem:[%s7318_s29 + $0x28] sm:$0xff] %v3839_v61   ;;  %v4004_v22 = vunpack.c.l.bf16 %v3839_v61  ;;  %v4005_v0 = vunpack.c.h.bf16 %v3839_v61 }
 0x1f9   : > { %v4101_v17 = vadd.f32 %v4100_v35, %v4070_v49  ;;  %4552 = vst [vmem:[%s7318_s29 + $0x20] sm:$0xff] %v3838_v1   ;;  %v4002_v9 = vunpack.c.l.bf16 %v3838_v1  ;;  %v4003_v51 = vunpack.c.h.bf16 %v3838_v1  ;;  %v4032_v30 = vadd.f32 %v4031_v53, %v4001_v2  ;;  %v5342_v8 = vpop.f32.mrb[124].mxu0 }
 0x1fa   : > { %v5258_v31 = vpop.f32.mrb[124].mxu1  ;;  %v3764_v39 = vadd.f32 %v5342_v8, %v7302_v56  ;;  %v3755_v55 = vpop.f32.mrb[125].mxu0  ;;  %v4074_v44 = vmul.f32 %v4004_v22, %v4004_v22  ;;  %v4075_v20 = vmul.f32 %v4005_v0, %v4005_v0 }
 0x1fb   : > { %v5259_v62 = vpop.f32.mrb[125].mxu1  ;;  %v4033_v42 = vadd.f32 %v4032_v30, %v4002_v9  ;;  %v4072_v41 = vmul.f32 %v4002_v9, %v4002_v9  ;;  %v4102_v37 = vadd.f32 %v4101_v17, %v4071_v4  ;;  %v5343_v24 = vpop.f32.mrb[126].mxu0  ;;  %v4073_v23 = vmul.f32 %v4003_v51, %v4003_v51 }
 0x1fc   : > { %v5261_v6 = vpop.f32.mrb[126].mxu1  ;;  %v5260_v38 = vadd.f32 %v5259_v62, %v5258_v31  ;;  %v3756_v15 = vadd.f32 %v3755_v55, %v7290_v14  ;;  %v3767_v63 = vadd.f32 %v5343_v24, %v7308_v36  ;;  %v3758_v47 = vpop.f32.mrb[127].mxu0 }
 0x1fd   : > { %v5262_v32 = vpop.f32.mrb[127].mxu1  ;;  %v4034_v48 = vadd.f32 %v4033_v42, %v4003_v51  ;;  %v4103_v56 = vadd.f32 %v4102_v37, %v4072_v41  ;;  %v3759_v13 = vadd.f32 %v3758_v47, %v7296_v5 }
 0x1fe   : > { %v5263_v12 = vadd.f32 %v5262_v32, %v5261_v6  ;;  %v3841_v60 = vpack.c.bf16 %v3767_v63, %v3764_v39  ;;  %v3635_v19 = vadd.f32 %v5260_v38, %v7251_v59 }
 0x1ff   : > { %v4035_v2 = vadd.f32 %v4034_v48, %v4004_v22  ;;  %v4104_v16 = vadd.f32 %v4103_v56, %v4073_v23  ;;  %v3840_v43 = vpack.c.bf16 %v3759_v13, %v3756_v15 }
 0x200   : > { %v3638_v14 = vadd.f32 %v5263_v12, %v7257_v52  ;;  %4555 = vst [vmem:[%s7318_s29 + $0x38] sm:$0xff] %v3841_v60   ;;  %v4008_v25 = vunpack.c.l.bf16 %v3841_v60  ;;  %v4009_v59 = vunpack.c.h.bf16 %v3841_v60 }
 0x201   : > { %v4105_v36 = vadd.f32 %v4104_v16, %v4074_v44  ;;  %4554 = vst [vmem:[%s7318_s29 + $0x30] sm:$0xff] %v3840_v43   ;;  %v4006_v7 = vunpack.c.l.bf16 %v3840_v43  ;;  %v4007_v29 = vunpack.c.h.bf16 %v3840_v43  ;;  %v4036_v40 = vadd.f32 %v4035_v2, %v4005_v0  ;;  %v5346_v18 = vpop.f32.mrb[128].mxu0 }
 0x202   : > { %v5264_v50 = vpop.f32.mrb[128].mxu1  ;;  %v3780_v5 = vadd.f32 %v5346_v18, %v7334_v11  ;;  %v3771_v61 = vpop.f32.mrb[129].mxu0  ;;  %v4078_v55 = vmul.f32 %v4008_v25, %v4008_v25  ;;  %v4079_v24 = vmul.f32 %v4009_v59, %v4009_v59 }
 0x203   : > { %v5265_v49 = vpop.f32.mrb[129].mxu1  ;;  %v4037_v53 = vadd.f32 %v4036_v40, %v4006_v7  ;;  %v4076_v35 = vmul.f32 %v4006_v7, %v4006_v7  ;;  %v4106_v1 = vadd.f32 %v4105_v36, %v4075_v20  ;;  %v5347_v52 = vpop.f32.mrb[130].mxu0  ;;  %v4077_v17 = vmul.f32 %v4007_v29, %v4007_v29 }
 0x204   : > { %v5267_v4 = vpop.f32.mrb[130].mxu1  ;;  %v5266_v9 = vadd.f32 %v5265_v49, %v5264_v50  ;;  %v3772_v51 = vadd.f32 %v3771_v61, %v7322_v58  ;;  %v3783_v30 = vadd.f32 %v5347_v52, %v7337_v54  ;;  %v3774_v8 = vpop.f32.mrb[131].mxu0 }
 0x205   : > { %v5268_v31 = vpop.f32.mrb[131].mxu1  ;;  %v4038_v22 = vadd.f32 %v4037_v53, %v4007_v29  ;;  %v4107_v11 = vadd.f32 %v4106_v1, %v4076_v35  ;;  %v3775_v62 = vadd.f32 %v3774_v8, %v7325_v21 }
 0x206   : > { %v5269_v39 = vadd.f32 %v5268_v31, %v5267_v4  ;;  %v3843_v0 = vpack.c.bf16 %v3783_v30, %v3780_v5  ;;  %v3643_v42 = vadd.f32 %v5266_v9, %v7263_v10 }
 0x207   : > { %v4039_v41 = vadd.f32 %v4038_v22, %v4008_v25  ;;  %v4108_v37 = vadd.f32 %v4107_v11, %v4077_v17  ;;  %v3842_v6 = vpack.c.bf16 %v3775_v62, %v3772_v51 }
 0x208   : > { %v7367_v58 = vadd.f32 %v5269_v39, %v7269_v27  ;;  %4557 = vst [vmem:[%s7318_s29 + $0x48] sm:$0xff] %v3843_v0   ;;  %v4012_v21 = vunpack.c.l.bf16 %v3843_v0  ;;  %v4013_v10 = vunpack.c.h.bf16 %v3843_v0 }
 0x209   : > { %v4109_v54 = vadd.f32 %v4108_v37, %v4078_v55  ;;  %4556 = vst [vmem:[%s7318_s29 + $0x40] sm:$0xff] %v3842_v6   ;;  %v4010_v23 = vunpack.c.l.bf16 %v3842_v6  ;;  %v4011_v38 = vunpack.c.h.bf16 %v3842_v6  ;;  %v4040_v15 = vadd.f32 %v4039_v41, %v4009_v59  ;;  %v5350_v32 = vpop.f32.mrb[132].mxu0 }
 0x20a   : > { %v5270_v63 = vpop.f32.mrb[132].mxu1  ;;  %v3796_v47 = vadd.f32 %v5350_v32, %v3635_v19  ;;  %v3787_v56 = vpop.f32.mrb[133].mxu0  ;;  %v4082_v18 = vmul.f32 %v4012_v21, %v4012_v21 }
 0x20b   : > { %v5271_v48 = vpop.f32.mrb[133].mxu1  ;;  %v4041_v12 = vadd.f32 %v4040_v15, %v4010_v23  ;;  %v4080_v13 = vmul.f32 %v4010_v23, %v4010_v23  ;;  %v4110_v44 = vadd.f32 %v4109_v54, %v4079_v24  ;;  %v5351_v27 = vpop.f32.mrb[134].mxu0  ;;  %v4081_v2 = vmul.f32 %v4011_v38, %v4011_v38 }
 0x20c   : > { %v5273_v60 = vpop.f32.mrb[134].mxu1  ;;  %v5272_v16 = vadd.f32 %v5271_v48, %v5270_v63  ;;  %v3788_v43 = vadd.f32 %v3787_v56, %v7346_v45  ;;  %v3799_v20 = vadd.f32 %v5351_v27, %v3638_v14  ;;  %v3790_v7 = vpop.f32.mrb[135].mxu0  ;;  %v4083_v45 = vmul.f32 %v4013_v10, %v4013_v10 }
 0x20d   : > { %v5274_v36 = vpop.f32.mrb[135].mxu1  ;;  %v4042_v29 = vadd.f32 %v4041_v12, %v4011_v38  ;;  %v4111_v40 = vadd.f32 %v4110_v44, %v4080_v13  ;;  %v3791_v50 = vadd.f32 %v3790_v7, %v7349_v28 }
 0x20e   : > { %v5275_v19 = vadd.f32 %v5274_v36, %v5273_v60  ;;  %v3845_v25 = vpack.c.bf16 %v3799_v20, %v3796_v47  ;;  %v3651_v5 = vadd.f32 %v5272_v16, %v7275_v33 }
 0x20f   : > { %v4043_v49 = vadd.f32 %v4042_v29, %v4012_v21  ;;  %v4112_v61 = vadd.f32 %v4111_v40, %v4081_v2  ;;  %v3844_v59 = vpack.c.bf16 %v3791_v50, %v3788_v43 }
 0x210   : > { %v3654_v53 = vadd.f32 %v5275_v19, %v7281_v46  ;;  %4559 = vst [vmem:[%s7318_s29 + $0x58] sm:$0xff] %v3845_v25   ;;  %v4016_v9 = vunpack.c.l.bf16 %v3845_v25  ;;  %v4017_v31 = vunpack.c.h.bf16 %v3845_v25 }
 0x211   : > { %v4113_v14 = vadd.f32 %v4112_v61, %v4082_v18  ;;  %4558 = vst [vmem:[%s7318_s29 + $0x50] sm:$0xff] %v3844_v59   ;;  %v4014_v35 = vunpack.c.l.bf16 %v3844_v59  ;;  %v4015_v1 = vunpack.c.h.bf16 %v3844_v59  ;;  %v4044_v4 = vadd.f32 %v4043_v49, %v4013_v10  ;;  %v5354_v17 = vpop.f32.mrb[136].mxu0 }
 0x212   : > { %v5276_v52 = vpop.f32.mrb[136].mxu1  ;;  %v3812_v28 = vadd.f32 %v5354_v17, %v3651_v5  ;;  %v3803_v30 = vpop.f32.mrb[137].mxu0  ;;  %v4086_v38 = vmul.f32 %v4016_v9, %v4016_v9 }
 0x213   : > { %v5277_v51 = vpop.f32.mrb[137].mxu1  ;;  %v4045_v33 = vadd.f32 %v4044_v4, %v4014_v35  ;;  %v4084_v8 = vmul.f32 %v4014_v35, %v4014_v35  ;;  %v4114_v22 = vadd.f32 %v4113_v14, %v4083_v45  ;;  %v5355_v39 = vpop.f32.mrb[138].mxu0  ;;  %v4085_v46 = vmul.f32 %v4015_v1, %v4015_v1 }
 0x214   : > { %v5279_v11 = vpop.f32.mrb[138].mxu1  ;;  %v5278_v62 = vadd.f32 %v5277_v51, %v5276_v52  ;;  %v3804_v55 = vadd.f32 %v3803_v30, %v3643_v42  ;;  %v3815_v0 = vadd.f32 %v5355_v39, %v3654_v53  ;;  %v3806_v37 = vpop.f32.mrb[139].mxu0  ;;  %v4087_v42 = vmul.f32 %v4017_v31, %v4017_v31 }
 0x215   : > { %v5280_v41 = vpop.f32.mrb[139].mxu1  ;;  %v4046_v6 = vadd.f32 %v4045_v33, %v4015_v1  ;;  %v4115_v24 = vadd.f32 %v4114_v22, %v4084_v8  ;;  %v3807_v23 = vadd.f32 %v3806_v37, %v7367_v58 }
 0x216   : > { %v5281_v54 = vadd.f32 %v5280_v41, %v5279_v11  ;;  %v3847_v15 = vpack.c.bf16 %v3815_v0, %v3812_v28  ;;  %v3659_v63 = vadd.f32 %v5278_v62, %v7287_v57 }
 0x217   : > { %v4047_v32 = vadd.f32 %v4046_v6, %v4016_v9  ;;  %v4116_v21 = vadd.f32 %v4115_v24, %v4085_v46  ;;  %v3846_v47 = vpack.c.bf16 %v3807_v23, %v3804_v55 }
 0x218   : > { %v3662_v48 = vadd.f32 %v5281_v54, %v7293_v3  ;;  %4561 = vst [vmem:[%s7318_s29 + $0x68] sm:$0xff] %v3847_v15   ;;  %v4020_v27 = vunpack.c.l.bf16 %v3847_v15  ;;  %v4021_v7 = vunpack.c.h.bf16 %v3847_v15 }
 0x219   : > { %v4117_v56 = vadd.f32 %v4116_v21, %v4086_v38  ;;  %4560 = vst [vmem:[%s7318_s29 + $0x60] sm:$0xff] %v3846_v47   ;;  %v4018_v10 = vunpack.c.l.bf16 %v3846_v47  ;;  %v4019_v12 = vunpack.c.h.bf16 %v3846_v47  ;;  %v4048_v13 = vadd.f32 %v4047_v32, %v4017_v31  ;;  %v5358_v60 = vpop.f32.mrb[140].mxu0 }
 0x21a   : > { %v5282_v44 = vpop.f32.mrb[140].mxu1  ;;  %v3819_v2 = vpop.f32.mrb[141].mxu0  ;;  %v4090_v61 = vmul.f32 %v4020_v27, %v4020_v27  ;;  %v4091_v1 = vmul.f32 %v4021_v7, %v4021_v7 }
 0x21b   : > { %v5283_v58 = vpop.f32.mrb[141].mxu1  ;;  %v4049_v16 = vadd.f32 %v4048_v13, %v4018_v10  ;;  %v4088_v43 = vmul.f32 %v4018_v10, %v4018_v10  ;;  %v4118_v57 = vadd.f32 %v4117_v56, %v4087_v42  ;;  %v5359_v36 = vpop.f32.mrb[142].mxu0  ;;  %v4089_v29 = vmul.f32 %v4019_v12, %v4019_v12 }
 0x21c   : > { %v5285_v20 = vpop.f32.mrb[142].mxu1  ;;  %v5284_v3 = vadd.f32 %v5283_v58, %v5282_v44  ;;  %v3820_v40 = vadd.f32 %v3819_v2, %v3659_v63  ;;  %v3822_v50 = vpop.f32.mrb[143].mxu0 }
 0x21d   : > { %v5286_v19 = vpop.f32.mrb[143].mxu1  ;;  %v4050_v18 = vadd.f32 %v4049_v16, %v4019_v12  ;;  %v4119_v25 = vadd.f32 %v4118_v57, %v4088_v43  ;;  %v3823_v49 = vadd.f32 %v3822_v50, %v3662_v48 }
 0x21e   : > { %v5287_v5 = vadd.f32 %v5286_v19, %v5285_v20  ;;  %v3667_v59 = vadd.f32 %v5284_v3, %v7299_v26 }
 0x21f   : > { %v4051_v53 = vadd.f32 %v4050_v18, %v4020_v27  ;;  %v4120_v45 = vadd.f32 %v4119_v25, %v4089_v29  ;;  %v3848_v35 = vpack.c.bf16 %v3823_v49, %v3820_v40 }
 0x220   : > { %v3670_v14 = vadd.f32 %v5287_v5, %v7305_v34  ;;  %v3828_v4 = vadd.f32 %v5358_v60, %v3667_v59 }
 0x221   : > { %v4121_v52 = vadd.f32 %v4120_v45, %v4090_v61  ;;  %4562 = vst [vmem:[%s7318_s29 + $0x70] sm:$0xff] %v3848_v35   ;;  %v4022_v9 = vunpack.c.l.bf16 %v3848_v35  ;;  %v4023_v28 = vunpack.c.h.bf16 %v3848_v35  ;;  %v4052_v51 = vadd.f32 %v4051_v53, %v4021_v7 }
 0x222   : > { %v3831_v17 = vadd.f32 %v5359_v36, %v3670_v14 }
 0x223   : > { %v4092_v31 = vmul.f32 %v4022_v9, %v4022_v9  ;;  %v4122_v33 = vadd.f32 %v4121_v52, %v4091_v1  ;;  %v4053_v8 = vadd.f32 %v4052_v51, %v4022_v9  ;;  %v4093_v11 = vmul.f32 %v4023_v28, %v4023_v28 }
 0x224   : > { %v3849_v30 = vpack.c.bf16 %v3831_v17, %v3828_v4 }
 0x225   : > { %v4123_v34 = vadd.f32 %v4122_v33, %v4092_v31  ;;  %v4054_v39 = vadd.f32 %v4053_v8, %v4023_v28 }
 0x226   : > { %4563 = vst [vmem:[%s7318_s29 + $0x78] sm:$0xff] %v3849_v30   ;;  %v4024_v26 = vunpack.c.l.bf16 %v3849_v30  ;;  %v4025_v22 = vunpack.c.h.bf16 %v3849_v30 }
 0x227   : > { %v4124_v62 = vadd.f32 %v4123_v34, %v4093_v11 }
 0x228   : > { %v4094_v46 = vmul.f32 %v4024_v26, %v4024_v26  ;;  %v4055_v55 = vadd.f32 %v4054_v39, %v4024_v26  ;;  %v4095_v0 = vmul.f32 %v4025_v22, %v4025_v22 }
 0x22a   : > { %v4125_v41 = vadd.f32 %v4124_v62, %v4094_v46  ;;  %v4056_v37 = vadd.f32 %v4055_v55, %v4025_v22 }
 0x22c   : > { %v4126_v6 = vadd.f32 %v4125_v41, %v4095_v0  ;;  %v4057_v24 = vrot.slane %v4056_v37, 4 }
 0x22e   : > { %v4127_v54 = vrot.slane %v4126_v6, 4  ;;  %v4058_v23 = vadd.f32 %v4057_v24, %v4056_v37 }
 0x230   : > { %v4128_v38 = vadd.f32 %v4127_v54, %v4126_v6  ;;  %v4059_v15 = vrot.slane %v4058_v23, 2 }
 0x232   : > { %v4129_v63 = vrot.slane %v4128_v38, 2  ;;  %v4060_v32 = vadd.f32 %v4059_v15, %v4058_v23 }
 0x234   : > { %v4130_v21 = vadd.f32 %v4129_v63, %v4128_v38  ;;  %v4061_v47 = vrot.slane %v4060_v32, 1 }
 0x236   : > { %v4131_v48 = vrot.slane %v4130_v21, 1  ;;  %v4062_v42 = vadd.f32 %v4061_v47, %v4060_v32 }
 0x238   : > { %v4132_v56 = vadd.f32 %v4131_v48, %v4130_v21  ;;  %4063 = vst [vmem:[%s268_s30] sm:$0x1] %v4062_v42 }
 0x23a   : > { %4133 = vst [vmem:[%s271_s8] sm:$0x1] %v4132_v56 }
 0x23b PF: > { %s17_s21 = sadd.s32 1, %s5467_s21  }
 0x23c   : > { %p14_p5 = scmp.ge.s32.totalorder %s17_s21, 4  }
 0x23e   :  { %16 = sbr.rel (!%p14_p5) target bundleno = 1 (0x1), region = 90 }

</bundles_post_ra>
